<compile_context>
chip_gen: v7x
topology: tpu7x:2x2x1
jax: 0.10.0
libtpu: 0.0.40
codegen_flags: <defaults>
</compile_context>

<pallas_src>
import functools
import math

import jax
import jax.numpy as jnp
from jax import lax
from jax.experimental import pallas as pl
from jax.experimental.pallas import tpu as pltpu

VMEM = pl.BlockSpec(memory_space=pltpu.MemorySpace.VMEM)

GAT_ORDER = ('gcDy', 'gc1', 'gc2', 'gc3_0', 'gc3_1', 'gc4_0', 'gc4_1')


# ----------------------------------------------------------------------------
# dense single-head DGL GATConv + fused outer F.leaky_relu(0.01)
# (values in, values out -- runs inside the fused kernel)
# ----------------------------------------------------------------------------
def _gat(feat_bf, adj, z, wl, ar, bias):
    """feat_bf: (N,F) bf16; adj: (N,N) f32 mask adj[dst,src]; z: (N,F) f32
    precomputed feat @ W; wl: (1,F) bf16 precomputed attn_l @ W.T; ar/bias f32."""
    er = jnp.sum(z * ar, axis=-1, keepdims=True)                          # (N,1) dst score
    # src-score row produced directly from feat (not z) -> no dependency on the
    # z matmul and no XLU transpose.
    el = lax.dot_general(wl, feat_bf, (((1,), (1,)), ((), ())),
                         preferred_element_type=jnp.float32)              # (1,N)
    e = er + el                                                           # e[dst, src]
    e = jnp.where(e > 0, e, 0.2 * e)                                      # DGL leaky_relu(0.2)
    e = jnp.where(adj > 0, e, -1e30)                                      # mask non-edges
    m = jnp.max(e, axis=-1, keepdims=True)
    p = jnp.exp(e - m) * adj
    denom = jnp.sum(p, axis=-1, keepdims=True)
    alpha = p * pl.reciprocal(jnp.maximum(denom, 1e-20), approx=True)     # edge softmax
    rst = jnp.dot(alpha.astype(jnp.bfloat16), z.astype(jnp.bfloat16),
                  preferred_element_type=jnp.float32) + bias
    return jnp.where(rst > 0, rst, 0.01 * rst)                            # outer F.leaky_relu


# ----------------------------------------------------------------------------
# the single fused forward kernel
# ----------------------------------------------------------------------------
def _merge_lstm_kernel(
        # embedding + LSTM (fused i|f|g|o lane layout)
        x_ref, web_ref, beb_ref, wih_ref, whh_ref, blstm_ref,
        # static features + stacked static graphs
        st_ref, adj12_ref, adj3_ref, adj4_ref,
        # GAT params: gw3 = [W_dy|W_1|W_2] along lanes, gw4 = (gc3_0,gc3_1,gc4_0,gc4_1)
        gw3_ref, gw4_ref, gwl_ref, gar_ref, gb_ref,
        # merge head: wqk = (Q,K) stacked, bqk = (bQ,bK) stacked
        wqk_ref, bqk_ref, wlin_ref, blin_ref,
        # output
        o_ref,
        *, knn_w):
    f32, bf16 = jnp.float32, jnp.bfloat16
    npat = o_ref.shape[0]
    T = x_ref.shape[0] // npat
    nF = whh_ref.shape[0]

    # ---- eb Linear + ReLU over all T*npat rows (dropout = eval no-op) -------
    e = jnp.dot(x_ref[...], web_ref[...], preferred_element_type=f32) + beb_ref[...]
    e = jnp.maximum(e, 0.0)

    # ---- hoisted input->hidden projection: ONE (T*npat,nF)x(nF,4nF) matmul --
    ih = jnp.dot(e.astype(bf16), wih_ref[...], preferred_element_type=f32) + blstm_ref[...]

    # ---- LSTM recurrence: 1 fused MXU push + 2 full-vreg EUP passes / step --
    whh = whh_ref[...]
    h = jnp.zeros((npat, nF), f32)
    c = jnp.zeros((npat, nF), f32)
    for t in range(T):
        lo = t * npat
        pre = ih[lo:lo + npat] + jnp.dot(h.astype(bf16), whh,
                                         preferred_element_type=f32)      # (npat, 4nF)
        sg = jax.nn.sigmoid(pre)       # valid in the i | f | . | o lane blocks
        th = jnp.tanh(pre)             # valid in the . | . | g | . lane block
        gi = sg[:, 0 * nF:1 * nF]
        gf = sg[:, 1 * nF:2 * nF]
        gg = th[:, 2 * nF:3 * nF]
        go = sg[:, 3 * nF:4 * nF]
        c = gf * c + gi * gg
        h = go * jnp.tanh(c)
    # TODO(synk): optionally keep `whh` resident in the MXU across the T steps
    # via pltpu.matmul_push_rhs / matmul_acc_lhs / matmul_pop (verify a net win
    # with a bundle dump first).

    # ---- dynamic kNN adjacency adj_dy[dst, src] from the last hidden --------
    # column i of `score` orders candidates j exactly like ||h_j - h_i||^2 (the
    # column-constant +||h_i||^2 term is dropped -> no transposes).  Kept f32:
    # it feeds a discrete arg-min selection.
    gram = lax.dot_general(h, h, (((1,), (1,)), ((), ())),
                           preferred_element_type=f32)                    # h @ h.T
    score = jnp.sum(h * h, axis=-1, keepdims=True) - 2.0 * gram           # (npat, npat)
    work = score
    kth = jnp.min(work, axis=0, keepdims=True)
    for _ in range(knn_w - 1):
        work = jnp.where(work <= kth, 3.0e38, work)
        kth = jnp.min(work, axis=0, keepdims=True)
    # TODO(synk): like the original `d2 <= kth`, ties at the w-th distance can
    # admit more than w neighbours (sklearn kneighbors picks exactly w).
    adj_dy = (score <= kth).astype(f32)                                   # adj[dst, src]

    # ---- h2 = cat(h_last, static) --------------------------------------------
    h2 = jnp.concatenate([h, st_ref[...]], axis=1)                        # (npat, nF2)
    nF2 = h2.shape[1]
    h2_bf = h2.astype(bf16)

    # ---- GAT branches ---------------------------------------------------------
    # gcDy / gc1 / gc2 share the h2 input -> one (npat,nF2)x(nF2,3nF2) matmul.
    z3 = jnp.dot(h2_bf, gw3_ref[...], preferred_element_type=f32)         # (npat, 3*nF2)
    aft_dy = _gat(h2_bf, adj_dy,       z3[:, 0 * nF2:1 * nF2],
                  gwl_ref[0], gar_ref[0], gb_ref[0])
    aft1 = _gat(h2_bf, adj12_ref[0],   z3[:, 1 * nF2:2 * nF2],
                gwl_ref[1], gar_ref[1], gb_ref[1])
    aft2 = _gat(h2_bf, adj12_ref[1],   z3[:, 2 * nF2:3 * nF2],
                gwl_ref[2], gar_ref[2], gb_ref[2])

    def two_layer(adj_pair_ref, i0):
        # i0 = GAT_ORDER index of the first layer; gw4 index = i0 - 3
        n_total = adj_pair_ref.shape[1]
        bft = jnp.concatenate([h2, jnp.zeros((n_total - npat, nF2), f32)], axis=0)
        bft_bf = bft.astype(bf16)
        z_a = jnp.dot(bft_bf, gw4_ref[i0 - 3], preferred_element_type=f32)
        mid = _gat(bft_bf, adj_pair_ref[0], z_a,
                   gwl_ref[i0], gar_ref[i0], gb_ref[i0])
        mid_bf = mid.astype(bf16)
        z_b = jnp.dot(mid_bf, gw4_ref[i0 - 2], preferred_element_type=f32)
        out = _gat(mid_bf, adj_pair_ref[1], z_b,
                   gwl_ref[i0 + 1], gar_ref[i0 + 1], gb_ref[i0 + 1])
        return out[:npat]

    aft3 = two_layer(adj3_ref, 3)                                          # gc3_0 -> gc3_1
    aft4 = two_layer(adj4_ref, 5)                                          # gc4_0 -> gc4_1

    # ---- QKV attention merger over the 5 GNN branches ------------------------
    M = 5
    # branch order matches torch.cat((aft1, aft2, aft3, aft4, aft_dy), dim=1)
    xs = jnp.concatenate([aft1, aft2, aft3, aft4, aft_dy], axis=0)         # (M*npat, nF2)
    xs_bf = xs.astype(bf16)
    q = jnp.dot(h2_bf, wqk_ref[0], preferred_element_type=f32) + bqk_ref[0]   # (npat, dk)
    k = jnp.dot(xs_bf, wqk_ref[1], preferred_element_type=f32) + bqk_ref[1]   # (M*npat, dk)
    qt = jnp.concatenate([q] * M, axis=0)                                  # (M*npat, dk)
    dk = q.shape[1]
    s = jnp.sum(qt * k, axis=-1, keepdims=True) * (1.0 / math.sqrt(dk))    # (M*npat, 1)
    sb = [s[m * npat:(m + 1) * npat] for m in range(M)]                    # M x (npat, 1)
    smax = sb[0]
    for sv in sb[1:]:
        smax = jnp.maximum(smax, sv)
    pb = [jnp.exp(sv - smax) for sv in sb]
    denom = pb[0]
    for pv in pb[1:]:
        denom = denom + pv
    inv = pl.reciprocal(denom, approx=True)
    attn = jnp.zeros_like(h2)
    for m in range(M):                                                     # A @ V, V = X
        attn = attn + (pb[m] * inv) * xs[m * npat:(m + 1) * npat]

    # ---- final Linear on lane-dense cat(h2, attn) + log_softmax --------------
    bft = jnp.concatenate([h2, attn], axis=1)                              # (npat, 2*nF2)
    logits = jnp.dot(bft.astype(bf16), wlin_ref[...],
                     preferred_element_type=f32) + blin_ref[...]
    lmax = jnp.max(logits, axis=-1, keepdims=True)
    lse = jnp.log(jnp.sum(jnp.exp(logits - lmax), axis=-1, keepdims=True)) + lmax
    o_ref[...] = logits - lse                                              # log_softmax(dim=1)


# ----------------------------------------------------------------------------
# wrapper
# ----------------------------------------------------------------------------
def merge_lstm_forward(params, input_tensor, static_tensor, graphs_adj, w):
    npat, T, nF0 = input_tensor.shape
    nclass = params['wlin'].shape[1]
    bf16 = jnp.bfloat16

    # time-major, row-flattened LSTM input: row t*npat + p (bf16 matmul operand)
    x2d = jnp.transpose(input_tensor, (1, 0, 2)).reshape(T * npat, nF0).astype(bf16)

    # ---- trace-time weight prep: bf16 matmul operands + fused/stacked slabs --
    gw = [params[n][0] for n in GAT_ORDER]
    gal = [params[n][1] for n in GAT_ORDER]
    gw3 = jnp.concatenate(gw[:3], axis=1).astype(bf16)                     # (nF2, 3*nF2)
    gw4 = jnp.stack(gw[3:]).astype(bf16)                                   # (4, nF2, nF2)
    gwl = jnp.stack([jnp.dot(gal[i], gw[i].T) for i in range(7)]).astype(bf16)  # (7,1,nF2)
    gar = jnp.stack([params[n][2] for n in GAT_ORDER])                     # (7, 1, nF2)
    gb = jnp.stack([params[n][3] for n in GAT_ORDER])                      # (7, 1, nF2)

    adj12 = jnp.stack(graphs_adj[0:2])                                     # (2, npat, npat)
    adj3 = jnp.stack(graphs_adj[2:4])                                      # (2, n3, n3)
    adj4 = jnp.stack(graphs_adj[4:6])                                      # (2, n4, n4)

    wqk = jnp.stack([params['wq'], params['wk']]).astype(bf16)             # (2, nF2, dk)
    bqk = jnp.stack([params['bq'], params['bk']])                          # (2, 1, dk)

    kernel = functools.partial(_merge_lstm_kernel, knn_w=w)
    # TODO(synk): for many independent samples, add a leading sample grid axis
    # marked "parallel" (constant index_maps for the weight/adjacency inputs) so
    # v7x's second TensorCore is used and the weights stay VMEM-resident.
    return pl.pallas_call(
        kernel,
        out_shape=jax.ShapeDtypeStruct((npat, nclass), jnp.float32),
        in_specs=[VMEM] * 19,
        out_specs=VMEM,
    )(x2d, params['eb_w'].astype(bf16), params['eb_b'],
      params['lstm_wih'].astype(bf16), params['lstm_whh'].astype(bf16),
      params['lstm_b'],
      static_tensor, adj12, adj3, adj4,
      gw3, gw4, gwl, gar, gb,
      wqk, bqk,
      params['wlin'].astype(bf16), params['blin'])


# ----------------------------------------------------------------------------
# params / inputs
# ----------------------------------------------------------------------------
def init_params(key, nF0, nF, nF2, nclass, attn_dk):
    ks = iter(jax.random.split(key, 64))

    def mat(shape, scale):
        return jax.random.normal(next(ks), shape, jnp.float32) * scale

    p = {
        'eb_w': mat((nF0, nF), 1.0 / math.sqrt(nF0)),
        'eb_b': mat((1, nF), 0.01),
        # LSTM weights in fused i|f|g|o lane layout; bias = b_ih + b_hh merged.
        'lstm_wih': mat((nF, 4 * nF), 1.0 / math.sqrt(nF)),
        'lstm_whh': mat((nF, 4 * nF), 1.0 / math.sqrt(nF)),
        'lstm_b': mat((1, 4 * nF), 0.01),
        'wq': mat((nF2, attn_dk), 1.0 / math.sqrt(nF2)),
        'bq': mat((1, attn_dk), 0.01),
        'wk': mat((nF2, attn_dk), 1.0 / math.sqrt(nF2)),
        'bk': mat((1, attn_dk), 0.01),
        'wlin': mat((2 * nF2, nclass), 1.0 / math.sqrt(2 * nF2)),
        'blin': mat((1, nclass), 0.01),
    }
    for name in GAT_ORDER:
        p[name] = (mat((nF2, nF2), 1.0 / math.sqrt(nF2)),   # W
                   mat((1, nF2), 0.1),                      # attn_l
                   mat((1, nF2), 0.1),                      # attn_r
                   mat((1, nF2), 0.01))                     # bias
    return p


def random_adj(key, n, p=0.35):
    a = (jax.random.uniform(key, (n, n)) < p).astype(jnp.float32)
    return jnp.maximum(a, jnp.eye(n, dtype=jnp.float32))     # adj[dst, src], self-loops


# ----------------------------------------------------------------------------
# main
# ----------------------------------------------------------------------------
if __name__ == "__main__":
    npat, T = 8, 8
    nF0, nF, static_features = 16, 32, 32
    nF2 = nF + static_features
    nheads, attn_dk, nclass, w = 1, 16, 8, 3
    n_gender_extra, n_services_extra = 2, 4

    key = jax.random.PRNGKey(0)
    k_in, k_static, k_par, kg0, kg1, kg2, kg3, kg4, kg5 = jax.random.split(key, 9)

    input_tensor = jax.random.normal(k_in, (npat, T, nF0), jnp.float32)
    static_tensor = jax.random.normal(k_static, (npat, static_features), jnp.float32)

    graphs_adj = [
        random_adj(kg0, npat),
        random_adj(kg1, npat),
        random_adj(kg2, npat + n_gender_extra),
        random_adj(kg3, npat + n_gender_extra),
        random_adj(kg4, npat + n_services_extra),
        random_adj(kg5, npat + n_services_extra),
    ]

    params = init_params(k_par, nF0, nF, nF2, nclass, attn_dk)

    out = merge_lstm_forward(params, input_tensor, static_tensor, graphs_adj, w)
    out = jax.block_until_ready(out)

    assert out.shape == (npat, nclass), out.shape
    assert bool(jnp.all(jnp.isfinite(out)))
    print("KERNEL_OK")
</pallas_src>

<mosaic_0001>
module attributes {stable_mosaic.version = 11 : i64} {
  func.func @_merge_lstm_kernel(%arg0: memref<64x16xbf16, #tpu.memory_space<vmem>>, %arg1: memref<16x32xbf16, #tpu.memory_space<vmem>>, %arg2: memref<1x32xf32, #tpu.memory_space<vmem>>, %arg3: memref<32x128xbf16, #tpu.memory_space<vmem>>, %arg4: memref<32x128xbf16, #tpu.memory_space<vmem>>, %arg5: memref<1x128xf32, #tpu.memory_space<vmem>>, %arg6: memref<8x32xf32, #tpu.memory_space<vmem>>, %arg7: memref<2x8x8xf32, #tpu.memory_space<vmem>>, %arg8: memref<2x10x10xf32, #tpu.memory_space<vmem>>, %arg9: memref<2x12x12xf32, #tpu.memory_space<vmem>>, %arg10: memref<64x192xbf16, #tpu.memory_space<vmem>>, %arg11: memref<4x64x64xbf16, #tpu.memory_space<vmem>>, %arg12: memref<7x1x64xbf16, #tpu.memory_space<vmem>>, %arg13: memref<7x1x64xf32, #tpu.memory_space<vmem>>, %arg14: memref<7x1x64xf32, #tpu.memory_space<vmem>>, %arg15: memref<2x64x16xbf16, #tpu.memory_space<vmem>>, %arg16: memref<2x1x16xf32, #tpu.memory_space<vmem>>, %arg17: memref<128x8xbf16, #tpu.memory_space<vmem>>, %arg18: memref<1x8xf32, #tpu.memory_space<vmem>>, %arg19: memref<8x8xf32, #tpu.memory_space<vmem>>) attributes {dimension_semantics = [], scalar_prefetch = 0 : i64, scratch_operands = 0 : i64, tpu.core_type = #tpu.core_type<tc>} {
    %c0 = arith.constant 0 : index
    %c0_0 = arith.constant 0 : index
    %0 = vector.load %arg0[%c0, %c0_0] : memref<64x16xbf16, #tpu.memory_space<vmem>>, vector<64x16xbf16>
    %c0_1 = arith.constant 0 : index
    %c0_2 = arith.constant 0 : index
    %1 = vector.load %arg1[%c0_1, %c0_2] : memref<16x32xbf16, #tpu.memory_space<vmem>>, vector<16x32xbf16>
    %cst = arith.constant dense<0.000000e+00> : vector<64x32xf32>
    %2 = tpu.matmul %0, %1, %cst {dimension_numbers = #tpu.dot_dimension_numbers<[1], [0], [0], [1], [0, 0, 1, 1], [], []>} : vector<64x16xbf16>, vector<16x32xbf16>, vector<64x32xf32> -> vector<64x32xf32>
    %c0_3 = arith.constant 0 : index
    %c0_4 = arith.constant 0 : index
    %3 = vector.load %arg2[%c0_3, %c0_4] : memref<1x32xf32, #tpu.memory_space<vmem>>, vector<1x32xf32>
    %4 = vector.broadcast %3 : vector<1x32xf32> to vector<64x32xf32>
    %5 = arith.addf %2, %4 : vector<64x32xf32>
    %cst_5 = arith.constant 0.000000e+00 : f32
    %6 = vector.broadcast %cst_5 : f32 to vector<64x32xf32>
    %7 = arith.maximumf %5, %6 : vector<64x32xf32>
    %8 = arith.truncf %7 : vector<64x32xf32> to vector<64x32xbf16>
    %c0_6 = arith.constant 0 : index
    %c0_7 = arith.constant 0 : index
    %9 = vector.load %arg3[%c0_6, %c0_7] : memref<32x128xbf16, #tpu.memory_space<vmem>>, vector<32x128xbf16>
    %cst_8 = arith.constant dense<0.000000e+00> : vector<64x128xf32>
    %10 = tpu.matmul %8, %9, %cst_8 {dimension_numbers = #tpu.dot_dimension_numbers<[1], [0], [0], [1], [0, 0, 1, 1], [], []>} : vector<64x32xbf16>, vector<32x128xbf16>, vector<64x128xf32> -> vector<64x128xf32>
    %c0_9 = arith.constant 0 : index
    %c0_10 = arith.constant 0 : index
    %11 = vector.load %arg5[%c0_9, %c0_10] : memref<1x128xf32, #tpu.memory_space<vmem>>, vector<1x128xf32>
    %12 = vector.broadcast %11 : vector<1x128xf32> to vector<64x128xf32>
    %13 = arith.addf %10, %12 : vector<64x128xf32>
    %c0_11 = arith.constant 0 : index
    %c0_12 = arith.constant 0 : index
    %14 = vector.load %arg4[%c0_11, %c0_12] : memref<32x128xbf16, #tpu.memory_space<vmem>>, vector<32x128xbf16>
    %cst_13 = arith.constant 0.000000e+00 : f32
    %15 = vector.broadcast %cst_13 : f32 to vector<8x32xf32>
    %cst_14 = arith.constant 0.000000e+00 : f32
    %16 = vector.broadcast %cst_14 : f32 to vector<8x32xf32>
    %17 = vector.extract_strided_slice %13 {offsets = [0, 0], sizes = [8, 128], strides = [1, 1]} : vector<64x128xf32> to vector<8x128xf32>
    %18 = arith.truncf %15 : vector<8x32xf32> to vector<8x32xbf16>
    %cst_15 = arith.constant dense<0.000000e+00> : vector<8x128xf32>
    %19 = tpu.matmul %18, %14, %cst_15 {dimension_numbers = #tpu.dot_dimension_numbers<[1], [0], [0], [1], [0, 0, 1, 1], [], []>} : vector<8x32xbf16>, vector<32x128xbf16>, vector<8x128xf32> -> vector<8x128xf32>
    %20 = arith.addf %17, %19 : vector<8x128xf32>
    %21 = arith.negf %20 : vector<8x128xf32>
    %22 = math.exp %21 : vector<8x128xf32>
    %cst_16 = arith.constant 1.000000e+00 : f32
    %23 = vector.broadcast %cst_16 : f32 to vector<8x128xf32>
    %24 = arith.addf %23, %22 : vector<8x128xf32>
    %25 = arith.divf %23, %24 : vector<8x128xf32>
    %26 = math.tanh %20 : vector<8x128xf32>
    %27 = vector.extract_strided_slice %25 {offsets = [0, 0], sizes = [8, 32], strides = [1, 1]} : vector<8x128xf32> to vector<8x32xf32>
    %28 = vector.extract_strided_slice %25 {offsets = [0, 32], sizes = [8, 32], strides = [1, 1]} : vector<8x128xf32> to vector<8x32xf32>
    %29 = vector.extract_strided_slice %26 {offsets = [0, 64], sizes = [8, 32], strides = [1, 1]} : vector<8x128xf32> to vector<8x32xf32>
    %30 = vector.extract_strided_slice %25 {offsets = [0, 96], sizes = [8, 32], strides = [1, 1]} : vector<8x128xf32> to vector<8x32xf32>
    %31 = arith.mulf %28, %16 : vector<8x32xf32>
    %32 = arith.mulf %27, %29 : vector<8x32xf32>
    %33 = arith.addf %31, %32 : vector<8x32xf32>
    %34 = math.tanh %33 : vector<8x32xf32>
    %35 = arith.mulf %30, %34 : vector<8x32xf32>
    %36 = vector.extract_strided_slice %13 {offsets = [8, 0], sizes = [8, 128], strides = [1, 1]} : vector<64x128xf32> to vector<8x128xf32>
    %37 = arith.truncf %35 : vector<8x32xf32> to vector<8x32xbf16>
    %cst_17 = arith.constant dense<0.000000e+00> : vector<8x128xf32>
    %38 = tpu.matmul %37, %14, %cst_17 {dimension_numbers = #tpu.dot_dimension_numbers<[1], [0], [0], [1], [0, 0, 1, 1], [], []>} : vector<8x32xbf16>, vector<32x128xbf16>, vector<8x128xf32> -> vector<8x128xf32>
    %39 = arith.addf %36, %38 : vector<8x128xf32>
    %40 = arith.negf %39 : vector<8x128xf32>
    %41 = math.exp %40 : vector<8x128xf32>
    %cst_18 = arith.constant 1.000000e+00 : f32
    %42 = vector.broadcast %cst_18 : f32 to vector<8x128xf32>
    %43 = arith.addf %42, %41 : vector<8x128xf32>
    %44 = arith.divf %42, %43 : vector<8x128xf32>
    %45 = math.tanh %39 : vector<8x128xf32>
    %46 = vector.extract_strided_slice %44 {offsets = [0, 0], sizes = [8, 32], strides = [1, 1]} : vector<8x128xf32> to vector<8x32xf32>
    %47 = vector.extract_strided_slice %44 {offsets = [0, 32], sizes = [8, 32], strides = [1, 1]} : vector<8x128xf32> to vector<8x32xf32>
    %48 = vector.extract_strided_slice %45 {offsets = [0, 64], sizes = [8, 32], strides = [1, 1]} : vector<8x128xf32> to vector<8x32xf32>
    %49 = vector.extract_strided_slice %44 {offsets = [0, 96], sizes = [8, 32], strides = [1, 1]} : vector<8x128xf32> to vector<8x32xf32>
    %50 = arith.mulf %47, %33 : vector<8x32xf32>
    %51 = arith.mulf %46, %48 : vector<8x32xf32>
    %52 = arith.addf %50, %51 : vector<8x32xf32>
    %53 = math.tanh %52 : vector<8x32xf32>
    %54 = arith.mulf %49, %53 : vector<8x32xf32>
    %55 = vector.extract_strided_slice %13 {offsets = [16, 0], sizes = [8, 128], strides = [1, 1]} : vector<64x128xf32> to vector<8x128xf32>
    %56 = arith.truncf %54 : vector<8x32xf32> to vector<8x32xbf16>
    %cst_19 = arith.constant dense<0.000000e+00> : vector<8x128xf32>
    %57 = tpu.matmul %56, %14, %cst_19 {dimension_numbers = #tpu.dot_dimension_numbers<[1], [0], [0], [1], [0, 0, 1, 1], [], []>} : vector<8x32xbf16>, vector<32x128xbf16>, vector<8x128xf32> -> vector<8x128xf32>
    %58 = arith.addf %55, %57 : vector<8x128xf32>
    %59 = arith.negf %58 : vector<8x128xf32>
    %60 = math.exp %59 : vector<8x128xf32>
    %cst_20 = arith.constant 1.000000e+00 : f32
    %61 = vector.broadcast %cst_20 : f32 to vector<8x128xf32>
    %62 = arith.addf %61, %60 : vector<8x128xf32>
    %63 = arith.divf %61, %62 : vector<8x128xf32>
    %64 = math.tanh %58 : vector<8x128xf32>
    %65 = vector.extract_strided_slice %63 {offsets = [0, 0], sizes = [8, 32], strides = [1, 1]} : vector<8x128xf32> to vector<8x32xf32>
    %66 = vector.extract_strided_slice %63 {offsets = [0, 32], sizes = [8, 32], strides = [1, 1]} : vector<8x128xf32> to vector<8x32xf32>
    %67 = vector.extract_strided_slice %64 {offsets = [0, 64], sizes = [8, 32], strides = [1, 1]} : vector<8x128xf32> to vector<8x32xf32>
    %68 = vector.extract_strided_slice %63 {offsets = [0, 96], sizes = [8, 32], strides = [1, 1]} : vector<8x128xf32> to vector<8x32xf32>
    %69 = arith.mulf %66, %52 : vector<8x32xf32>
    %70 = arith.mulf %65, %67 : vector<8x32xf32>
    %71 = arith.addf %69, %70 : vector<8x32xf32>
    %72 = math.tanh %71 : vector<8x32xf32>
    %73 = arith.mulf %68, %72 : vector<8x32xf32>
    %74 = vector.extract_strided_slice %13 {offsets = [24, 0], sizes = [8, 128], strides = [1, 1]} : vector<64x128xf32> to vector<8x128xf32>
    %75 = arith.truncf %73 : vector<8x32xf32> to vector<8x32xbf16>
    %cst_21 = arith.constant dense<0.000000e+00> : vector<8x128xf32>
    %76 = tpu.matmul %75, %14, %cst_21 {dimension_numbers = #tpu.dot_dimension_numbers<[1], [0], [0], [1], [0, 0, 1, 1], [], []>} : vector<8x32xbf16>, vector<32x128xbf16>, vector<8x128xf32> -> vector<8x128xf32>
    %77 = arith.addf %74, %76 : vector<8x128xf32>
    %78 = arith.negf %77 : vector<8x128xf32>
    %79 = math.exp %78 : vector<8x128xf32>
    %cst_22 = arith.constant 1.000000e+00 : f32
    %80 = vector.broadcast %cst_22 : f32 to vector<8x128xf32>
    %81 = arith.addf %80, %79 : vector<8x128xf32>
    %82 = arith.divf %80, %81 : vector<8x128xf32>
    %83 = math.tanh %77 : vector<8x128xf32>
    %84 = vector.extract_strided_slice %82 {offsets = [0, 0], sizes = [8, 32], strides = [1, 1]} : vector<8x128xf32> to vector<8x32xf32>
    %85 = vector.extract_strided_slice %82 {offsets = [0, 32], sizes = [8, 32], strides = [1, 1]} : vector<8x128xf32> to vector<8x32xf32>
    %86 = vector.extract_strided_slice %83 {offsets = [0, 64], sizes = [8, 32], strides = [1, 1]} : vector<8x128xf32> to vector<8x32xf32>
    %87 = vector.extract_strided_slice %82 {offsets = [0, 96], sizes = [8, 32], strides = [1, 1]} : vector<8x128xf32> to vector<8x32xf32>
    %88 = arith.mulf %85, %71 : vector<8x32xf32>
    %89 = arith.mulf %84, %86 : vector<8x32xf32>
    %90 = arith.addf %88, %89 : vector<8x32xf32>
    %91 = math.tanh %90 : vector<8x32xf32>
    %92 = arith.mulf %87, %91 : vector<8x32xf32>
    %93 = vector.extract_strided_slice %13 {offsets = [32, 0], sizes = [8, 128], strides = [1, 1]} : vector<64x128xf32> to vector<8x128xf32>
    %94 = arith.truncf %92 : vector<8x32xf32> to vector<8x32xbf16>
    %cst_23 = arith.constant dense<0.000000e+00> : vector<8x128xf32>
    %95 = tpu.matmul %94, %14, %cst_23 {dimension_numbers = #tpu.dot_dimension_numbers<[1], [0], [0], [1], [0, 0, 1, 1], [], []>} : vector<8x32xbf16>, vector<32x128xbf16>, vector<8x128xf32> -> vector<8x128xf32>
    %96 = arith.addf %93, %95 : vector<8x128xf32>
    %97 = arith.negf %96 : vector<8x128xf32>
    %98 = math.exp %97 : vector<8x128xf32>
    %cst_24 = arith.constant 1.000000e+00 : f32
    %99 = vector.broadcast %cst_24 : f32 to vector<8x128xf32>
    %100 = arith.addf %99, %98 : vector<8x128xf32>
    %101 = arith.divf %99, %100 : vector<8x128xf32>
    %102 = math.tanh %96 : vector<8x128xf32>
    %103 = vector.extract_strided_slice %101 {offsets = [0, 0], sizes = [8, 32], strides = [1, 1]} : vector<8x128xf32> to vector<8x32xf32>
    %104 = vector.extract_strided_slice %101 {offsets = [0, 32], sizes = [8, 32], strides = [1, 1]} : vector<8x128xf32> to vector<8x32xf32>
    %105 = vector.extract_strided_slice %102 {offsets = [0, 64], sizes = [8, 32], strides = [1, 1]} : vector<8x128xf32> to vector<8x32xf32>
    %106 = vector.extract_strided_slice %101 {offsets = [0, 96], sizes = [8, 32], strides = [1, 1]} : vector<8x128xf32> to vector<8x32xf32>
    %107 = arith.mulf %104, %90 : vector<8x32xf32>
    %108 = arith.mulf %103, %105 : vector<8x32xf32>
    %109 = arith.addf %107, %108 : vector<8x32xf32>
    %110 = math.tanh %109 : vector<8x32xf32>
    %111 = arith.mulf %106, %110 : vector<8x32xf32>
    %112 = vector.extract_strided_slice %13 {offsets = [40, 0], sizes = [8, 128], strides = [1, 1]} : vector<64x128xf32> to vector<8x128xf32>
    %113 = arith.truncf %111 : vector<8x32xf32> to vector<8x32xbf16>
    %cst_25 = arith.constant dense<0.000000e+00> : vector<8x128xf32>
    %114 = tpu.matmul %113, %14, %cst_25 {dimension_numbers = #tpu.dot_dimension_numbers<[1], [0], [0], [1], [0, 0, 1, 1], [], []>} : vector<8x32xbf16>, vector<32x128xbf16>, vector<8x128xf32> -> vector<8x128xf32>
    %115 = arith.addf %112, %114 : vector<8x128xf32>
    %116 = arith.negf %115 : vector<8x128xf32>
    %117 = math.exp %116 : vector<8x128xf32>
    %cst_26 = arith.constant 1.000000e+00 : f32
    %118 = vector.broadcast %cst_26 : f32 to vector<8x128xf32>
    %119 = arith.addf %118, %117 : vector<8x128xf32>
    %120 = arith.divf %118, %119 : vector<8x128xf32>
    %121 = math.tanh %115 : vector<8x128xf32>
    %122 = vector.extract_strided_slice %120 {offsets = [0, 0], sizes = [8, 32], strides = [1, 1]} : vector<8x128xf32> to vector<8x32xf32>
    %123 = vector.extract_strided_slice %120 {offsets = [0, 32], sizes = [8, 32], strides = [1, 1]} : vector<8x128xf32> to vector<8x32xf32>
    %124 = vector.extract_strided_slice %121 {offsets = [0, 64], sizes = [8, 32], strides = [1, 1]} : vector<8x128xf32> to vector<8x32xf32>
    %125 = vector.extract_strided_slice %120 {offsets = [0, 96], sizes = [8, 32], strides = [1, 1]} : vector<8x128xf32> to vector<8x32xf32>
    %126 = arith.mulf %123, %109 : vector<8x32xf32>
    %127 = arith.mulf %122, %124 : vector<8x32xf32>
    %128 = arith.addf %126, %127 : vector<8x32xf32>
    %129 = math.tanh %128 : vector<8x32xf32>
    %130 = arith.mulf %125, %129 : vector<8x32xf32>
    %131 = vector.extract_strided_slice %13 {offsets = [48, 0], sizes = [8, 128], strides = [1, 1]} : vector<64x128xf32> to vector<8x128xf32>
    %132 = arith.truncf %130 : vector<8x32xf32> to vector<8x32xbf16>
    %cst_27 = arith.constant dense<0.000000e+00> : vector<8x128xf32>
    %133 = tpu.matmul %132, %14, %cst_27 {dimension_numbers = #tpu.dot_dimension_numbers<[1], [0], [0], [1], [0, 0, 1, 1], [], []>} : vector<8x32xbf16>, vector<32x128xbf16>, vector<8x128xf32> -> vector<8x128xf32>
    %134 = arith.addf %131, %133 : vector<8x128xf32>
    %135 = arith.negf %134 : vector<8x128xf32>
    %136 = math.exp %135 : vector<8x128xf32>
    %cst_28 = arith.constant 1.000000e+00 : f32
    %137 = vector.broadcast %cst_28 : f32 to vector<8x128xf32>
    %138 = arith.addf %137, %136 : vector<8x128xf32>
    %139 = arith.divf %137, %138 : vector<8x128xf32>
    %140 = math.tanh %134 : vector<8x128xf32>
    %141 = vector.extract_strided_slice %139 {offsets = [0, 0], sizes = [8, 32], strides = [1, 1]} : vector<8x128xf32> to vector<8x32xf32>
    %142 = vector.extract_strided_slice %139 {offsets = [0, 32], sizes = [8, 32], strides = [1, 1]} : vector<8x128xf32> to vector<8x32xf32>
    %143 = vector.extract_strided_slice %140 {offsets = [0, 64], sizes = [8, 32], strides = [1, 1]} : vector<8x128xf32> to vector<8x32xf32>
    %144 = vector.extract_strided_slice %139 {offsets = [0, 96], sizes = [8, 32], strides = [1, 1]} : vector<8x128xf32> to vector<8x32xf32>
    %145 = arith.mulf %142, %128 : vector<8x32xf32>
    %146 = arith.mulf %141, %143 : vector<8x32xf32>
    %147 = arith.addf %145, %146 : vector<8x32xf32>
    %148 = math.tanh %147 : vector<8x32xf32>
    %149 = arith.mulf %144, %148 : vector<8x32xf32>
    %150 = vector.extract_strided_slice %13 {offsets = [56, 0], sizes = [8, 128], strides = [1, 1]} : vector<64x128xf32> to vector<8x128xf32>
    %151 = arith.truncf %149 : vector<8x32xf32> to vector<8x32xbf16>
    %cst_29 = arith.constant dense<0.000000e+00> : vector<8x128xf32>
    %152 = tpu.matmul %151, %14, %cst_29 {dimension_numbers = #tpu.dot_dimension_numbers<[1], [0], [0], [1], [0, 0, 1, 1], [], []>} : vector<8x32xbf16>, vector<32x128xbf16>, vector<8x128xf32> -> vector<8x128xf32>
    %153 = arith.addf %150, %152 : vector<8x128xf32>
    %154 = arith.negf %153 : vector<8x128xf32>
    %155 = math.exp %154 : vector<8x128xf32>
    %cst_30 = arith.constant 1.000000e+00 : f32
    %156 = vector.broadcast %cst_30 : f32 to vector<8x128xf32>
    %157 = arith.addf %156, %155 : vector<8x128xf32>
    %158 = arith.divf %156, %157 : vector<8x128xf32>
    %159 = math.tanh %153 : vector<8x128xf32>
    %160 = vector.extract_strided_slice %158 {offsets = [0, 0], sizes = [8, 32], strides = [1, 1]} : vector<8x128xf32> to vector<8x32xf32>
    %161 = vector.extract_strided_slice %158 {offsets = [0, 32], sizes = [8, 32], strides = [1, 1]} : vector<8x128xf32> to vector<8x32xf32>
    %162 = vector.extract_strided_slice %159 {offsets = [0, 64], sizes = [8, 32], strides = [1, 1]} : vector<8x128xf32> to vector<8x32xf32>
    %163 = vector.extract_strided_slice %158 {offsets = [0, 96], sizes = [8, 32], strides = [1, 1]} : vector<8x128xf32> to vector<8x32xf32>
    %164 = arith.mulf %161, %147 : vector<8x32xf32>
    %165 = arith.mulf %160, %162 : vector<8x32xf32>
    %166 = arith.addf %164, %165 : vector<8x32xf32>
    %167 = math.tanh %166 : vector<8x32xf32>
    %168 = arith.mulf %163, %167 : vector<8x32xf32>
    %cst_31 = arith.constant dense<0.000000e+00> : vector<8x8xf32>
    %169 = tpu.matmul %168, %168, %cst_31 {dimension_numbers = #tpu.dot_dimension_numbers<[1], [1], [0], [0], [0, 0, 1, 0], [], []>} : vector<8x32xf32>, vector<8x32xf32>, vector<8x8xf32> -> vector<8x8xf32>
    %170 = arith.mulf %168, %168 : vector<8x32xf32>
    %cst_32 = arith.constant dense<0.000000e+00> : vector<8xf32>
    %171 = vector.multi_reduction <add>, %170, %cst_32 [1] : vector<8x32xf32> to vector<8xf32>
    %172 = vector.shape_cast %171 : vector<8xf32> to vector<8x1xf32>
    %cst_33 = arith.constant 2.000000e+00 : f32
    %173 = vector.broadcast %cst_33 : f32 to vector<8x8xf32>
    %174 = arith.mulf %173, %169 : vector<8x8xf32>
    %175 = vector.broadcast %172 : vector<8x1xf32> to vector<8x8xf32>
    %176 = arith.subf %175, %174 : vector<8x8xf32>
    %cst_34 = arith.constant dense<0x7F800000> : vector<8xf32>
    %177 = vector.multi_reduction <minimumf>, %176, %cst_34 [0] : vector<8x8xf32> to vector<8xf32>
    %178 = vector.shape_cast %177 : vector<8xf32> to vector<1x8xf32>
    %179 = vector.broadcast %178 : vector<1x8xf32> to vector<8x8xf32>
    %180 = arith.cmpf ole, %176, %179 : vector<8x8xf32>
    %cst_35 = arith.constant 3.000000e+38 : f32
    %181 = vector.broadcast %cst_35 : f32 to vector<8x8xf32>
    %182 = arith.select %180, %181, %176 : vector<8x8xi1>, vector<8x8xf32>
    %cst_36 = arith.constant dense<0x7F800000> : vector<8xf32>
    %183 = vector.multi_reduction <minimumf>, %182, %cst_36 [0] : vector<8x8xf32> to vector<8xf32>
    %184 = vector.shape_cast %183 : vector<8xf32> to vector<1x8xf32>
    %185 = vector.broadcast %184 : vector<1x8xf32> to vector<8x8xf32>
    %186 = arith.cmpf ole, %182, %185 : vector<8x8xf32>
    %cst_37 = arith.constant 3.000000e+38 : f32
    %187 = vector.broadcast %cst_37 : f32 to vector<8x8xf32>
    %188 = arith.select %186, %187, %182 : vector<8x8xi1>, vector<8x8xf32>
    %cst_38 = arith.constant dense<0x7F800000> : vector<8xf32>
    %189 = vector.multi_reduction <minimumf>, %188, %cst_38 [0] : vector<8x8xf32> to vector<8xf32>
    %190 = vector.shape_cast %189 : vector<8xf32> to vector<1x8xf32>
    %191 = vector.broadcast %190 : vector<1x8xf32> to vector<8x8xf32>
    %192 = arith.cmpf ole, %176, %191 : vector<8x8xf32>
    %193 = arith.extui %192 : vector<8x8xi1> to vector<8x8xi32>
    %194 = arith.sitofp %193 : vector<8x8xi32> to vector<8x8xf32>
    %c0_39 = arith.constant 0 : index
    %c0_40 = arith.constant 0 : index
    %195 = vector.load %arg6[%c0_39, %c0_40] : memref<8x32xf32, #tpu.memory_space<vmem>>, vector<8x32xf32>
    %196 = tpu.concatenate %168, %195 in 1 : vector<8x32xf32>, vector<8x32xf32> -> vector<8x64xf32>
    %197 = arith.truncf %196 : vector<8x64xf32> to vector<8x64xbf16>
    %c0_41 = arith.constant 0 : index
    %c0_42 = arith.constant 0 : index
    %198 = vector.load %arg10[%c0_41, %c0_42] : memref<64x192xbf16, #tpu.memory_space<vmem>>, vector<64x192xbf16>
    %cst_43 = arith.constant dense<0.000000e+00> : vector<8x192xf32>
    %199 = tpu.matmul %197, %198, %cst_43 {dimension_numbers = #tpu.dot_dimension_numbers<[1], [0], [0], [1], [0, 0, 1, 1], [], []>} : vector<8x64xbf16>, vector<64x192xbf16>, vector<8x192xf32> -> vector<8x192xf32>
    %200 = vector.extract_strided_slice %199 {offsets = [0, 0], sizes = [8, 64], strides = [1, 1]} : vector<8x192xf32> to vector<8x64xf32>
    %c0_44 = arith.constant 0 : index
    %c0_45 = arith.constant 0 : index
    %c0_46 = arith.constant 0 : index
    %201 = vector.load %arg12[%c0_44, %c0_45, %c0_46] : memref<7x1x64xbf16, #tpu.memory_space<vmem>>, vector<1x1x64xbf16>
    %202 = vector.shape_cast %201 : vector<1x1x64xbf16> to vector<1x64xbf16>
    %c0_47 = arith.constant 0 : index
    %c0_48 = arith.constant 0 : index
    %c0_49 = arith.constant 0 : index
    %203 = vector.load %arg13[%c0_47, %c0_48, %c0_49] : memref<7x1x64xf32, #tpu.memory_space<vmem>>, vector<1x1x64xf32>
    %204 = vector.shape_cast %203 : vector<1x1x64xf32> to vector<1x64xf32>
    %c0_50 = arith.constant 0 : index
    %c0_51 = arith.constant 0 : index
    %c0_52 = arith.constant 0 : index
    %205 = vector.load %arg14[%c0_50, %c0_51, %c0_52] : memref<7x1x64xf32, #tpu.memory_space<vmem>>, vector<1x1x64xf32>
    %206 = vector.shape_cast %205 : vector<1x1x64xf32> to vector<1x64xf32>
    %207 = vector.broadcast %204 : vector<1x64xf32> to vector<8x64xf32>
    %208 = arith.mulf %200, %207 : vector<8x64xf32>
    %cst_53 = arith.constant dense<0.000000e+00> : vector<8xf32>
    %209 = vector.multi_reduction <add>, %208, %cst_53 [1] : vector<8x64xf32> to vector<8xf32>
    %210 = vector.shape_cast %209 : vector<8xf32> to vector<8x1xf32>
    %cst_54 = arith.constant dense<0.000000e+00> : vector<1x8xf32>
    %211 = tpu.matmul %202, %197, %cst_54 {dimension_numbers = #tpu.dot_dimension_numbers<[1], [1], [0], [0], [0, 0, 1, 0], [], []>} : vector<1x64xbf16>, vector<8x64xbf16>, vector<1x8xf32> -> vector<1x8xf32>
    %212 = vector.broadcast %210 : vector<8x1xf32> to vector<8x8xf32>
    %213 = vector.broadcast %211 : vector<1x8xf32> to vector<8x8xf32>
    %214 = arith.addf %212, %213 : vector<8x8xf32>
    %cst_55 = arith.constant 0.000000e+00 : f32
    %215 = vector.broadcast %cst_55 : f32 to vector<8x8xf32>
    %216 = arith.cmpf ogt, %214, %215 : vector<8x8xf32>
    %cst_56 = arith.constant 2.000000e-01 : f32
    %217 = vector.broadcast %cst_56 : f32 to vector<8x8xf32>
    %218 = arith.mulf %217, %214 : vector<8x8xf32>
    %219 = arith.select %216, %214, %218 : vector<8x8xi1>, vector<8x8xf32>
    %cst_57 = arith.constant 0.000000e+00 : f32
    %220 = vector.broadcast %cst_57 : f32 to vector<8x8xf32>
    %221 = arith.cmpf ogt, %194, %220 : vector<8x8xf32>
    %cst_58 = arith.constant -1.000000e+30 : f32
    %222 = vector.broadcast %cst_58 : f32 to vector<8x8xf32>
    %223 = arith.select %221, %219, %222 : vector<8x8xi1>, vector<8x8xf32>
    %cst_59 = arith.constant dense<0xFF800000> : vector<8xf32>
    %224 = vector.multi_reduction <maximumf>, %223, %cst_59 [1] : vector<8x8xf32> to vector<8xf32>
    %225 = vector.shape_cast %224 : vector<8xf32> to vector<8x1xf32>
    %226 = vector.broadcast %225 : vector<8x1xf32> to vector<8x8xf32>
    %227 = arith.subf %223, %226 : vector<8x8xf32>
    %228 = math.exp %227 : vector<8x8xf32>
    %229 = arith.mulf %228, %194 : vector<8x8xf32>
    %cst_60 = arith.constant dense<0.000000e+00> : vector<8xf32>
    %230 = vector.multi_reduction <add>, %229, %cst_60 [1] : vector<8x8xf32> to vector<8xf32>
    %231 = vector.shape_cast %230 : vector<8xf32> to vector<8x1xf32>
    %cst_61 = arith.constant 9.99999968E-21 : f32
    %232 = vector.broadcast %cst_61 : f32 to vector<8x1xf32>
    %233 = arith.maximumf %231, %232 : vector<8x1xf32>
    %234 = tpu.reciprocal %233 {approx = true} : vector<8x1xf32> -> vector<8x1xf32>
    %235 = vector.broadcast %234 : vector<8x1xf32> to vector<8x8xf32>
    %236 = arith.mulf %229, %235 : vector<8x8xf32>
    %237 = arith.truncf %236 : vector<8x8xf32> to vector<8x8xbf16>
    %238 = arith.truncf %200 : vector<8x64xf32> to vector<8x64xbf16>
    %cst_62 = arith.constant dense<0.000000e+00> : vector<8x64xf32>
    %239 = tpu.matmul %237, %238, %cst_62 {dimension_numbers = #tpu.dot_dimension_numbers<[1], [0], [0], [1], [0, 0, 1, 1], [], []>} : vector<8x8xbf16>, vector<8x64xbf16>, vector<8x64xf32> -> vector<8x64xf32>
    %240 = vector.broadcast %206 : vector<1x64xf32> to vector<8x64xf32>
    %241 = arith.addf %239, %240 : vector<8x64xf32>
    %cst_63 = arith.constant 0.000000e+00 : f32
    %242 = vector.broadcast %cst_63 : f32 to vector<8x64xf32>
    %243 = arith.cmpf ogt, %241, %242 : vector<8x64xf32>
    %cst_64 = arith.constant 0.00999999977 : f32
    %244 = vector.broadcast %cst_64 : f32 to vector<8x64xf32>
    %245 = arith.mulf %244, %241 : vector<8x64xf32>
    %246 = arith.select %243, %241, %245 : vector<8x64xi1>, vector<8x64xf32>
    %c0_65 = arith.constant 0 : index
    %c0_66 = arith.constant 0 : index
    %c0_67 = arith.constant 0 : index
    %247 = vector.load %arg7[%c0_65, %c0_66, %c0_67] : memref<2x8x8xf32, #tpu.memory_space<vmem>>, vector<1x8x8xf32>
    %248 = vector.shape_cast %247 : vector<1x8x8xf32> to vector<8x8xf32>
    %249 = vector.extract_strided_slice %199 {offsets = [0, 64], sizes = [8, 64], strides = [1, 1]} : vector<8x192xf32> to vector<8x64xf32>
    %c1 = arith.constant 1 : index
    %c0_68 = arith.constant 0 : index
    %c0_69 = arith.constant 0 : index
    %250 = vector.load %arg12[%c1, %c0_68, %c0_69] : memref<7x1x64xbf16, #tpu.memory_space<vmem>>, vector<1x1x64xbf16>
    %251 = vector.shape_cast %250 : vector<1x1x64xbf16> to vector<1x64xbf16>
    %c1_70 = arith.constant 1 : index
    %c0_71 = arith.constant 0 : index
    %c0_72 = arith.constant 0 : index
    %252 = vector.load %arg13[%c1_70, %c0_71, %c0_72] : memref<7x1x64xf32, #tpu.memory_space<vmem>>, vector<1x1x64xf32>
    %253 = vector.shape_cast %252 : vector<1x1x64xf32> to vector<1x64xf32>
    %c1_73 = arith.constant 1 : index
    %c0_74 = arith.constant 0 : index
    %c0_75 = arith.constant 0 : index
    %254 = vector.load %arg14[%c1_73, %c0_74, %c0_75] : memref<7x1x64xf32, #tpu.memory_space<vmem>>, vector<1x1x64xf32>
    %255 = vector.shape_cast %254 : vector<1x1x64xf32> to vector<1x64xf32>
    %256 = vector.broadcast %253 : vector<1x64xf32> to vector<8x64xf32>
    %257 = arith.mulf %249, %256 : vector<8x64xf32>
    %cst_76 = arith.constant dense<0.000000e+00> : vector<8xf32>
    %258 = vector.multi_reduction <add>, %257, %cst_76 [1] : vector<8x64xf32> to vector<8xf32>
    %259 = vector.shape_cast %258 : vector<8xf32> to vector<8x1xf32>
    %cst_77 = arith.constant dense<0.000000e+00> : vector<1x8xf32>
    %260 = tpu.matmul %251, %197, %cst_77 {dimension_numbers = #tpu.dot_dimension_numbers<[1], [1], [0], [0], [0, 0, 1, 0], [], []>} : vector<1x64xbf16>, vector<8x64xbf16>, vector<1x8xf32> -> vector<1x8xf32>
    %261 = vector.broadcast %259 : vector<8x1xf32> to vector<8x8xf32>
    %262 = vector.broadcast %260 : vector<1x8xf32> to vector<8x8xf32>
    %263 = arith.addf %261, %262 : vector<8x8xf32>
    %cst_78 = arith.constant 0.000000e+00 : f32
    %264 = vector.broadcast %cst_78 : f32 to vector<8x8xf32>
    %265 = arith.cmpf ogt, %263, %264 : vector<8x8xf32>
    %cst_79 = arith.constant 2.000000e-01 : f32
    %266 = vector.broadcast %cst_79 : f32 to vector<8x8xf32>
    %267 = arith.mulf %266, %263 : vector<8x8xf32>
    %268 = arith.select %265, %263, %267 : vector<8x8xi1>, vector<8x8xf32>
    %cst_80 = arith.constant 0.000000e+00 : f32
    %269 = vector.broadcast %cst_80 : f32 to vector<8x8xf32>
    %270 = arith.cmpf ogt, %248, %269 : vector<8x8xf32>
    %cst_81 = arith.constant -1.000000e+30 : f32
    %271 = vector.broadcast %cst_81 : f32 to vector<8x8xf32>
    %272 = arith.select %270, %268, %271 : vector<8x8xi1>, vector<8x8xf32>
    %cst_82 = arith.constant dense<0xFF800000> : vector<8xf32>
    %273 = vector.multi_reduction <maximumf>, %272, %cst_82 [1] : vector<8x8xf32> to vector<8xf32>
    %274 = vector.shape_cast %273 : vector<8xf32> to vector<8x1xf32>
    %275 = vector.broadcast %274 : vector<8x1xf32> to vector<8x8xf32>
    %276 = arith.subf %272, %275 : vector<8x8xf32>
    %277 = math.exp %276 : vector<8x8xf32>
    %278 = arith.mulf %277, %248 : vector<8x8xf32>
    %cst_83 = arith.constant dense<0.000000e+00> : vector<8xf32>
    %279 = vector.multi_reduction <add>, %278, %cst_83 [1] : vector<8x8xf32> to vector<8xf32>
    %280 = vector.shape_cast %279 : vector<8xf32> to vector<8x1xf32>
    %cst_84 = arith.constant 9.99999968E-21 : f32
    %281 = vector.broadcast %cst_84 : f32 to vector<8x1xf32>
    %282 = arith.maximumf %280, %281 : vector<8x1xf32>
    %283 = tpu.reciprocal %282 {approx = true} : vector<8x1xf32> -> vector<8x1xf32>
    %284 = vector.broadcast %283 : vector<8x1xf32> to vector<8x8xf32>
    %285 = arith.mulf %278, %284 : vector<8x8xf32>
    %286 = arith.truncf %285 : vector<8x8xf32> to vector<8x8xbf16>
    %287 = arith.truncf %249 : vector<8x64xf32> to vector<8x64xbf16>
    %cst_85 = arith.constant dense<0.000000e+00> : vector<8x64xf32>
    %288 = tpu.matmul %286, %287, %cst_85 {dimension_numbers = #tpu.dot_dimension_numbers<[1], [0], [0], [1], [0, 0, 1, 1], [], []>} : vector<8x8xbf16>, vector<8x64xbf16>, vector<8x64xf32> -> vector<8x64xf32>
    %289 = vector.broadcast %255 : vector<1x64xf32> to vector<8x64xf32>
    %290 = arith.addf %288, %289 : vector<8x64xf32>
    %cst_86 = arith.constant 0.000000e+00 : f32
    %291 = vector.broadcast %cst_86 : f32 to vector<8x64xf32>
    %292 = arith.cmpf ogt, %290, %291 : vector<8x64xf32>
    %cst_87 = arith.constant 0.00999999977 : f32
    %293 = vector.broadcast %cst_87 : f32 to vector<8x64xf32>
    %294 = arith.mulf %293, %290 : vector<8x64xf32>
    %295 = arith.select %292, %290, %294 : vector<8x64xi1>, vector<8x64xf32>
    %c1_88 = arith.constant 1 : index
    %c0_89 = arith.constant 0 : index
    %c0_90 = arith.constant 0 : index
    %296 = vector.load %arg7[%c1_88, %c0_89, %c0_90] : memref<2x8x8xf32, #tpu.memory_space<vmem>>, vector<1x8x8xf32>
    %297 = vector.shape_cast %296 : vector<1x8x8xf32> to vector<8x8xf32>
    %298 = vector.extract_strided_slice %199 {offsets = [0, 128], sizes = [8, 64], strides = [1, 1]} : vector<8x192xf32> to vector<8x64xf32>
    %c2 = arith.constant 2 : index
    %c0_91 = arith.constant 0 : index
    %c0_92 = arith.constant 0 : index
    %299 = vector.load %arg12[%c2, %c0_91, %c0_92] : memref<7x1x64xbf16, #tpu.memory_space<vmem>>, vector<1x1x64xbf16>
    %300 = vector.shape_cast %299 : vector<1x1x64xbf16> to vector<1x64xbf16>
    %c2_93 = arith.constant 2 : index
    %c0_94 = arith.constant 0 : index
    %c0_95 = arith.constant 0 : index
    %301 = vector.load %arg13[%c2_93, %c0_94, %c0_95] : memref<7x1x64xf32, #tpu.memory_space<vmem>>, vector<1x1x64xf32>
    %302 = vector.shape_cast %301 : vector<1x1x64xf32> to vector<1x64xf32>
    %c2_96 = arith.constant 2 : index
    %c0_97 = arith.constant 0 : index
    %c0_98 = arith.constant 0 : index
    %303 = vector.load %arg14[%c2_96, %c0_97, %c0_98] : memref<7x1x64xf32, #tpu.memory_space<vmem>>, vector<1x1x64xf32>
    %304 = vector.shape_cast %303 : vector<1x1x64xf32> to vector<1x64xf32>
    %305 = vector.broadcast %302 : vector<1x64xf32> to vector<8x64xf32>
    %306 = arith.mulf %298, %305 : vector<8x64xf32>
    %cst_99 = arith.constant dense<0.000000e+00> : vector<8xf32>
    %307 = vector.multi_reduction <add>, %306, %cst_99 [1] : vector<8x64xf32> to vector<8xf32>
    %308 = vector.shape_cast %307 : vector<8xf32> to vector<8x1xf32>
    %cst_100 = arith.constant dense<0.000000e+00> : vector<1x8xf32>
    %309 = tpu.matmul %300, %197, %cst_100 {dimension_numbers = #tpu.dot_dimension_numbers<[1], [1], [0], [0], [0, 0, 1, 0], [], []>} : vector<1x64xbf16>, vector<8x64xbf16>, vector<1x8xf32> -> vector<1x8xf32>
    %310 = vector.broadcast %308 : vector<8x1xf32> to vector<8x8xf32>
    %311 = vector.broadcast %309 : vector<1x8xf32> to vector<8x8xf32>
    %312 = arith.addf %310, %311 : vector<8x8xf32>
    %cst_101 = arith.constant 0.000000e+00 : f32
    %313 = vector.broadcast %cst_101 : f32 to vector<8x8xf32>
    %314 = arith.cmpf ogt, %312, %313 : vector<8x8xf32>
    %cst_102 = arith.constant 2.000000e-01 : f32
    %315 = vector.broadcast %cst_102 : f32 to vector<8x8xf32>
    %316 = arith.mulf %315, %312 : vector<8x8xf32>
    %317 = arith.select %314, %312, %316 : vector<8x8xi1>, vector<8x8xf32>
    %cst_103 = arith.constant 0.000000e+00 : f32
    %318 = vector.broadcast %cst_103 : f32 to vector<8x8xf32>
    %319 = arith.cmpf ogt, %297, %318 : vector<8x8xf32>
    %cst_104 = arith.constant -1.000000e+30 : f32
    %320 = vector.broadcast %cst_104 : f32 to vector<8x8xf32>
    %321 = arith.select %319, %317, %320 : vector<8x8xi1>, vector<8x8xf32>
    %cst_105 = arith.constant dense<0xFF800000> : vector<8xf32>
    %322 = vector.multi_reduction <maximumf>, %321, %cst_105 [1] : vector<8x8xf32> to vector<8xf32>
    %323 = vector.shape_cast %322 : vector<8xf32> to vector<8x1xf32>
    %324 = vector.broadcast %323 : vector<8x1xf32> to vector<8x8xf32>
    %325 = arith.subf %321, %324 : vector<8x8xf32>
    %326 = math.exp %325 : vector<8x8xf32>
    %327 = arith.mulf %326, %297 : vector<8x8xf32>
    %cst_106 = arith.constant dense<0.000000e+00> : vector<8xf32>
    %328 = vector.multi_reduction <add>, %327, %cst_106 [1] : vector<8x8xf32> to vector<8xf32>
    %329 = vector.shape_cast %328 : vector<8xf32> to vector<8x1xf32>
    %cst_107 = arith.constant 9.99999968E-21 : f32
    %330 = vector.broadcast %cst_107 : f32 to vector<8x1xf32>
    %331 = arith.maximumf %329, %330 : vector<8x1xf32>
    %332 = tpu.reciprocal %331 {approx = true} : vector<8x1xf32> -> vector<8x1xf32>
    %333 = vector.broadcast %332 : vector<8x1xf32> to vector<8x8xf32>
    %334 = arith.mulf %327, %333 : vector<8x8xf32>
    %335 = arith.truncf %334 : vector<8x8xf32> to vector<8x8xbf16>
    %336 = arith.truncf %298 : vector<8x64xf32> to vector<8x64xbf16>
    %cst_108 = arith.constant dense<0.000000e+00> : vector<8x64xf32>
    %337 = tpu.matmul %335, %336, %cst_108 {dimension_numbers = #tpu.dot_dimension_numbers<[1], [0], [0], [1], [0, 0, 1, 1], [], []>} : vector<8x8xbf16>, vector<8x64xbf16>, vector<8x64xf32> -> vector<8x64xf32>
    %338 = vector.broadcast %304 : vector<1x64xf32> to vector<8x64xf32>
    %339 = arith.addf %337, %338 : vector<8x64xf32>
    %cst_109 = arith.constant 0.000000e+00 : f32
    %340 = vector.broadcast %cst_109 : f32 to vector<8x64xf32>
    %341 = arith.cmpf ogt, %339, %340 : vector<8x64xf32>
    %cst_110 = arith.constant 0.00999999977 : f32
    %342 = vector.broadcast %cst_110 : f32 to vector<8x64xf32>
    %343 = arith.mulf %342, %339 : vector<8x64xf32>
    %344 = arith.select %341, %339, %343 : vector<8x64xi1>, vector<8x64xf32>
    %cst_111 = arith.constant 0.000000e+00 : f32
    %345 = vector.broadcast %cst_111 : f32 to vector<2x64xf32>
    %346 = tpu.concatenate %196, %345 in 0 : vector<8x64xf32>, vector<2x64xf32> -> vector<10x64xf32>
    %347 = arith.truncf %346 : vector<10x64xf32> to vector<10x64xbf16>
    %c0_112 = arith.constant 0 : index
    %c0_113 = arith.constant 0 : index
    %c0_114 = arith.constant 0 : index
    %348 = vector.load %arg11[%c0_112, %c0_113, %c0_114] : memref<4x64x64xbf16, #tpu.memory_space<vmem>>, vector<1x64x64xbf16>
    %349 = vector.shape_cast %348 : vector<1x64x64xbf16> to vector<64x64xbf16>
    %cst_115 = arith.constant dense<0.000000e+00> : vector<10x64xf32>
    %350 = tpu.matmul %347, %349, %cst_115 {dimension_numbers = #tpu.dot_dimension_numbers<[1], [0], [0], [1], [0, 0, 1, 1], [], []>} : vector<10x64xbf16>, vector<64x64xbf16>, vector<10x64xf32> -> vector<10x64xf32>
    %c0_116 = arith.constant 0 : index
    %c0_117 = arith.constant 0 : index
    %c0_118 = arith.constant 0 : index
    %351 = vector.load %arg8[%c0_116, %c0_117, %c0_118] : memref<2x10x10xf32, #tpu.memory_space<vmem>>, vector<1x10x10xf32>
    %352 = vector.shape_cast %351 : vector<1x10x10xf32> to vector<10x10xf32>
    %c3 = arith.constant 3 : index
    %c0_119 = arith.constant 0 : index
    %c0_120 = arith.constant 0 : index
    %353 = vector.load %arg12[%c3, %c0_119, %c0_120] : memref<7x1x64xbf16, #tpu.memory_space<vmem>>, vector<1x1x64xbf16>
    %354 = vector.shape_cast %353 : vector<1x1x64xbf16> to vector<1x64xbf16>
    %c3_121 = arith.constant 3 : index
    %c0_122 = arith.constant 0 : index
    %c0_123 = arith.constant 0 : index
    %355 = vector.load %arg13[%c3_121, %c0_122, %c0_123] : memref<7x1x64xf32, #tpu.memory_space<vmem>>, vector<1x1x64xf32>
    %356 = vector.shape_cast %355 : vector<1x1x64xf32> to vector<1x64xf32>
    %c3_124 = arith.constant 3 : index
    %c0_125 = arith.constant 0 : index
    %c0_126 = arith.constant 0 : index
    %357 = vector.load %arg14[%c3_124, %c0_125, %c0_126] : memref<7x1x64xf32, #tpu.memory_space<vmem>>, vector<1x1x64xf32>
    %358 = vector.shape_cast %357 : vector<1x1x64xf32> to vector<1x64xf32>
    %359 = vector.broadcast %356 : vector<1x64xf32> to vector<10x64xf32>
    %360 = arith.mulf %350, %359 : vector<10x64xf32>
    %cst_127 = arith.constant dense<0.000000e+00> : vector<10xf32>
    %361 = vector.multi_reduction <add>, %360, %cst_127 [1] : vector<10x64xf32> to vector<10xf32>
    %362 = vector.shape_cast %361 : vector<10xf32> to vector<10x1xf32>
    %cst_128 = arith.constant dense<0.000000e+00> : vector<1x10xf32>
    %363 = tpu.matmul %354, %347, %cst_128 {dimension_numbers = #tpu.dot_dimension_numbers<[1], [1], [0], [0], [0, 0, 1, 0], [], []>} : vector<1x64xbf16>, vector<10x64xbf16>, vector<1x10xf32> -> vector<1x10xf32>
    %364 = vector.broadcast %362 : vector<10x1xf32> to vector<10x10xf32>
    %365 = vector.broadcast %363 : vector<1x10xf32> to vector<10x10xf32>
    %366 = arith.addf %364, %365 : vector<10x10xf32>
    %cst_129 = arith.constant 0.000000e+00 : f32
    %367 = vector.broadcast %cst_129 : f32 to vector<10x10xf32>
    %368 = arith.cmpf ogt, %366, %367 : vector<10x10xf32>
    %cst_130 = arith.constant 2.000000e-01 : f32
    %369 = vector.broadcast %cst_130 : f32 to vector<10x10xf32>
    %370 = arith.mulf %369, %366 : vector<10x10xf32>
    %371 = arith.select %368, %366, %370 : vector<10x10xi1>, vector<10x10xf32>
    %cst_131 = arith.constant 0.000000e+00 : f32
    %372 = vector.broadcast %cst_131 : f32 to vector<10x10xf32>
    %373 = arith.cmpf ogt, %352, %372 : vector<10x10xf32>
    %cst_132 = arith.constant -1.000000e+30 : f32
    %374 = vector.broadcast %cst_132 : f32 to vector<10x10xf32>
    %375 = arith.select %373, %371, %374 : vector<10x10xi1>, vector<10x10xf32>
    %cst_133 = arith.constant dense<0xFF800000> : vector<10xf32>
    %376 = vector.multi_reduction <maximumf>, %375, %cst_133 [1] : vector<10x10xf32> to vector<10xf32>
    %377 = vector.shape_cast %376 : vector<10xf32> to vector<10x1xf32>
    %378 = vector.broadcast %377 : vector<10x1xf32> to vector<10x10xf32>
    %379 = arith.subf %375, %378 : vector<10x10xf32>
    %380 = math.exp %379 : vector<10x10xf32>
    %381 = arith.mulf %380, %352 : vector<10x10xf32>
    %cst_134 = arith.constant dense<0.000000e+00> : vector<10xf32>
    %382 = vector.multi_reduction <add>, %381, %cst_134 [1] : vector<10x10xf32> to vector<10xf32>
    %383 = vector.shape_cast %382 : vector<10xf32> to vector<10x1xf32>
    %cst_135 = arith.constant 9.99999968E-21 : f32
    %384 = vector.broadcast %cst_135 : f32 to vector<10x1xf32>
    %385 = arith.maximumf %383, %384 : vector<10x1xf32>
    %386 = tpu.reciprocal %385 {approx = true} : vector<10x1xf32> -> vector<10x1xf32>
    %387 = vector.broadcast %386 : vector<10x1xf32> to vector<10x10xf32>
    %388 = arith.mulf %381, %387 : vector<10x10xf32>
    %389 = arith.truncf %388 : vector<10x10xf32> to vector<10x10xbf16>
    %390 = arith.truncf %350 : vector<10x64xf32> to vector<10x64xbf16>
    %cst_136 = arith.constant dense<0.000000e+00> : vector<10x64xf32>
    %391 = tpu.matmul %389, %390, %cst_136 {dimension_numbers = #tpu.dot_dimension_numbers<[1], [0], [0], [1], [0, 0, 1, 1], [], []>} : vector<10x10xbf16>, vector<10x64xbf16>, vector<10x64xf32> -> vector<10x64xf32>
    %392 = vector.broadcast %358 : vector<1x64xf32> to vector<10x64xf32>
    %393 = arith.addf %391, %392 : vector<10x64xf32>
    %cst_137 = arith.constant 0.000000e+00 : f32
    %394 = vector.broadcast %cst_137 : f32 to vector<10x64xf32>
    %395 = arith.cmpf ogt, %393, %394 : vector<10x64xf32>
    %cst_138 = arith.constant 0.00999999977 : f32
    %396 = vector.broadcast %cst_138 : f32 to vector<10x64xf32>
    %397 = arith.mulf %396, %393 : vector<10x64xf32>
    %398 = arith.select %395, %393, %397 : vector<10x64xi1>, vector<10x64xf32>
    %399 = arith.truncf %398 : vector<10x64xf32> to vector<10x64xbf16>
    %c1_139 = arith.constant 1 : index
    %c0_140 = arith.constant 0 : index
    %c0_141 = arith.constant 0 : index
    %400 = vector.load %arg11[%c1_139, %c0_140, %c0_141] : memref<4x64x64xbf16, #tpu.memory_space<vmem>>, vector<1x64x64xbf16>
    %401 = vector.shape_cast %400 : vector<1x64x64xbf16> to vector<64x64xbf16>
    %cst_142 = arith.constant dense<0.000000e+00> : vector<10x64xf32>
    %402 = tpu.matmul %399, %401, %cst_142 {dimension_numbers = #tpu.dot_dimension_numbers<[1], [0], [0], [1], [0, 0, 1, 1], [], []>} : vector<10x64xbf16>, vector<64x64xbf16>, vector<10x64xf32> -> vector<10x64xf32>
    %c1_143 = arith.constant 1 : index
    %c0_144 = arith.constant 0 : index
    %c0_145 = arith.constant 0 : index
    %403 = vector.load %arg8[%c1_143, %c0_144, %c0_145] : memref<2x10x10xf32, #tpu.memory_space<vmem>>, vector<1x10x10xf32>
    %404 = vector.shape_cast %403 : vector<1x10x10xf32> to vector<10x10xf32>
    %c4 = arith.constant 4 : index
    %c0_146 = arith.constant 0 : index
    %c0_147 = arith.constant 0 : index
    %405 = vector.load %arg12[%c4, %c0_146, %c0_147] : memref<7x1x64xbf16, #tpu.memory_space<vmem>>, vector<1x1x64xbf16>
    %406 = vector.shape_cast %405 : vector<1x1x64xbf16> to vector<1x64xbf16>
    %c4_148 = arith.constant 4 : index
    %c0_149 = arith.constant 0 : index
    %c0_150 = arith.constant 0 : index
    %407 = vector.load %arg13[%c4_148, %c0_149, %c0_150] : memref<7x1x64xf32, #tpu.memory_space<vmem>>, vector<1x1x64xf32>
    %408 = vector.shape_cast %407 : vector<1x1x64xf32> to vector<1x64xf32>
    %c4_151 = arith.constant 4 : index
    %c0_152 = arith.constant 0 : index
    %c0_153 = arith.constant 0 : index
    %409 = vector.load %arg14[%c4_151, %c0_152, %c0_153] : memref<7x1x64xf32, #tpu.memory_space<vmem>>, vector<1x1x64xf32>
    %410 = vector.shape_cast %409 : vector<1x1x64xf32> to vector<1x64xf32>
    %411 = vector.broadcast %408 : vector<1x64xf32> to vector<10x64xf32>
    %412 = arith.mulf %402, %411 : vector<10x64xf32>
    %cst_154 = arith.constant dense<0.000000e+00> : vector<10xf32>
    %413 = vector.multi_reduction <add>, %412, %cst_154 [1] : vector<10x64xf32> to vector<10xf32>
    %414 = vector.shape_cast %413 : vector<10xf32> to vector<10x1xf32>
    %cst_155 = arith.constant dense<0.000000e+00> : vector<1x10xf32>
    %415 = tpu.matmul %406, %399, %cst_155 {dimension_numbers = #tpu.dot_dimension_numbers<[1], [1], [0], [0], [0, 0, 1, 0], [], []>} : vector<1x64xbf16>, vector<10x64xbf16>, vector<1x10xf32> -> vector<1x10xf32>
    %416 = vector.broadcast %414 : vector<10x1xf32> to vector<10x10xf32>
    %417 = vector.broadcast %415 : vector<1x10xf32> to vector<10x10xf32>
    %418 = arith.addf %416, %417 : vector<10x10xf32>
    %cst_156 = arith.constant 0.000000e+00 : f32
    %419 = vector.broadcast %cst_156 : f32 to vector<10x10xf32>
    %420 = arith.cmpf ogt, %418, %419 : vector<10x10xf32>
    %cst_157 = arith.constant 2.000000e-01 : f32
    %421 = vector.broadcast %cst_157 : f32 to vector<10x10xf32>
    %422 = arith.mulf %421, %418 : vector<10x10xf32>
    %423 = arith.select %420, %418, %422 : vector<10x10xi1>, vector<10x10xf32>
    %cst_158 = arith.constant 0.000000e+00 : f32
    %424 = vector.broadcast %cst_158 : f32 to vector<10x10xf32>
    %425 = arith.cmpf ogt, %404, %424 : vector<10x10xf32>
    %cst_159 = arith.constant -1.000000e+30 : f32
    %426 = vector.broadcast %cst_159 : f32 to vector<10x10xf32>
    %427 = arith.select %425, %423, %426 : vector<10x10xi1>, vector<10x10xf32>
    %cst_160 = arith.constant dense<0xFF800000> : vector<10xf32>
    %428 = vector.multi_reduction <maximumf>, %427, %cst_160 [1] : vector<10x10xf32> to vector<10xf32>
    %429 = vector.shape_cast %428 : vector<10xf32> to vector<10x1xf32>
    %430 = vector.broadcast %429 : vector<10x1xf32> to vector<10x10xf32>
    %431 = arith.subf %427, %430 : vector<10x10xf32>
    %432 = math.exp %431 : vector<10x10xf32>
    %433 = arith.mulf %432, %404 : vector<10x10xf32>
    %cst_161 = arith.constant dense<0.000000e+00> : vector<10xf32>
    %434 = vector.multi_reduction <add>, %433, %cst_161 [1] : vector<10x10xf32> to vector<10xf32>
    %435 = vector.shape_cast %434 : vector<10xf32> to vector<10x1xf32>
    %cst_162 = arith.constant 9.99999968E-21 : f32
    %436 = vector.broadcast %cst_162 : f32 to vector<10x1xf32>
    %437 = arith.maximumf %435, %436 : vector<10x1xf32>
    %438 = tpu.reciprocal %437 {approx = true} : vector<10x1xf32> -> vector<10x1xf32>
    %439 = vector.broadcast %438 : vector<10x1xf32> to vector<10x10xf32>
    %440 = arith.mulf %433, %439 : vector<10x10xf32>
    %441 = arith.truncf %440 : vector<10x10xf32> to vector<10x10xbf16>
    %442 = arith.truncf %402 : vector<10x64xf32> to vector<10x64xbf16>
    %cst_163 = arith.constant dense<0.000000e+00> : vector<10x64xf32>
    %443 = tpu.matmul %441, %442, %cst_163 {dimension_numbers = #tpu.dot_dimension_numbers<[1], [0], [0], [1], [0, 0, 1, 1], [], []>} : vector<10x10xbf16>, vector<10x64xbf16>, vector<10x64xf32> -> vector<10x64xf32>
    %444 = vector.broadcast %410 : vector<1x64xf32> to vector<10x64xf32>
    %445 = arith.addf %443, %444 : vector<10x64xf32>
    %cst_164 = arith.constant 0.000000e+00 : f32
    %446 = vector.broadcast %cst_164 : f32 to vector<10x64xf32>
    %447 = arith.cmpf ogt, %445, %446 : vector<10x64xf32>
    %cst_165 = arith.constant 0.00999999977 : f32
    %448 = vector.broadcast %cst_165 : f32 to vector<10x64xf32>
    %449 = arith.mulf %448, %445 : vector<10x64xf32>
    %450 = arith.select %447, %445, %449 : vector<10x64xi1>, vector<10x64xf32>
    %451 = vector.extract_strided_slice %450 {offsets = [0, 0], sizes = [8, 64], strides = [1, 1]} : vector<10x64xf32> to vector<8x64xf32>
    %cst_166 = arith.constant 0.000000e+00 : f32
    %452 = vector.broadcast %cst_166 : f32 to vector<4x64xf32>
    %453 = tpu.concatenate %196, %452 in 0 : vector<8x64xf32>, vector<4x64xf32> -> vector<12x64xf32>
    %454 = arith.truncf %453 : vector<12x64xf32> to vector<12x64xbf16>
    %c2_167 = arith.constant 2 : index
    %c0_168 = arith.constant 0 : index
    %c0_169 = arith.constant 0 : index
    %455 = vector.load %arg11[%c2_167, %c0_168, %c0_169] : memref<4x64x64xbf16, #tpu.memory_space<vmem>>, vector<1x64x64xbf16>
    %456 = vector.shape_cast %455 : vector<1x64x64xbf16> to vector<64x64xbf16>
    %cst_170 = arith.constant dense<0.000000e+00> : vector<12x64xf32>
    %457 = tpu.matmul %454, %456, %cst_170 {dimension_numbers = #tpu.dot_dimension_numbers<[1], [0], [0], [1], [0, 0, 1, 1], [], []>} : vector<12x64xbf16>, vector<64x64xbf16>, vector<12x64xf32> -> vector<12x64xf32>
    %c0_171 = arith.constant 0 : index
    %c0_172 = arith.constant 0 : index
    %c0_173 = arith.constant 0 : index
    %458 = vector.load %arg9[%c0_171, %c0_172, %c0_173] : memref<2x12x12xf32, #tpu.memory_space<vmem>>, vector<1x12x12xf32>
    %459 = vector.shape_cast %458 : vector<1x12x12xf32> to vector<12x12xf32>
    %c5 = arith.constant 5 : index
    %c0_174 = arith.constant 0 : index
    %c0_175 = arith.constant 0 : index
    %460 = vector.load %arg12[%c5, %c0_174, %c0_175] : memref<7x1x64xbf16, #tpu.memory_space<vmem>>, vector<1x1x64xbf16>
    %461 = vector.shape_cast %460 : vector<1x1x64xbf16> to vector<1x64xbf16>
    %c5_176 = arith.constant 5 : index
    %c0_177 = arith.constant 0 : index
    %c0_178 = arith.constant 0 : index
    %462 = vector.load %arg13[%c5_176, %c0_177, %c0_178] : memref<7x1x64xf32, #tpu.memory_space<vmem>>, vector<1x1x64xf32>
    %463 = vector.shape_cast %462 : vector<1x1x64xf32> to vector<1x64xf32>
    %c5_179 = arith.constant 5 : index
    %c0_180 = arith.constant 0 : index
    %c0_181 = arith.constant 0 : index
    %464 = vector.load %arg14[%c5_179, %c0_180, %c0_181] : memref<7x1x64xf32, #tpu.memory_space<vmem>>, vector<1x1x64xf32>
    %465 = vector.shape_cast %464 : vector<1x1x64xf32> to vector<1x64xf32>
    %466 = vector.broadcast %463 : vector<1x64xf32> to vector<12x64xf32>
    %467 = arith.mulf %457, %466 : vector<12x64xf32>
    %cst_182 = arith.constant dense<0.000000e+00> : vector<12xf32>
    %468 = vector.multi_reduction <add>, %467, %cst_182 [1] : vector<12x64xf32> to vector<12xf32>
    %469 = vector.shape_cast %468 : vector<12xf32> to vector<12x1xf32>
    %cst_183 = arith.constant dense<0.000000e+00> : vector<1x12xf32>
    %470 = tpu.matmul %461, %454, %cst_183 {dimension_numbers = #tpu.dot_dimension_numbers<[1], [1], [0], [0], [0, 0, 1, 0], [], []>} : vector<1x64xbf16>, vector<12x64xbf16>, vector<1x12xf32> -> vector<1x12xf32>
    %471 = vector.broadcast %469 : vector<12x1xf32> to vector<12x12xf32>
    %472 = vector.broadcast %470 : vector<1x12xf32> to vector<12x12xf32>
    %473 = arith.addf %471, %472 : vector<12x12xf32>
    %cst_184 = arith.constant 0.000000e+00 : f32
    %474 = vector.broadcast %cst_184 : f32 to vector<12x12xf32>
    %475 = arith.cmpf ogt, %473, %474 : vector<12x12xf32>
    %cst_185 = arith.constant 2.000000e-01 : f32
    %476 = vector.broadcast %cst_185 : f32 to vector<12x12xf32>
    %477 = arith.mulf %476, %473 : vector<12x12xf32>
    %478 = arith.select %475, %473, %477 : vector<12x12xi1>, vector<12x12xf32>
    %cst_186 = arith.constant 0.000000e+00 : f32
    %479 = vector.broadcast %cst_186 : f32 to vector<12x12xf32>
    %480 = arith.cmpf ogt, %459, %479 : vector<12x12xf32>
    %cst_187 = arith.constant -1.000000e+30 : f32
    %481 = vector.broadcast %cst_187 : f32 to vector<12x12xf32>
    %482 = arith.select %480, %478, %481 : vector<12x12xi1>, vector<12x12xf32>
    %cst_188 = arith.constant dense<0xFF800000> : vector<12xf32>
    %483 = vector.multi_reduction <maximumf>, %482, %cst_188 [1] : vector<12x12xf32> to vector<12xf32>
    %484 = vector.shape_cast %483 : vector<12xf32> to vector<12x1xf32>
    %485 = vector.broadcast %484 : vector<12x1xf32> to vector<12x12xf32>
    %486 = arith.subf %482, %485 : vector<12x12xf32>
    %487 = math.exp %486 : vector<12x12xf32>
    %488 = arith.mulf %487, %459 : vector<12x12xf32>
    %cst_189 = arith.constant dense<0.000000e+00> : vector<12xf32>
    %489 = vector.multi_reduction <add>, %488, %cst_189 [1] : vector<12x12xf32> to vector<12xf32>
    %490 = vector.shape_cast %489 : vector<12xf32> to vector<12x1xf32>
    %cst_190 = arith.constant 9.99999968E-21 : f32
    %491 = vector.broadcast %cst_190 : f32 to vector<12x1xf32>
    %492 = arith.maximumf %490, %491 : vector<12x1xf32>
    %493 = tpu.reciprocal %492 {approx = true} : vector<12x1xf32> -> vector<12x1xf32>
    %494 = vector.broadcast %493 : vector<12x1xf32> to vector<12x12xf32>
    %495 = arith.mulf %488, %494 : vector<12x12xf32>
    %496 = arith.truncf %495 : vector<12x12xf32> to vector<12x12xbf16>
    %497 = arith.truncf %457 : vector<12x64xf32> to vector<12x64xbf16>
    %cst_191 = arith.constant dense<0.000000e+00> : vector<12x64xf32>
    %498 = tpu.matmul %496, %497, %cst_191 {dimension_numbers = #tpu.dot_dimension_numbers<[1], [0], [0], [1], [0, 0, 1, 1], [], []>} : vector<12x12xbf16>, vector<12x64xbf16>, vector<12x64xf32> -> vector<12x64xf32>
    %499 = vector.broadcast %465 : vector<1x64xf32> to vector<12x64xf32>
    %500 = arith.addf %498, %499 : vector<12x64xf32>
    %cst_192 = arith.constant 0.000000e+00 : f32
    %501 = vector.broadcast %cst_192 : f32 to vector<12x64xf32>
    %502 = arith.cmpf ogt, %500, %501 : vector<12x64xf32>
    %cst_193 = arith.constant 0.00999999977 : f32
    %503 = vector.broadcast %cst_193 : f32 to vector<12x64xf32>
    %504 = arith.mulf %503, %500 : vector<12x64xf32>
    %505 = arith.select %502, %500, %504 : vector<12x64xi1>, vector<12x64xf32>
    %506 = arith.truncf %505 : vector<12x64xf32> to vector<12x64xbf16>
    %c3_194 = arith.constant 3 : index
    %c0_195 = arith.constant 0 : index
    %c0_196 = arith.constant 0 : index
    %507 = vector.load %arg11[%c3_194, %c0_195, %c0_196] : memref<4x64x64xbf16, #tpu.memory_space<vmem>>, vector<1x64x64xbf16>
    %508 = vector.shape_cast %507 : vector<1x64x64xbf16> to vector<64x64xbf16>
    %cst_197 = arith.constant dense<0.000000e+00> : vector<12x64xf32>
    %509 = tpu.matmul %506, %508, %cst_197 {dimension_numbers = #tpu.dot_dimension_numbers<[1], [0], [0], [1], [0, 0, 1, 1], [], []>} : vector<12x64xbf16>, vector<64x64xbf16>, vector<12x64xf32> -> vector<12x64xf32>
    %c1_198 = arith.constant 1 : index
    %c0_199 = arith.constant 0 : index
    %c0_200 = arith.constant 0 : index
    %510 = vector.load %arg9[%c1_198, %c0_199, %c0_200] : memref<2x12x12xf32, #tpu.memory_space<vmem>>, vector<1x12x12xf32>
    %511 = vector.shape_cast %510 : vector<1x12x12xf32> to vector<12x12xf32>
    %c6 = arith.constant 6 : index
    %c0_201 = arith.constant 0 : index
    %c0_202 = arith.constant 0 : index
    %512 = vector.load %arg12[%c6, %c0_201, %c0_202] : memref<7x1x64xbf16, #tpu.memory_space<vmem>>, vector<1x1x64xbf16>
    %513 = vector.shape_cast %512 : vector<1x1x64xbf16> to vector<1x64xbf16>
    %c6_203 = arith.constant 6 : index
    %c0_204 = arith.constant 0 : index
    %c0_205 = arith.constant 0 : index
    %514 = vector.load %arg13[%c6_203, %c0_204, %c0_205] : memref<7x1x64xf32, #tpu.memory_space<vmem>>, vector<1x1x64xf32>
    %515 = vector.shape_cast %514 : vector<1x1x64xf32> to vector<1x64xf32>
    %c6_206 = arith.constant 6 : index
    %c0_207 = arith.constant 0 : index
    %c0_208 = arith.constant 0 : index
    %516 = vector.load %arg14[%c6_206, %c0_207, %c0_208] : memref<7x1x64xf32, #tpu.memory_space<vmem>>, vector<1x1x64xf32>
    %517 = vector.shape_cast %516 : vector<1x1x64xf32> to vector<1x64xf32>
    %518 = vector.broadcast %515 : vector<1x64xf32> to vector<12x64xf32>
    %519 = arith.mulf %509, %518 : vector<12x64xf32>
    %cst_209 = arith.constant dense<0.000000e+00> : vector<12xf32>
    %520 = vector.multi_reduction <add>, %519, %cst_209 [1] : vector<12x64xf32> to vector<12xf32>
    %521 = vector.shape_cast %520 : vector<12xf32> to vector<12x1xf32>
    %cst_210 = arith.constant dense<0.000000e+00> : vector<1x12xf32>
    %522 = tpu.matmul %513, %506, %cst_210 {dimension_numbers = #tpu.dot_dimension_numbers<[1], [1], [0], [0], [0, 0, 1, 0], [], []>} : vector<1x64xbf16>, vector<12x64xbf16>, vector<1x12xf32> -> vector<1x12xf32>
    %523 = vector.broadcast %521 : vector<12x1xf32> to vector<12x12xf32>
    %524 = vector.broadcast %522 : vector<1x12xf32> to vector<12x12xf32>
    %525 = arith.addf %523, %524 : vector<12x12xf32>
    %cst_211 = arith.constant 0.000000e+00 : f32
    %526 = vector.broadcast %cst_211 : f32 to vector<12x12xf32>
    %527 = arith.cmpf ogt, %525, %526 : vector<12x12xf32>
    %cst_212 = arith.constant 2.000000e-01 : f32
    %528 = vector.broadcast %cst_212 : f32 to vector<12x12xf32>
    %529 = arith.mulf %528, %525 : vector<12x12xf32>
    %530 = arith.select %527, %525, %529 : vector<12x12xi1>, vector<12x12xf32>
    %cst_213 = arith.constant 0.000000e+00 : f32
    %531 = vector.broadcast %cst_213 : f32 to vector<12x12xf32>
    %532 = arith.cmpf ogt, %511, %531 : vector<12x12xf32>
    %cst_214 = arith.constant -1.000000e+30 : f32
    %533 = vector.broadcast %cst_214 : f32 to vector<12x12xf32>
    %534 = arith.select %532, %530, %533 : vector<12x12xi1>, vector<12x12xf32>
    %cst_215 = arith.constant dense<0xFF800000> : vector<12xf32>
    %535 = vector.multi_reduction <maximumf>, %534, %cst_215 [1] : vector<12x12xf32> to vector<12xf32>
    %536 = vector.shape_cast %535 : vector<12xf32> to vector<12x1xf32>
    %537 = vector.broadcast %536 : vector<12x1xf32> to vector<12x12xf32>
    %538 = arith.subf %534, %537 : vector<12x12xf32>
    %539 = math.exp %538 : vector<12x12xf32>
    %540 = arith.mulf %539, %511 : vector<12x12xf32>
    %cst_216 = arith.constant dense<0.000000e+00> : vector<12xf32>
    %541 = vector.multi_reduction <add>, %540, %cst_216 [1] : vector<12x12xf32> to vector<12xf32>
    %542 = vector.shape_cast %541 : vector<12xf32> to vector<12x1xf32>
    %cst_217 = arith.constant 9.99999968E-21 : f32
    %543 = vector.broadcast %cst_217 : f32 to vector<12x1xf32>
    %544 = arith.maximumf %542, %543 : vector<12x1xf32>
    %545 = tpu.reciprocal %544 {approx = true} : vector<12x1xf32> -> vector<12x1xf32>
    %546 = vector.broadcast %545 : vector<12x1xf32> to vector<12x12xf32>
    %547 = arith.mulf %540, %546 : vector<12x12xf32>
    %548 = arith.truncf %547 : vector<12x12xf32> to vector<12x12xbf16>
    %549 = arith.truncf %509 : vector<12x64xf32> to vector<12x64xbf16>
    %cst_218 = arith.constant dense<0.000000e+00> : vector<12x64xf32>
    %550 = tpu.matmul %548, %549, %cst_218 {dimension_numbers = #tpu.dot_dimension_numbers<[1], [0], [0], [1], [0, 0, 1, 1], [], []>} : vector<12x12xbf16>, vector<12x64xbf16>, vector<12x64xf32> -> vector<12x64xf32>
    %551 = vector.broadcast %517 : vector<1x64xf32> to vector<12x64xf32>
    %552 = arith.addf %550, %551 : vector<12x64xf32>
    %cst_219 = arith.constant 0.000000e+00 : f32
    %553 = vector.broadcast %cst_219 : f32 to vector<12x64xf32>
    %554 = arith.cmpf ogt, %552, %553 : vector<12x64xf32>
    %cst_220 = arith.constant 0.00999999977 : f32
    %555 = vector.broadcast %cst_220 : f32 to vector<12x64xf32>
    %556 = arith.mulf %555, %552 : vector<12x64xf32>
    %557 = arith.select %554, %552, %556 : vector<12x64xi1>, vector<12x64xf32>
    %558 = vector.extract_strided_slice %557 {offsets = [0, 0], sizes = [8, 64], strides = [1, 1]} : vector<12x64xf32> to vector<8x64xf32>
    %559 = tpu.concatenate %295, %344, %451, %558, %246 in 0 : vector<8x64xf32>, vector<8x64xf32>, vector<8x64xf32>, vector<8x64xf32>, vector<8x64xf32> -> vector<40x64xf32>
    %560 = arith.truncf %559 : vector<40x64xf32> to vector<40x64xbf16>
    %c0_221 = arith.constant 0 : index
    %c0_222 = arith.constant 0 : index
    %c0_223 = arith.constant 0 : index
    %561 = vector.load %arg15[%c0_221, %c0_222, %c0_223] : memref<2x64x16xbf16, #tpu.memory_space<vmem>>, vector<1x64x16xbf16>
    %562 = vector.shape_cast %561 : vector<1x64x16xbf16> to vector<64x16xbf16>
    %cst_224 = arith.constant dense<0.000000e+00> : vector<8x16xf32>
    %563 = tpu.matmul %197, %562, %cst_224 {dimension_numbers = #tpu.dot_dimension_numbers<[1], [0], [0], [1], [0, 0, 1, 1], [], []>} : vector<8x64xbf16>, vector<64x16xbf16>, vector<8x16xf32> -> vector<8x16xf32>
    %c0_225 = arith.constant 0 : index
    %c0_226 = arith.constant 0 : index
    %c0_227 = arith.constant 0 : index
    %564 = vector.load %arg16[%c0_225, %c0_226, %c0_227] : memref<2x1x16xf32, #tpu.memory_space<vmem>>, vector<1x1x16xf32>
    %565 = vector.shape_cast %564 : vector<1x1x16xf32> to vector<1x16xf32>
    %566 = vector.broadcast %565 : vector<1x16xf32> to vector<8x16xf32>
    %567 = arith.addf %563, %566 : vector<8x16xf32>
    %c1_228 = arith.constant 1 : index
    %c0_229 = arith.constant 0 : index
    %c0_230 = arith.constant 0 : index
    %568 = vector.load %arg15[%c1_228, %c0_229, %c0_230] : memref<2x64x16xbf16, #tpu.memory_space<vmem>>, vector<1x64x16xbf16>
    %569 = vector.shape_cast %568 : vector<1x64x16xbf16> to vector<64x16xbf16>
    %cst_231 = arith.constant dense<0.000000e+00> : vector<40x16xf32>
    %570 = tpu.matmul %560, %569, %cst_231 {dimension_numbers = #tpu.dot_dimension_numbers<[1], [0], [0], [1], [0, 0, 1, 1], [], []>} : vector<40x64xbf16>, vector<64x16xbf16>, vector<40x16xf32> -> vector<40x16xf32>
    %c1_232 = arith.constant 1 : index
    %c0_233 = arith.constant 0 : index
    %c0_234 = arith.constant 0 : index
    %571 = vector.load %arg16[%c1_232, %c0_233, %c0_234] : memref<2x1x16xf32, #tpu.memory_space<vmem>>, vector<1x1x16xf32>
    %572 = vector.shape_cast %571 : vector<1x1x16xf32> to vector<1x16xf32>
    %573 = vector.broadcast %572 : vector<1x16xf32> to vector<40x16xf32>
    %574 = arith.addf %570, %573 : vector<40x16xf32>
    %575 = tpu.concatenate %567, %567, %567, %567, %567 in 0 : vector<8x16xf32>, vector<8x16xf32>, vector<8x16xf32>, vector<8x16xf32>, vector<8x16xf32> -> vector<40x16xf32>
    %576 = arith.mulf %575, %574 : vector<40x16xf32>
    %cst_235 = arith.constant dense<0.000000e+00> : vector<40xf32>
    %577 = vector.multi_reduction <add>, %576, %cst_235 [1] : vector<40x16xf32> to vector<40xf32>
    %578 = vector.shape_cast %577 : vector<40xf32> to vector<40x1xf32>
    %cst_236 = arith.constant 2.500000e-01 : f32
    %579 = vector.broadcast %cst_236 : f32 to vector<40x1xf32>
    %580 = arith.mulf %578, %579 : vector<40x1xf32>
    %581 = vector.extract_strided_slice %580 {offsets = [0, 0], sizes = [8, 1], strides = [1, 1]} : vector<40x1xf32> to vector<8x1xf32>
    %582 = vector.extract_strided_slice %580 {offsets = [8, 0], sizes = [8, 1], strides = [1, 1]} : vector<40x1xf32> to vector<8x1xf32>
    %583 = vector.extract_strided_slice %580 {offsets = [16, 0], sizes = [8, 1], strides = [1, 1]} : vector<40x1xf32> to vector<8x1xf32>
    %584 = vector.extract_strided_slice %580 {offsets = [24, 0], sizes = [8, 1], strides = [1, 1]} : vector<40x1xf32> to vector<8x1xf32>
    %585 = vector.extract_strided_slice %580 {offsets = [32, 0], sizes = [8, 1], strides = [1, 1]} : vector<40x1xf32> to vector<8x1xf32>
    %586 = arith.maximumf %581, %582 : vector<8x1xf32>
    %587 = arith.maximumf %586, %583 : vector<8x1xf32>
    %588 = arith.maximumf %587, %584 : vector<8x1xf32>
    %589 = arith.maximumf %588, %585 : vector<8x1xf32>
    %590 = arith.subf %581, %589 : vector<8x1xf32>
    %591 = math.exp %590 : vector<8x1xf32>
    %592 = arith.subf %582, %589 : vector<8x1xf32>
    %593 = math.exp %592 : vector<8x1xf32>
    %594 = arith.subf %583, %589 : vector<8x1xf32>
    %595 = math.exp %594 : vector<8x1xf32>
    %596 = arith.subf %584, %589 : vector<8x1xf32>
    %597 = math.exp %596 : vector<8x1xf32>
    %598 = arith.subf %585, %589 : vector<8x1xf32>
    %599 = math.exp %598 : vector<8x1xf32>
    %600 = arith.addf %591, %593 : vector<8x1xf32>
    %601 = arith.addf %600, %595 : vector<8x1xf32>
    %602 = arith.addf %601, %597 : vector<8x1xf32>
    %603 = arith.addf %602, %599 : vector<8x1xf32>
    %604 = tpu.reciprocal %603 {approx = true} : vector<8x1xf32> -> vector<8x1xf32>
    %cst_237 = arith.constant 0.000000e+00 : f32
    %605 = vector.broadcast %cst_237 : f32 to vector<8x64xf32>
    %606 = arith.mulf %591, %604 : vector<8x1xf32>
    %607 = vector.extract_strided_slice %559 {offsets = [0, 0], sizes = [8, 64], strides = [1, 1]} : vector<40x64xf32> to vector<8x64xf32>
    %608 = vector.broadcast %606 : vector<8x1xf32> to vector<8x64xf32>
    %609 = arith.mulf %608, %607 : vector<8x64xf32>
    %610 = arith.addf %605, %609 : vector<8x64xf32>
    %611 = arith.mulf %593, %604 : vector<8x1xf32>
    %612 = vector.extract_strided_slice %559 {offsets = [8, 0], sizes = [8, 64], strides = [1, 1]} : vector<40x64xf32> to vector<8x64xf32>
    %613 = vector.broadcast %611 : vector<8x1xf32> to vector<8x64xf32>
    %614 = arith.mulf %613, %612 : vector<8x64xf32>
    %615 = arith.addf %610, %614 : vector<8x64xf32>
    %616 = arith.mulf %595, %604 : vector<8x1xf32>
    %617 = vector.extract_strided_slice %559 {offsets = [16, 0], sizes = [8, 64], strides = [1, 1]} : vector<40x64xf32> to vector<8x64xf32>
    %618 = vector.broadcast %616 : vector<8x1xf32> to vector<8x64xf32>
    %619 = arith.mulf %618, %617 : vector<8x64xf32>
    %620 = arith.addf %615, %619 : vector<8x64xf32>
    %621 = arith.mulf %597, %604 : vector<8x1xf32>
    %622 = vector.extract_strided_slice %559 {offsets = [24, 0], sizes = [8, 64], strides = [1, 1]} : vector<40x64xf32> to vector<8x64xf32>
    %623 = vector.broadcast %621 : vector<8x1xf32> to vector<8x64xf32>
    %624 = arith.mulf %623, %622 : vector<8x64xf32>
    %625 = arith.addf %620, %624 : vector<8x64xf32>
    %626 = arith.mulf %599, %604 : vector<8x1xf32>
    %627 = vector.extract_strided_slice %559 {offsets = [32, 0], sizes = [8, 64], strides = [1, 1]} : vector<40x64xf32> to vector<8x64xf32>
    %628 = vector.broadcast %626 : vector<8x1xf32> to vector<8x64xf32>
    %629 = arith.mulf %628, %627 : vector<8x64xf32>
    %630 = arith.addf %625, %629 : vector<8x64xf32>
    %631 = tpu.concatenate %196, %630 in 1 : vector<8x64xf32>, vector<8x64xf32> -> vector<8x128xf32>
    %632 = arith.truncf %631 : vector<8x128xf32> to vector<8x128xbf16>
    %c0_238 = arith.constant 0 : index
    %c0_239 = arith.constant 0 : index
    %633 = vector.load %arg17[%c0_238, %c0_239] : memref<128x8xbf16, #tpu.memory_space<vmem>>, vector<128x8xbf16>
    %cst_240 = arith.constant dense<0.000000e+00> : vector<8x8xf32>
    %634 = tpu.matmul %632, %633, %cst_240 {dimension_numbers = #tpu.dot_dimension_numbers<[1], [0], [0], [1], [0, 0, 1, 1], [], []>} : vector<8x128xbf16>, vector<128x8xbf16>, vector<8x8xf32> -> vector<8x8xf32>
    %c0_241 = arith.constant 0 : index
    %c0_242 = arith.constant 0 : index
    %635 = vector.load %arg18[%c0_241, %c0_242] : memref<1x8xf32, #tpu.memory_space<vmem>>, vector<1x8xf32>
    %636 = vector.broadcast %635 : vector<1x8xf32> to vector<8x8xf32>
    %637 = arith.addf %634, %636 : vector<8x8xf32>
    %cst_243 = arith.constant dense<0xFF800000> : vector<8xf32>
    %638 = vector.multi_reduction <maximumf>, %637, %cst_243 [1] : vector<8x8xf32> to vector<8xf32>
    %639 = vector.shape_cast %638 : vector<8xf32> to vector<8x1xf32>
    %640 = vector.broadcast %639 : vector<8x1xf32> to vector<8x8xf32>
    %641 = arith.subf %637, %640 : vector<8x8xf32>
    %642 = math.exp %641 : vector<8x8xf32>
    %cst_244 = arith.constant dense<0.000000e+00> : vector<8xf32>
    %643 = vector.multi_reduction <add>, %642, %cst_244 [1] : vector<8x8xf32> to vector<8xf32>
    %644 = vector.shape_cast %643 : vector<8xf32> to vector<8x1xf32>
    %645 = math.log %644 : vector<8x1xf32>
    %646 = arith.addf %645, %639 : vector<8x1xf32>
    %647 = vector.broadcast %646 : vector<8x1xf32> to vector<8x8xf32>
    %648 = arith.subf %637, %647 : vector<8x8xf32>
    %c0_245 = arith.constant 0 : index
    %c0_246 = arith.constant 0 : index
    %649 = vector.load %arg19[%c0_245, %c0_246] : memref<8x8xf32, #tpu.memory_space<vmem>>, vector<8x8xf32>
    tpu.vector_store %arg19[%c0_245, %c0_246], %648 {strides = array<i32>} : memref<8x8xf32, #tpu.memory_space<vmem>>, vector<8x8xf32>,
    return
  }
}

</mosaic_0001>

<bundles_post_ra>
// kernel: tpu_custom_call.1
= control target key start
LH: loop header
LB: loop body
LE: loop exit
PB: predicated region body
PF: predicated region fallthrough
CT: control target
= control target key end

     0   :  { %s4549_s0 = inlined_call_operand.vmem [shape: bf16[64,16], index: 0, kind: input, shape index: {}]   ;;  %s4550_s1 = inlined_call_operand.vmem [shape: bf16[16,32], index: 1, kind: input, shape index: {}]   ;;  %s4551_s2 = inlined_call_operand.hbm [shape: f32[1,32], index: 2, kind: input, shape index: {}]   ;;  %s4552_s3 = inlined_call_operand.vmem [shape: bf16[32,128], index: 3, kind: input, shape index: {}]   ;;  %s4553_s4 = inlined_call_operand.vmem [shape: bf16[32,128], index: 4, kind: input, shape index: {}]   ;;  %s4554_s5 = inlined_call_operand.hbm [shape: f32[1,128], index: 5, kind: input, shape index: {}]   ;;  %s4555_s6 = inlined_call_operand.vmem [shape: f32[8,32], index: 6, kind: input, shape index: {}]   ;;  %s4556_s7 = inlined_call_operand.vmem [shape: f32[2,8,8], index: 7, kind: input, shape index: {}]   ;;  %s4557_s8 = inlined_call_operand.vmem [shape: f32[2,10,10], index: 8, kind: input, shape index: {}]   ;;  %s4558_s9 = inlined_call_operand.vmem [shape: f32[2,12,12], index: 9, kind: input, shape index: {}]   ;;  %s4559_s10 = inlined_call_operand.vmem [shape: bf16[64,192], index: 10, kind: input, shape index: {}]   ;;  %s4560_s11 = inlined_call_operand.vmem [shape: bf16[4,64,64], index: 11, kind: input, shape index: {}]   ;;  %s4561_s12 = inlined_call_operand.vmem [shape: bf16[7,1,64], index: 12, kind: input, shape index: {}]   ;;  %s4562_s13 = inlined_call_operand.vmem [shape: f32[7,1,64], index: 13, kind: input, shape index: {}]   ;;  %s4563_s14 = inlined_call_operand.vmem [shape: f32[7,1,64], index: 14, kind: input, shape index: {}]   ;;  %s4564_s15 = inlined_call_operand.vmem [shape: bf16[2,64,16], index: 15, kind: input, shape index: {}]   ;;  %s4565_s16 = inlined_call_operand.vmem [shape: f32[2,1,16], index: 16, kind: input, shape index: {}]   ;;  %s4566_s17 = inlined_call_operand.vmem [shape: bf16[128,8], index: 17, kind: input, shape index: {}]   ;;  %s4567_s18 = inlined_call_operand.vmem [shape: f32[1,8], index: 18, kind: input, shape index: {}]   ;;  %s4568_s19 = inlined_call_operand.hbm [shape: f32[8,8], index: 19, kind: output, shape index: {}]  }
   0x1   :  { %4572 = sst [smem:[#allocation11_spill]] %s4549_s0 }
   0x2   :  { %4573 = sst [smem:[#allocation12_spill]] %s4550_s1 }
   0x3   :  { %4574 = sst [smem:[#allocation13_spill]] %s4551_s2 }
   0x4   :  { %4575 = sst [smem:[#allocation14_spill]] %s4552_s3 }
   0x5   :  { %24 = vsyncpa [#allocation3], 0 }
   0x6   :  { %25 = vsyncpa [#allocation6], 0 }
   0x7   :  { %26 = vsyncpa [#allocation4], 0  ;;  %s3746_s0 = smov [#allocation2]   ;;  %s3747_s20 = smov [#allocation5]  }
   0x8   :  { %s37_s30 = sshll.u32 %s3746_s0, 4  ;;  %s51_s21 = sshll.u32 %s3747_s20, 4  ;;  %s38_s30 = int_to_ptr.vmem [resolvable:$true] %s37_s30  ;;  %s52_s21 = int_to_ptr.vmem [resolvable:$true] %s51_s21 }
   0x9   :  { %s4576_s2 = sld [smem:[#allocation13_spill]] }
   0xf   :  { %s3674_s23 = scalar_lea.hbm %s4576_s2, 16 }
  0x10   :  { %p3675_p0 = scmp.ne.s32.totalorder %s4576_s2, %s3674_s23  ;;  %p3678_p1 = scmp.lt.u32.totalorder %s3674_s23, %s4576_s2 }
  0x12   :  { %p3680_p2 = pnand %p3678_p1, %p3675_p0 }
  0x14   :  { %3683 = shalt.err (!%p3680_p2)
}
  0x15   :  { %s3684_s27 = scalar_lea.vmem %s38_s30, 16  ;;  %s3688_s28 = scalar_lea.vmem %s38_s30, 32 }
  0x16   :  { %p3685_p3 = scmp.ne.s32.totalorder %s38_s30, %s3684_s27  ;;  %p3689_p4 = scmp.lt.s32.totalorder %s38_s30, %s38_s30 }
  0x17   :  { %p3690_p5 = scmp.lt.s32.totalorder %s3688_s28, %s3684_s27 }
  0x19   :  { %p3691_p6 = por %p3690_p5, %p3689_p4 }
  0x1b   :  { %p3692_p7 = pnand %p3691_p6, %p3685_p3 }
  0x1d   :  { %3695 = shalt.err (!%p3692_p7)
}
  0x1e   :  { %40 = dma.hbm_to_vmem [thread:$0]  %s4576_s2, 16, %s38_s30, [#allocation3]  }
  0x1f   :  { %s3696_s22 = scalar_lea.hbm %s4554_s5, 16 }
  0x20   :  { %p3697_p8 = scmp.ne.s32.totalorder %s4554_s5, %s3696_s22  ;;  %p3700_p9 = scmp.lt.u32.totalorder %s3696_s22, %s4554_s5 }
  0x22   :  { %p3702_p10 = pnand %p3700_p9, %p3697_p8 }
  0x24   :  { %3705 = shalt.err (!%p3702_p10)
}
  0x25   :  { %s3706_s26 = scalar_lea.vmem %s52_s21, 16  ;;  %s3710_s27 = scalar_lea.vmem %s52_s21, 32 }
  0x26   :  { %p3707_p11 = scmp.ne.s32.totalorder %s52_s21, %s3706_s26  ;;  %p3711_p12 = scmp.lt.s32.totalorder %s52_s21, %s52_s21 }
  0x27   :  { %p3712_p13 = scmp.lt.s32.totalorder %s3710_s27, %s3706_s26 }
  0x29   :  { %p3713_p0 = por %p3712_p13, %p3711_p12 }
  0x2b   :  { %p3714_p1 = pnand %p3713_p0, %p3707_p11 }
  0x2d   :  { %3717 = shalt.err (!%p3714_p1)
}
  0x2e   :  { %54 = dma.hbm_to_vmem [thread:$0]  %s4554_s5, 16, %s52_s21, [#allocation6]  }
  0x2f   :  { %3740 = dma.done.wait [#allocation3], 16  }
  0x30   :  { %3741 = vsyncadd [#allocation3], 4294967280 }
  0x31   :  { %3742 = dma.done.wait [#allocation6], 16  }
  0x32   :  { %3743 = vsyncadd [#allocation6], 4294967280  ;;  %s4577_s0 = sld [smem:[#allocation12_spill]]  ;;  %vm131_vm0 = vcmask 130048   ;;  %s4578_s22 = sld [smem:[#allocation11_spill]]  ;;  %v3748_v7 = vmov 0.0  }
  0x33   :  { %s4579_s26 = sld [smem:[#allocation14_spill]]  ;;  %v2931_v8 = vld [vmem:[#allocation2] ss:$0 sm:$0xff]  ;;  %vm244_vm1 = vcmask 261120   ;;  %v3916_v32 = vld [vmem:[%s4553_s4 + $0x8] sm:$0xff]   ;;  %vm3749_vm2 = vmmov 0  }
  0x34   :  { %v3908_v23 = vld [vmem:[%s4553_s4] sm:$0xff]   ;;  %v3750_v39 = vmov 0   ;;  %s3751_s4 = smov 64   ;;  %vm1080_vm3 = vcmask 523264   ;;  %vm1215_vm4 = vcmask 1043456   ;;  %vm995_vm5 = vcmask 64512  }
  0x35   :  { %v2941_v40 = vld [vmem:[#allocation5] ss:$0 sm:$0xff]  ;;  %vm1647_vm15 = vcmask 517120  }
  0x38   :  { %v3497_v0 = vld [vmem:[%s4577_s0] sm:$0xff]   ;;  %v3499_v2 = vld [vmem:[%s4578_s22 + $0x8] sm:$0xff]   ;;  %v3500_v3 = vld [vmem:[%s4578_s22 + $0x10] sm:$0xff]  }
  0x39   :  { %v3498_v1 = vld [vmem:[%s4578_s22] sm:$0xff]   ;;  %3210 = vmatprep.subr.bf16.mxu0 %v3497_v0  ;;  %v3502_v5 = vld [vmem:[%s4578_s22 + $0x18] sm:$0xff]   ;;  %v3503_v6 = vld [vmem:[%s4579_s26 + $0x8] sm:$0xff]   ;;  %s3752_s22 = smov 32  }
  0x3a   :  { %3211 = vmatpush3.bf16.msra.mxu0 %v3497_v0  ;;  %3212 = vmatprep.mubr.msk.bf16.mxu0 %vm131_vm0, %v3498_v1  ;;  %v3501_v4 = vld [vmem:[%s4579_s26] sm:$0xff]  }
  0x3b   :  { %3220 = vmatprep.subr.bf16.mxu0 %v3501_v4  ;;  %3485 = vmatprep.subr.bf16.mxu1 %v3501_v4 }
  0x3c   :  { %3487 = vmatpush3.bf16.msra.mxu1 %v3501_v4 }
  0x3d   :  { %3213 = vmatmul.mubr.msk.bf16.vlgmr.msra.gmra.mrb[0].mxu0 %vm131_vm0, %v3499_v2  ;;  %3486 = vmatprep.subr.bf16.mxu1 %v3503_v6 }
  0x3e   :  { %3216 = vmatprep.mubr.msk.bf16.mxu0 %vm131_vm0, %v3500_v3  ;;  %3221 = vmatpush3.bf16.msra.mxu0 %v3501_v4 }
  0x3f   :  { %3222 = vmatprep.subr.bf16.mxu0 %v3503_v6 }
  0x40   :  { %3488 = vmatpush3.bf16.msra.mxu1 %v3503_v6 }
  0x41   :  { %3240 = vmatprep.subr.bf16.mxu1 %v3748_v7 }
  0x42   :  { %3223 = vmatpush3.bf16.msra.mxu0 %v3503_v6 }
  0x43   :  { %3232 = vmatprep.subr.bf16.mxu0 %v3748_v7 }
  0x45   :  { %3217 = vmatmul.mubr.msk.bf16.gmra.mrb[4].mxu0 %vm131_vm0, %v3502_v5 }
 0x110   :  { %v3214_v9 = vpop.f32.mrb[0].mxu0 }
 0x111   :  { %v187_v10 = vadd.f32 %v3214_v9, %v2931_v8  ;;  %v178_v11 = vpop.f32.mrb[1].mxu0 }
 0x112   :  { %v179_v12 = vadd.f32 %v2931_v8, %v178_v11  ;;  %v3215_v13 = vpop.f32.mrb[2].mxu0 }
 0x113   :  { %v190_v14 = vadd.f32 %v3215_v13, %v2931_v8  ;;  %v181_v15 = vpop.f32.mrb[3].mxu0  ;;  %v211_v17 = vmax.f32 %v187_v10, 0.0 }
 0x114   :  { %v182_v16 = vadd.f32 %v2931_v8, %v181_v15  ;;  %v209_v19 = vmax.f32 %v179_v12, 0.0 }
 0x115   :  { %v212_v18 = vmax.f32 %v190_v14, 0.0 }
 0x116   :  { %v210_v20 = vmax.f32 %v182_v16, 0.0 }
 0x117   :  { %v218_v21 = vpack.c.bf16 %v212_v18, %v211_v17 }
 0x118   :  { %v217_v22 = vpack.c.bf16 %v210_v20, %v209_v19  ;;  %v3218_v24 = vpop.f32.mrb[4].mxu0 }
 0x119   :  { %v203_v25 = vadd.f32 %v3218_v24, %v2931_v8  ;;  %v194_v26 = vpop.f32.mrb[5].mxu0 }
 0x11a   :  { %3224 = vmatprep.mubr.msk.bf16.mxu0 %vm244_vm1, %v217_v22  ;;  %v195_v27 = vadd.f32 %v2931_v8, %v194_v26  ;;  %v3219_v28 = vpop.f32.mrb[6].mxu0 }
 0x11b   :  { %3225 = vmatmul.mubr.msk.bf16.vlgmr.msra.gmra.mrb[8].mxu0 %vm244_vm1, %v218_v21  ;;  %v215_v29 = vmax.f32 %v203_v25, 0.0  ;;  %v206_v30 = vadd.f32 %v3219_v28, %v2931_v8  ;;  %v197_v31 = vpop.f32.mrb[7].mxu0 }
 0x11c   :  { %3233 = vmatpush3.bf16.msra.mxu0 %v3908_v23  ;;  %3236 = vmatprep.mubr.msk.bf16.mxu0 %vm3749_vm2, %v3748_v7  ;;  %v213_v33 = vmax.f32 %v195_v27, 0.0  ;;  %v198_v34 = vadd.f32 %v2931_v8, %v197_v31 }
 0x11d   :  { %3234 = vmatprep.subr.bf16.mxu0 %v3748_v7  ;;  %v216_v35 = vmax.f32 %v206_v30, 0.0 }
 0x11e   :  { %v214_v36 = vmax.f32 %v198_v34, 0.0 }
 0x11f   :  { %v220_v37 = vpack.c.bf16 %v216_v35, %v215_v29 }
 0x120   :  { %3235 = vmatpush3.bf16.msra.mxu0 %v3916_v32  ;;  %v219_v38 = vpack.c.bf16 %v214_v36, %v213_v33 }
 0x121   :  { %3248 = vmatprep.subr.bf16.mxu0 %v3748_v7 }
 0x122   :  { %3228 = vmatprep.mubr.msk.bf16.mxu1 %vm244_vm1, %v219_v38 }
 0x123   :  { %3237 = vmatmul.mubr.bf16.vlgmr.msra.gmra.mrb[12].mxu0 %v3750_v39  ;;  %3229 = vmatmul.mubr.msk.bf16.vlgmr.msra.gmra.mrb[0].mxu1 %vm244_vm1, %v220_v37 }
 0x124   :  { %3241 = vmatpush3.bf16.msra.mxu1 %v3908_v23  ;;  %3244 = vmatprep.mubr.msk.bf16.mxu1 %vm3749_vm2, %v3748_v7 }
 0x125   :  { %3242 = vmatprep.subr.bf16.mxu1 %v3748_v7  ;;  %3249 = vmatpush3.bf16.msra.mxu0 %v3908_v23 }
 0x126   :  { %3250 = vmatprep.subr.bf16.mxu0 %v3748_v7  ;;  %3252 = vmatprep.mubr.msk.bf16.mxu0 %vm3749_vm2, %v3748_v7 }
 0x128   :  { %3243 = vmatpush3.bf16.msra.mxu1 %v3916_v32 }
 0x129   :  { %3251 = vmatpush3.bf16.msra.mxu0 %v3916_v32  ;;  %3256 = vmatprep.subr.bf16.mxu1 %v3748_v7 }
 0x12a   :  { %3264 = vmatprep.subr.bf16.mxu0 %v3748_v7 }
 0x1ee   :  { %v3226_v41 = vpop.f32.mrb[8].mxu0 }
 0x1ef   :  { %v3938_v42 = vadd.f32 %v3226_v41, %v2941_v40  ;;  %v291_v43 = vpop.f32.mrb[9].mxu0 }
 0x1f0   :  { %v3227_v44 = vpop.f32.mrb[10].mxu0  ;;  %v292_v48 = vadd.f32 %v2941_v40, %v291_v43 }
 0x1f1   :  { %v3940_v45 = vadd.f32 %v3227_v44, %v2941_v40  ;;  %v294_v46 = vpop.f32.mrb[11].mxu0 }
 0x1f2   :  { %v295_v47 = vadd.f32 %v2941_v40, %v294_v46 }
 0x1f6   :  { %v375_v49 = vpop.f32.mrb[12].mxu0  ;;  %v3230_v54 = vpop.f32.mrb[0].mxu1 }
 0x1f7   :  { %v381_v50 = vadd.f32 %v375_v49, %v292_v48  ;;  %v3238_v51 = vpop.f32.mrb[13].mxu0  ;;  %v3942_v55 = vadd.f32 %v3230_v54, %v2941_v40  ;;  %v307_v56 = vpop.f32.mrb[1].mxu1 }
 0x1f8   :  { %v378_v52 = vpop.f32.mrb[14].mxu0  ;;  %v3944_v57 = vadd.f32 %v2941_v40, %v307_v56  ;;  %v3231_v58 = vpop.f32.mrb[2].mxu1 }
 0x1f9   :  { %3550 = vtanh.f32 %v381_v50  ;;  %v3239_v53 = vpop.f32.mrb[15].mxu0  ;;  %v3946_v59 = vadd.f32 %v3231_v58, %v2941_v40  ;;  %v310_v60 = vpop.f32.mrb[3].mxu1  ;;  %v2950_v63 = vmul.f32 -1.442695, %v381_v50 }
 0x1fa   :  { %v3948_v61 = vadd.f32 %v2941_v40, %v310_v60 }
 0x1fb   :  { %3552 = vpow2.f32 %v2950_v63 }
 0x203   :  { %v3551_v62 = vpop.eup %3550 }
 0x204   :  { %391 = vrot.lane.b32.xlu0 %v3551_v62, %s3751_s4 }
 0x205   :  { %v3553_v0 = vpop.eup %3552 }
 0x206   :  { %v385_v1 = vadd.f32 1.0, %v3553_v0 }
 0x208   :  { %3554 = vrcp.f32 %v385_v1 }
 0x212   :  { %v3555_v2 = vpop.eup %3554 }
 0x213   :  { %v389_v5 = vmul.f32 0.0, %v3555_v2 }
 0x276   :  { %v392_v3 = vpop.permute.xlu0 %391 }
 0x277   :  { %v394_v4 = vmul.f32 %v3555_v2, %v392_v3 }
 0x279   :  { %396 = vrot.lane.b32.xlu0 %v394_v4, %s3752_s22 }
 0x2eb   :  { %v397_v6 = vpop.permute.xlu0 %396 }
 0x2ec   :  { %v399_v8 = vadd.f32 %v397_v6, %v389_v5 }
 0x2ee   :  { %3556 = vtanh.f32 %v399_v8 }
 0x2f8   :  { %v3557_v9 = vpop.eup %3556 }
 0x2f9   :  { %402 = vrot.lane.b32.xlu1 %v3557_v9, %s3751_s4 }
 0x36b   :  { %v403_v10 = vpop.permute.xlu1 %402 }
 0x36c   :  { %v405_v11 = vmul.f32 %v3555_v2, %v403_v10 }
 0x36e   :  { %v406_v12 = vpack.c.bf16 %v405_v11, %v405_v11 }
 0x370   :  { %408 = vrot.lane.b32.xlu1 %v406_v12, %s3752_s22 }
 0x3e2   :  { %v409_v13 = vpop.permute.xlu1 %408 }
 0x3e3   :  { %3245 = vmatmul.mubr.msk.bf16.vlgmr.msra.gmra.mrb[4].mxu1 %vm244_vm1, %v409_v13 }
 0x3e4   :  { %3257 = vmatpush3.bf16.msra.mxu1 %v3908_v23  ;;  %3260 = vmatprep.mubr.msk.bf16.mxu1 %vm3749_vm2, %v3748_v7 }
 0x3e5   :  { %3258 = vmatprep.subr.bf16.mxu1 %v3748_v7 }
 0x3e8   :  { %3259 = vmatpush3.bf16.msra.mxu1 %v3916_v32 }
 0x3e9   :  { %3272 = vmatprep.subr.bf16.mxu1 %v3748_v7 }
 0x4b6   :  { %v447_v14 = vpop.f32.mrb[4].mxu1 }
 0x4b7   :  { %v453_v15 = vadd.f32 %v447_v14, %v295_v47  ;;  %v3246_v16 = vpop.f32.mrb[5].mxu1 }
 0x4b8   :  { %v450_v17 = vpop.f32.mrb[6].mxu1 }
 0x4b9   :  { %3558 = vtanh.f32 %v453_v15  ;;  %v3247_v18 = vpop.f32.mrb[7].mxu1  ;;  %v2952_v20 = vmul.f32 -1.442695, %v453_v15 }
 0x4bb   :  { %3560 = vpow2.f32 %v2952_v20 }
 0x4c3   :  { %v3559_v19 = vpop.eup %3558 }
 0x4c4   :  { %463 = vrot.lane.b32.xlu0 %v3559_v19, %s3751_s4 }
 0x4c5   :  { %v3561_v21 = vpop.eup %3560 }
 0x4c6   :  { %v457_v22 = vadd.f32 1.0, %v3561_v21 }
 0x4c8   :  { %3562 = vrcp.f32 %v457_v22 }
 0x4d2   :  { %v3563_v24 = vpop.eup %3562 }
 0x4d3   :  { %v461_v27 = vmul.f32 %v3563_v24, %v399_v8 }
 0x536   :  { %v464_v25 = vpop.permute.xlu0 %463 }
 0x537   :  { %v466_v26 = vmul.f32 %v3563_v24, %v464_v25 }
 0x539   :  { %468 = vrot.lane.b32.xlu1 %v466_v26, %s3752_s22 }
 0x5ab   :  { %v469_v28 = vpop.permute.xlu1 %468 }
 0x5ac   :  { %v471_v29 = vadd.f32 %v469_v28, %v461_v27 }
 0x5ae   :  { %3564 = vtanh.f32 %v471_v29 }
 0x5b8   :  { %v3565_v30 = vpop.eup %3564 }
 0x5b9   :  { %474 = vrot.lane.b32.xlu0 %v3565_v30, %s3751_s4 }
 0x62b   :  { %v475_v31 = vpop.permute.xlu0 %474 }
 0x62c   :  { %v477_v33 = vmul.f32 %v3563_v24, %v475_v31 }
 0x62e   :  { %v478_v34 = vpack.c.bf16 %v477_v33, %v477_v33 }
 0x630   :  { %480 = vrot.lane.b32.xlu1 %v478_v34, %s3752_s22 }
 0x6a2   :  { %v481_v35 = vpop.permute.xlu1 %480 }
 0x6a3   :  { %3253 = vmatmul.mubr.msk.bf16.vlgmr.msra.gmra.mrb[16].mxu0 %vm244_vm1, %v481_v35 }
 0x6a4   :  { %3265 = vmatpush3.bf16.msra.mxu0 %v3908_v23  ;;  %3268 = vmatprep.mubr.msk.bf16.mxu0 %vm3749_vm2, %v3748_v7 }
 0x6a5   :  { %3266 = vmatprep.subr.bf16.mxu0 %v3748_v7 }
 0x6a8   :  { %3267 = vmatpush3.bf16.msra.mxu0 %v3916_v32 }
 0x6a9   :  { %3280 = vmatprep.subr.bf16.mxu0 %v3748_v7 }
 0x776   :  { %v519_v36 = vpop.f32.mrb[16].mxu0 }
 0x777   :  { %v525_v37 = vadd.f32 %v519_v36, %v3938_v42  ;;  %v3254_v38 = vpop.f32.mrb[17].mxu0 }
 0x778   :  { %v522_v40 = vpop.f32.mrb[18].mxu0 }
 0x779   :  { %3566 = vtanh.f32 %v525_v37  ;;  %v3255_v41 = vpop.f32.mrb[19].mxu0  ;;  %v2954_v44 = vmul.f32 -1.442695, %v525_v37 }
 0x77b   :  { %3568 = vpow2.f32 %v2954_v44 }
 0x783   :  { %v3567_v43 = vpop.eup %3566 }
 0x784   :  { %535 = vrot.lane.b32.xlu0 %v3567_v43, %s3751_s4 }
 0x785   :  { %v3569_v46 = vpop.eup %3568 }
 0x786   :  { %v529_v47 = vadd.f32 1.0, %v3569_v46 }
 0x788   :  { %3570 = vrcp.f32 %v529_v47 }
 0x792   :  { %v3571_v48 = vpop.eup %3570 }
 0x793   :  { %v533_v51 = vmul.f32 %v3571_v48, %v471_v29 }
 0x7f6   :  { %v536_v49 = vpop.permute.xlu0 %535 }
 0x7f7   :  { %v538_v50 = vmul.f32 %v3571_v48, %v536_v49 }
 0x7f9   :  { %540 = vrot.lane.b32.xlu1 %v538_v50, %s3752_s22 }
 0x86b   :  { %v541_v52 = vpop.permute.xlu1 %540 }
 0x86c   :  { %v543_v42 = vadd.f32 %v541_v52, %v533_v51 }
 0x86e   :  { %3572 = vtanh.f32 %v543_v42 }
 0x878   :  { %v3573_v53 = vpop.eup %3572 }
 0x879   :  { %546 = vrot.lane.b32.xlu0 %v3573_v53, %s3751_s4 }
 0x8eb   :  { %v547_v54 = vpop.permute.xlu0 %546 }
 0x8ec   :  { %v549_v56 = vmul.f32 %v3571_v48, %v547_v54 }
 0x8ee   :  { %v550_v58 = vpack.c.bf16 %v549_v56, %v549_v56 }
 0x8f0   :  { %552 = vrot.lane.b32.xlu1 %v550_v58, %s3752_s22 }
 0x962   :  { %v553_v60 = vpop.permute.xlu1 %552 }
 0x963   :  { %3261 = vmatmul.mubr.msk.bf16.vlgmr.msra.gmra.mrb[8].mxu1 %vm244_vm1, %v553_v60 }
 0x964   :  { %3273 = vmatpush3.bf16.msra.mxu1 %v3908_v23  ;;  %3276 = vmatprep.mubr.msk.bf16.mxu1 %vm3749_vm2, %v3748_v7 }
 0x965   :  { %3274 = vmatprep.subr.bf16.mxu1 %v3748_v7 }
 0x968   :  { %3275 = vmatpush3.bf16.msra.mxu1 %v3916_v32 }
 0x969   :  { %3288 = vmatprep.subr.bf16.mxu1 %v3748_v7 }
 0xa36   :  { %v591_v62 = vpop.f32.mrb[8].mxu1 }
 0xa37   :  { %v597_v63 = vadd.f32 %v591_v62, %v3940_v45  ;;  %v3262_v0 = vpop.f32.mrb[9].mxu1 }
 0xa38   :  { %v594_v1 = vpop.f32.mrb[10].mxu1 }
 0xa39   :  { %3574 = vtanh.f32 %v597_v63  ;;  %v3263_v2 = vpop.f32.mrb[11].mxu1  ;;  %v2956_v4 = vmul.f32 -1.442695, %v597_v63 }
 0xa3b   :  { %3576 = vpow2.f32 %v2956_v4 }
 0xa43   :  { %v3575_v3 = vpop.eup %3574 }
 0xa44   :  { %607 = vrot.lane.b32.xlu0 %v3575_v3, %s3751_s4 }
 0xa45   :  { %v3577_v5 = vpop.eup %3576 }
 0xa46   :  { %v601_v6 = vadd.f32 1.0, %v3577_v5 }
 0xa48   :  { %3578 = vrcp.f32 %v601_v6 }
 0xa52   :  { %v3579_v8 = vpop.eup %3578 }
 0xa53   :  { %v605_v11 = vmul.f32 %v3579_v8, %v543_v42 }
 0xab6   :  { %v608_v9 = vpop.permute.xlu0 %607 }
 0xab7   :  { %v610_v10 = vmul.f32 %v3579_v8, %v608_v9 }
 0xab9   :  { %612 = vrot.lane.b32.xlu1 %v610_v10, %s3752_s22 }
 0xb2b   :  { %v613_v12 = vpop.permute.xlu1 %612 }
 0xb2c   :  { %v615_v45 = vadd.f32 %v613_v12, %v605_v11 }
 0xb2e   :  { %3580 = vtanh.f32 %v615_v45 }
 0xb38   :  { %v3581_v13 = vpop.eup %3580 }
 0xb39   :  { %618 = vrot.lane.b32.xlu0 %v3581_v13, %s3751_s4 }
 0xbab   :  { %v619_v14 = vpop.permute.xlu0 %618 }
 0xbac   :  { %v621_v15 = vmul.f32 %v3579_v8, %v619_v14 }
 0xbae   :  { %v622_v16 = vpack.c.bf16 %v621_v15, %v621_v15 }
 0xbb0   :  { %624 = vrot.lane.b32.xlu1 %v622_v16, %s3752_s22 }
 0xc22   :  { %v625_v17 = vpop.permute.xlu1 %624 }
 0xc23   :  { %3269 = vmatmul.mubr.msk.bf16.vlgmr.msra.gmra.mrb[20].mxu0 %vm244_vm1, %v625_v17 }
 0xc24   :  { %3281 = vmatpush3.bf16.msra.mxu0 %v3908_v23  ;;  %3284 = vmatprep.mubr.msk.bf16.mxu0 %vm3749_vm2, %v3748_v7 }
 0xc25   :  { %3282 = vmatprep.subr.bf16.mxu0 %v3748_v7 }
 0xc28   :  { %3283 = vmatpush3.bf16.msra.mxu0 %v3916_v32 }
 0xc29   :  { %3296 = vmatprep.subr.mxu0 %v3748_v7 }
 0xcf6   :  { %v663_v18 = vpop.f32.mrb[20].mxu0 }
 0xcf7   :  { %v669_v19 = vadd.f32 %v663_v18, %v3944_v57  ;;  %v3270_v20 = vpop.f32.mrb[21].mxu0 }
 0xcf8   :  { %v666_v21 = vpop.f32.mrb[22].mxu0 }
 0xcf9   :  { %3582 = vtanh.f32 %v669_v19  ;;  %v3271_v22 = vpop.f32.mrb[23].mxu0  ;;  %v2958_v25 = vmul.f32 -1.442695, %v669_v19 }
 0xcfb   :  { %3584 = vpow2.f32 %v2958_v25 }
 0xd03   :  { %v3583_v24 = vpop.eup %3582 }
 0xd04   :  { %679 = vrot.lane.b32.xlu0 %v3583_v24, %s3751_s4 }
 0xd05   :  { %v3585_v26 = vpop.eup %3584 }
 0xd06   :  { %v673_v27 = vadd.f32 1.0, %v3585_v26 }
 0xd08   :  { %3586 = vrcp.f32 %v673_v27 }
 0xd12   :  { %v3587_v28 = vpop.eup %3586 }
 0xd13   :  { %v677_v31 = vmul.f32 %v3587_v28, %v615_v45 }
 0xd76   :  { %v680_v29 = vpop.permute.xlu0 %679 }
 0xd77   :  { %v682_v30 = vmul.f32 %v3587_v28, %v680_v29 }
 0xd79   :  { %684 = vrot.lane.b32.xlu1 %v682_v30, %s3752_s22 }
 0xdeb   :  { %v685_v33 = vpop.permute.xlu1 %684 }
 0xdec   :  { %v687_v57 = vadd.f32 %v685_v33, %v677_v31  ;;  %v3506_v31 = vld [vmem:[%s4559_s10] ss:$8 sps:$4 sm:$0xff]   ;;  %v3508_v33 = vld [vmem:[%s4559_s10 + $0x4] ss:$8 sps:$4 sm:$0xff]  }
 0xdee   :  { %3588 = vtanh.f32 %v687_v57 }
 0xdf8   :  { %v3589_v34 = vpop.eup %3588 }
 0xdf9   :  { %690 = vrot.lane.b32.xlu0 %v3589_v34, %s3751_s4  ;;  %v3509_v34 = vld [vmem:[%s4559_s10 + $0x10] ss:$8 sps:$4 sm:$0xff]  }
 0xe6b   :  { %v691_v35 = vpop.permute.xlu0 %690 }
 0xe6c   :  { %v693_v36 = vmul.f32 %v3587_v28, %v691_v35  ;;  %v3514_v35 = vld [vmem:[%s4559_s10 + $0x24] ss:$8 sps:$4 sm:$0xff]  }
 0xe6e   :  { %v694_v37 = vpack.c.bf16 %v693_v36, %v693_v36  ;;  %v3512_v36 = vld [vmem:[%s4559_s10 + $0x20] ss:$8 sps:$4 sm:$0xff]  }
 0xe70   :  { %696 = vrot.lane.b32.xlu1 %v694_v37, %s3752_s22 }
 0xee2   :  { %v697_v38 = vpop.permute.xlu1 %696 }
 0xee3   :  { %3277 = vmatmul.mubr.msk.bf16.vlgmr.msra.gmra.mrb[12].mxu1 %vm244_vm1, %v697_v38  ;;  %v3517_v38 = vld [vmem:[%s4559_s10 + $0x34] ss:$8 sps:$4 sm:$0xff]  }
 0xee4   :  { %3289 = vmatpush3.bf16.msra.mxu1 %v3908_v23  ;;  %3292 = vmatprep.mubr.msk.bf16.mxu1 %vm3749_vm2, %v3748_v7 }
 0xee5   :  { %3290 = vmatprep.subr.bf16.mxu1 %v3748_v7 }
 0xee8   :  { %3291 = vmatpush3.bf16.msra.mxu1 %v3916_v32 }
 0xee9   :  { %1084 = vmatprep.subr.bf16.mxu1 %v3508_v33 }
 0xfb6   :  { %v735_v40 = vpop.f32.mrb[12].mxu1 }
 0xfb7   :  { %v741_v41 = vadd.f32 %v735_v40, %v3948_v61  ;;  %v3278_v43 = vpop.f32.mrb[13].mxu1  ;;  %v1024_v40 = vld [vmem:[%s4555_s6] sm:$0xff] }
 0xfb8   :  { %v738_v44 = vpop.f32.mrb[14].mxu1 }
 0xfb9   :  { %3590 = vtanh.f32 %v741_v41  ;;  %v3279_v46 = vpop.f32.mrb[15].mxu1  ;;  %v2960_v48 = vmul.f32 -1.442695, %v741_v41  ;;  %v3515_v41 = vld [vmem:[%s4559_s10 + $0x30] ss:$8 sps:$4 sm:$0xff]  }
 0xfbb   :  { %3592 = vpow2.f32 %v2960_v48 }
 0xfc3   :  { %v3591_v47 = vpop.eup %3590 }
 0xfc4   :  { %751 = vrot.lane.b32.xlu0 %v3591_v47, %s3751_s4  ;;  %v2984_v47 = vld [vmem:[%s4562_s13 + $0x1] ss:$0 sm:$0xff] }
 0xfc5   :  { %v3593_v23 = vpop.eup %3592 }
 0xfc6   :  { %v745_v49 = vadd.f32 1.0, %v3593_v23 }
 0xfc8   :  { %3594 = vrcp.f32 %v745_v49 }
 0xfd2   :  { %v3595_v50 = vpop.eup %3594 }
 0xfd3   :  { %v749_v32 = vmul.f32 %v3595_v50, %v687_v57  ;;  %v3511_v57 = vld [vmem:[%s4559_s10 + $0x14] ss:$8 sps:$4 sm:$0xff]  }
0x1036   :  { %v752_v51 = vpop.permute.xlu0 %751 }
0x1037   :  { %v754_v52 = vmul.f32 %v3595_v50, %v752_v51 }
0x1039   :  { %756 = vrot.lane.b32.xlu1 %v754_v52, %s3752_s22 }
0x10ab   :  { %v757_v42 = vpop.permute.xlu1 %756 }
0x10ac   :  { %v759_v61 = vadd.f32 %v757_v42, %v749_v32  ;;  %v2981_v42 = vld [vmem:[%s4561_s12 + $0x1] sm:$0x1] }
0x10ae   :  { %3596 = vtanh.f32 %v759_v61 }
0x10b8   :  { %v3597_v53 = vpop.eup %3596 }
0x10b9   :  { %762 = vrot.lane.b32.xlu0 %v3597_v53, %s3751_s4  ;;  %v3518_v53 = vld [vmem:[%s4560_s11] sm:$0xff]  }
0x112b   :  { %v763_v54 = vpop.permute.xlu0 %762 }
0x112c   :  { %v765_v56 = vmul.f32 %v3595_v50, %v763_v54  ;;  %v1125_v54 = vld [vmem:[%s4561_s12] sm:$0x1] }
0x112e   :  { %v766_v58 = vpack.c.bf16 %v765_v56, %v765_v56  ;;  %v3519_v56 = vld [vmem:[%s4560_s11 + $0x8] sm:$0xff]  }
0x1130   :  { %768 = vrot.lane.b32.xlu1 %v766_v58, %s3752_s22  ;;  %v3520_v58 = vld [vmem:[%s4560_s11 + $0x10] sm:$0xff]  }
0x11a2   :  { %v769_v60 = vpop.permute.xlu1 %768 }
0x11a3   :  { %3285 = vmatmul.mubr.msk.bf16.vlgmr.msra.gmra.mrb[24].mxu0 %vm244_vm1, %v769_v60  ;;  %v3521_v60 = vld [vmem:[%s4560_s11 + $0x18] sm:$0xff]  }
0x11a4   :  { %3298 = vmatprep.mubr.msk.f32.mxu0 %vm3749_vm2, %v3748_v7 }
0x1276   :  { %v807_v62 = vpop.f32.mrb[24].mxu0 }
0x1277   :  { %v813_v63 = vadd.f32 %v807_v62, %v3942_v55  ;;  %v3286_v0 = vpop.f32.mrb[25].mxu0 }
0x1278   :  { %v810_v1 = vpop.f32.mrb[26].mxu0 }
0x1279   :  { %3598 = vtanh.f32 %v813_v63  ;;  %v3287_v2 = vpop.f32.mrb[27].mxu0  ;;  %v2962_v4 = vmul.f32 -1.442695, %v813_v63 }
0x127b   :  { %3600 = vpow2.f32 %v2962_v4 }
0x1283   :  { %v3599_v3 = vpop.eup %3598 }
0x1284   :  { %823 = vrot.lane.b32.xlu0 %v3599_v3, %s3751_s4 }
0x1285   :  { %v3601_v5 = vpop.eup %3600 }
0x1286   :  { %v817_v6 = vadd.f32 1.0, %v3601_v5 }
0x1288   :  { %3602 = vrcp.f32 %v817_v6 }
0x1292   :  { %v3603_v8 = vpop.eup %3602 }
0x1293   :  { %v821_v11 = vmul.f32 %v3603_v8, %v759_v61  ;;  %v2989_v61 = vld [vmem:[%s4561_s12 + $0x2] sm:$0x1] }
0x12f6   :  { %v824_v9 = vpop.permute.xlu0 %823 }
0x12f7   :  { %v826_v10 = vmul.f32 %v3603_v8, %v824_v9 }
0x12f9   :  { %828 = vrot.lane.b32.xlu1 %v826_v10, %s3752_s22 }
0x136b   :  { %v829_v12 = vpop.permute.xlu1 %828 }
0x136c   :  { %v831_v55 = vadd.f32 %v829_v12, %v821_v11 }
0x136e   :  { %3604 = vtanh.f32 %v831_v55 }
0x1378   :  { %v3605_v45 = vpop.eup %3604 }
0x1379   :  { %834 = vrot.lane.b32.xlu0 %v3605_v45, %s3751_s4 }
0x13eb   :  { %v835_v13 = vpop.permute.xlu0 %834 }
0x13ec   :  { %v837_v14 = vmul.f32 %v3603_v8, %v835_v13 }
0x13ee   :  { %v838_v15 = vpack.c.bf16 %v837_v14, %v837_v14 }
0x13f0   :  { %840 = vrot.lane.b32.xlu1 %v838_v15, %s3752_s22 }
0x1462   :  { %v841_v16 = vpop.permute.xlu1 %840 }
0x1463   :  { %3293 = vmatmul.mubr.msk.bf16.vlgmr.msra.gmra.mrb[16].mxu1 %vm244_vm1, %v841_v16 }
0x1464   :  { %1116 = vmatprep.mubr.bf16.mxu1 %v3750_v39  ;;  %1085 = vmatpush1.bf16.msra.mxu1 %v3506_v31 }
0x1465   :  { %1086 = vmatprep.subr.bf16.mxu1 %v3511_v57 }
0x1468   :  { %1087 = vmatpush1.bf16.msra.mxu1 %v3509_v34 }
0x1469   :  { %1088 = vmatprep.subr.bf16.mxu1 %v3514_v35 }
0x146c   :  { %1089 = vmatpush1.bf16.msra.mxu1 %v3512_v36 }
0x146d   :  { %1090 = vmatprep.subr.bf16.mxu1 %v3517_v38 }
0x1470   :  { %1091 = vmatpush1.bf16.msra.mxu1 %v3515_v41 }
0x1471   :  { %3313 = vmatprep.subr.bf16.mxu1 %v3748_v7 }
0x1536   :  { %v879_v17 = vpop.f32.mrb[16].mxu1 }
0x1537   :  { %v885_v18 = vadd.f32 %v879_v17, %v3946_v59  ;;  %v3294_v19 = vpop.f32.mrb[17].mxu1 }
0x1538   :  { %v882_v20 = vpop.f32.mrb[18].mxu1 }
0x1539   :  { %3606 = vtanh.f32 %v885_v18  ;;  %v3295_v21 = vpop.f32.mrb[19].mxu1  ;;  %v2964_v24 = vmul.f32 -1.442695, %v885_v18  ;;  %v2977_v20 = vld [vmem:[%s4562_s13] ss:$0 sm:$0xff] }
0x153b   :  { %3608 = vpow2.f32 %v2964_v24 }
0x1543   :  { %v3607_v22 = vpop.eup %3606 }
0x1544   :  { %895 = vrot.lane.b32.xlu0 %v3607_v22, %s3751_s4 }
0x1545   :  { %v3609_v25 = vpop.eup %3608 }
0x1546   :  { %v889_v26 = vadd.f32 1.0, %v3609_v25 }
0x1548   :  { %3610 = vrcp.f32 %v889_v26 }
0x1552   :  { %v3611_v27 = vpop.eup %3610 }
0x1553   :  { %v893_v39 = vmul.f32 %v3611_v27, %v831_v55 }
0x15b6   :  { %v896_v28 = vpop.permute.xlu0 %895 }
0x15b7   :  { %v898_v29 = vmul.f32 %v3611_v27, %v896_v28 }
0x15b9   :  { %900 = vrot.lane.b32.xlu1 %v898_v29, %s3752_s22 }
0x162b   :  { %v901_v30 = vpop.permute.xlu1 %900 }
0x162c   :  { %v903_v59 = vadd.f32 %v901_v30, %v893_v39 }
0x162e   :  { %3612 = vtanh.f32 %v903_v59 }
0x1638   :  { %v3613_v37 = vpop.eup %3612 }
0x1639   :  { %906 = vrot.lane.b32.xlu0 %v3613_v37, %s3751_s4  ;;  %v2992_v37 = vld [vmem:[%s4562_s13 + $0x2] ss:$0 sm:$0xff] }
0x163d   :  { %1027 = vrot.lane.b32.xlu0 %v1024_v40, %s3752_s22 }
0x16ab   :  { %v907_v43 = vpop.permute.xlu0 %906 }
0x16ac   :  { %v909_v44 = vmul.f32 %v3611_v27, %v907_v43 }
0x16ae   :  { %v985_v46 = vmul.f32 %v909_v44, %v909_v44  ;;  %911 = vrot.lane.b32.xlu1 %v909_v44, %s3752_s22 }
0x16af   :  { %v1028_v48 = vpop.permute.xlu0 %1027 }
0x16b0   :  { %987 = vrot.lane.b32.xlu0 %v985_v46, %s3752_s22 }
0x16b2   :  { %1274 = vrot.lane.b32.xlu1 %v2984_v47, %s3751_s4 }
0x1720   :  { %v912_v23 = vpop.permute.xlu1 %911 }
0x1721   :  { %v4062_v49 = vsel %vm244_vm1, %v912_v23, %v1028_v48  ;;  %3297 = vmatpush3.xpose.msk.msra.mxu0 %vm244_vm1, %v912_v23 }
0x1722   :  { %v4067_v50 = vpack.c.bf16 %v4062_v49, %v4062_v49  ;;  %v988_v51 = vpop.permute.xlu0 %987  ;;  %3301 = vmatprep.subr.bf16.mxu0 %v3748_v7  ;;  %v4118_v62 = vpack.c.bf16 %v3748_v7, %v4062_v49 }
0x1723   :  { %v990_v52 = vsel %vm244_vm1, %v988_v51, 0.0 }
0x1724   :  { %3299 = vmatmul.mubr.msk.f32.vlgmr.msra.gmra.mrb[28].mxu0 %vm244_vm1, %v912_v23  ;;  %2976 = vmatmul.mubr.msk.bf16.vlgmr.msra.gmra.mrb[20].mxu1 %vm1080_vm3, %v4067_v50  ;;  %v1082_v32 = vsel %vm1080_vm3, %v4067_v50, 0  ;;  %v1275_v63 = vpop.permute.xlu1 %1274  ;;  %vm1749_vm1 = vcmask 1044480  }
0x1725   :  { %991 = vadd.xlane.f32.xlu0 %v990_v52  ;;  %3302 = vmatpush3.bf16.xpose.msra.mxu0 %v1082_v32 }
0x1726   :  { %3314 = vmatpush3.bf16.xpose.msra.mxu1 %v1082_v32  ;;  %3315 = vmatprep.mubr.msk.bf16.mxu1 %vm3749_vm2, %v3748_v7 }
0x1727   :  { %3325 = vmatprep.subr.bf16.mxu1 %v3748_v7  ;;  %3303 = vmatprep.mubr.msk.bf16.mxu0 %vm3749_vm2, %v3748_v7 }
0x1728   :  { %3307 = vmatprep.subr.bf16.mxu0 %v3748_v7 }
0x172c   :  { %3304 = vmatmul.mubr.msk.bf16.vlgmr.msra.gmra.mrb[32].mxu0 %vm1080_vm3, %v1125_v54 }
0x172d   :  { %3316 = vmatmul.mubr.msk.bf16.vlgmr.msra.gmra.mrb[24].mxu1 %vm1080_vm3, %v2981_v42  ;;  %3309 = vmatprep.mubr.msk.bf16.mxu0 %vm3749_vm2, %v3748_v7 }
0x172e   :  { %3326 = vmatpush3.bf16.xpose.msra.mxu1 %v1082_v32  ;;  %3327 = vmatprep.mubr.msk.bf16.mxu1 %vm3749_vm2, %v3748_v7 }
0x172f   :  { %3337 = vmatprep.subr.bf16.mxu1 %v3748_v7 }
0x1735   :  { %3328 = vmatmul.mubr.msk.bf16.vlgmr.msra.gmra.mrb[28].mxu1 %vm1080_vm3, %v2989_v61 }
0x1736   :  { %3338 = vmatpush3.bf16.msra.mxu1 %v3518_v53  ;;  %3345 = vmatprep.mubr.msk.bf16.mxu1 %vm3749_vm2, %v3748_v7 }
0x1737   :  { %3339 = vmatprep.subr.bf16.mxu1 %v3748_v7 }
0x173a   :  { %3340 = vmatpush3.bf16.msra.mxu1 %v3519_v56 }
0x173b   :  { %3341 = vmatprep.subr.bf16.mxu1 %v3748_v7 }
0x173e   :  { %3342 = vmatpush3.bf16.msra.mxu1 %v3520_v58  ;;  %v1181_v58 = vlaneseq }
0x173f   :  { %3343 = vmatprep.subr.bf16.mxu1 %v3748_v7 }
0x1742   :  { %3344 = vmatpush3.bf16.msra.mxu1 %v3521_v60 }
0x1743   :  { %3361 = vmatprep.subr.bf16.mxu1 %v3748_v7 }
0x1745   :  { %3346 = vmatmul.mubr.msk.bf16.vlgmr.msra.gmra.mrb[32].mxu1 %vm1080_vm3, %v4118_v62 }
0x1746   :  { %3369 = vmatprep.mubr.msk.bf16.mxu1 %vm3749_vm2, %v3748_v7 }
0x17b2   :  { %v992_v39 = vpop.xlane.xlu0 %991 }
0x17f7   :  { %v981_v0 = vpop.f32.mrb[28].mxu0  ;;  %v1118_v1 = vpop.f32.mrb[20].mxu1 }
0x17f8   :  { %v4125_v2 = vpack.c.bf16 %v1118_v1, %v1118_v1  ;;  %v1277_v3 = vmul.f32 %v1275_v63, %v1118_v1  ;;  %v3300_v4 = vpop.f32.mrb[29].mxu0  ;;  %v4127_v5 = vpop.f32.mrb[21].mxu1  ;;  %v1134_v24 = vmul.f32 %v2977_v20, %v1118_v1  ;;  %v993_v29 = vmul.f32 2.0, %v981_v0 }
0x17f9   :  { %v1122_v6 = vpop.f32.mrb[22].mxu1  ;;  %v1424_v41 = vmul.f32 %v2992_v37, %v4127_v5  ;;  %v1182_v63 = vshrl.u32 %v1181_v58, 7 }
0x17fa   :  { %1279 = vrot.lane.b32.xlu1 %v1277_v3, %s3751_s4  ;;  %v1123_v8 = vpop.f32.mrb[23].mxu1  ;;  %v1217_v9 = vsel %vm1215_vm4, %v4125_v2, 0  ;;  %v1135_v28 = vsel %vm1080_vm3, %v1134_v24, 0.0  ;;  %v994_v30 = vsub.f32 %v992_v39, %v993_v29 }
0x17fb   :  { %3308 = vmatpush3.bf16.msra.mxu0 %v1217_v9  ;;  %v1425_v47 = vsel %vm1080_vm3, %v1424_v41, 0.0  ;;  %v4156_v1 = vsub.s32 0, %v1182_v63 }
0x17fc   :  { %3319 = vmatprep.subr.bf16.mxu0 %v3748_v7  ;;  %v996_v59 = vsel %vm995_vm5, %v994_v30, inf }
0x17fd   :  { %v997_v31 = vrot.slane %v996_v59, 4 }
0x17ff   :  { %v1175_v45 = vpop.f32.mrb[32].mxu0  ;;  %v998_v33 = vmin.f32 %v996_v59, %v997_v31 }
0x1800   :  { %v4133_v10 = vpop.f32.mrb[24].mxu1  ;;  %v3305_v13 = vpop.f32.mrb[33].mxu0  ;;  %v1184_v4 = vrot.slane %v1175_v45, %v4156_v1  ;;  %v1262_v45 = vld [vmem:[%s4556_s7] sm:$0xff] }
0x1801   :  { %v3317_v11 = vpop.f32.mrb[25].mxu1  ;;  %v1178_v15 = vpop.f32.mrb[34].mxu0  ;;  %v999_v57 = vrot.slane %v998_v33, 2  ;;  %vm1336_vm12 = vcmp.gt.f32.partialorder %v1262_v45, 0.0 }
0x1802   :  { %v1325_v12 = vpop.f32.mrb[26].mxu1  ;;  %v3306_v17 = vpop.f32.mrb[35].mxu0  ;;  %v1331_v15 = vrot.slane %v4133_v10, %v4156_v1 }
0x1803   :  { %v3318_v55 = vpop.f32.mrb[27].mxu1  ;;  %v1000_v34 = vmin.f32 %v998_v33, %v999_v57 }
0x1805   :  { %v1001_v35 = vrot.slane %v1000_v34, 1 }
0x1807   :  { %v1002_v36 = vmin.f32 %v1000_v34, %v1001_v35 }
0x1808   :  { %v4135_v14 = vpop.f32.mrb[28].mxu1 }
0x1809   :  { %v3329_v16 = vpop.f32.mrb[29].mxu1  ;;  %vm1003_vm6 = vcmp.le.f32.partialorder %v994_v30, %v1002_v36  ;;  %v1474_v17 = vrot.slane %v4135_v14, %v4156_v1 }
0x180a   :  { %v1468_v18 = vpop.f32.mrb[30].mxu1  ;;  %v1004_v38 = vsel %vm1003_vm6, 3e+38, %v994_v30 }
0x180b   :  { %v3330_v19 = vpop.f32.mrb[31].mxu1  ;;  %v1005_v44 = vsel %vm995_vm5, %v1004_v38, inf }
0x180c   :  { %v1006_v46 = vrot.slane %v1005_v44, 4 }
0x180e   :  { %v1007_v48 = vmin.f32 %v1005_v44, %v1006_v46 }
0x1810   :  { %v1008_v23 = vrot.slane %v1007_v48, 2 }
0x1812   :  { %v1009_v51 = vmin.f32 %v1007_v48, %v1008_v23  ;;  %v3004_v23 = vld [vmem:[%s4562_s13 + $0x3] ss:$0 sm:$0xff] }
0x1814   :  { %v1010_v52 = vrot.slane %v1009_v51, 1 }
0x1816   :  { %v1011_v32 = vmin.f32 %v1009_v51, %v1010_v52 }
0x1818   :  { %v4140_v21 = vpop.f32.mrb[32].mxu1  ;;  %vm1012_vm7 = vcmp.le.f32.partialorder %v1004_v38, %v1011_v32 }
0x1819   :  { %v3347_v22 = vpop.f32.mrb[33].mxu1  ;;  %v1013_v42 = vsel %vm1012_vm7, 3e+38, %v1004_v38  ;;  %v1642_v52 = vmul.f32 %v3004_v23, %v4140_v21 }
0x181a   :  { %v4142_v25 = vpop.f32.mrb[34].mxu1  ;;  %v1014_v61 = vsel %vm995_vm5, %v1013_v42, inf  ;;  %v2988_v22 = vld [vmem:[%s4556_s7 + $0x8] sm:$0xff] }
0x181b   :  { %v1739_v26 = vpack.c.bf16 %v4142_v25, %v4140_v21  ;;  %v3348_v27 = vpop.f32.mrb[35].mxu1  ;;  %v1015_v53 = vrot.slane %v1014_v61, 4  ;;  %vm1479_vm14 = vcmp.gt.f32.partialorder %v2988_v22, 0.0  ;;  %v1643_v42 = vmul.f32 %v3004_v23, %v4142_v25 }
0x181d   :  { %v1016_v54 = vmin.f32 %v1014_v61, %v1015_v53  ;;  %v1644_v61 = vsel %vm1080_vm3, %v1642_v52, 0.0  ;;  %v1648_v53 = vsel %vm1647_vm15, %v1643_v42, 0.0 }
0x181e   :  { %1136 = vadd.xlane.f32.xlu1 %v1135_v28 }
0x181f   :  { %v1017_v56 = vrot.slane %v1016_v54, 2 }
0x1821   :  { %v1018_v60 = vmin.f32 %v1016_v54, %v1017_v56 }
0x1823   :  { %v1019_v0 = vrot.slane %v1018_v60, 1 }
0x1825   :  { %v1020_v3 = vmin.f32 %v1018_v60, %v1019_v0 }
0x1827   :  { %vm1021_vm8 = vcmp.le.f32.partialorder %v994_v30, %v1020_v3 }
0x1828   :  { %v2967_v9 = vsel %vm1021_vm8, 1.0, %v3748_v7  ;;  %vm1710_vm8 = vcmask 80896  }
0x1829   :  { %vm1189_vm10 = vcmp.gt.f32.partialorder %v2967_v9, 0.0 }
0x186c   :  { %v1280_v40 = vpop.permute.xlu1 %1279 }
0x186d   :  { %v1282_v43 = vsel %vm1080_vm3, %v1280_v40, 0.0 }
0x186e   :  { %1283 = vadd.xlane.f32.xlu0 %v1282_v43 }
0x1872   :  { %1426 = vadd.xlane.f32.xlu0 %v1425_v47 }
0x18ab   :  { %v1137_v6 = vpop.xlane.xlu1 %1136 }
0x18ac   :  { %v1185_v8 = vadd.f32 %v1184_v4, %v1137_v6 }
0x18ae   :  { %v1187_v11 = vmul.f32 0.2, %v1185_v8  ;;  %vm1186_vm9 = vcmp.gt.f32.partialorder %v1185_v8, 0.0 }
0x18b0   :  { %v1188_v12 = vsel %vm1186_vm9, %v1185_v8, %v1187_v11  ;;  %v1495_v11 = vpack.c.bf16 %v4127_v5, %v4127_v5  ;;  %v4200_v5 = vsel %vm1080_vm3, %v4118_v62, 0 }
0x18b1   :  { %v1190_v55 = vsel %vm1189_vm10, %v1188_v12, -1e+30  ;;  %vm1714_vm10 = vcmask 74752  }
0x18b2   :  { %v1191_v13 = vsel %vm995_vm5, %v1190_v55, -inf }
0x18b3   :  { %1192 = vmax.xlane.f32.xlu1 %v1191_v13 }
0x18fb   :  { %v1284_v16 = vpop.xlane.xlu0 %1283 }
0x18fc   :  { %v1332_v18 = vadd.f32 %v1331_v15, %v1284_v16  ;;  %v1506_v15 = vsel %vm1215_vm4, %v1495_v11, 0 }
0x18fe   :  { %v1334_v19 = vmul.f32 0.2, %v1332_v18  ;;  %vm1333_vm11 = vcmp.gt.f32.partialorder %v1332_v18, 0.0 }
0x18ff   :  { %v1427_v20 = vpop.xlane.xlu0 %1426 }
0x1900   :  { %v1475_v24 = vadd.f32 %v1474_v17, %v1427_v20  ;;  %v1335_v27 = vsel %vm1333_vm11, %v1332_v18, %v1334_v19  ;;  %v3001_v17 = vld [vmem:[%s4561_s12 + $0x3] sm:$0x1]  ;;  %v1751_v18 = vsel %vm1749_vm1, %v1739_v26, 0 }
0x1901   :  { %v1337_v10 = vsel %vm1336_vm12, %v1335_v27, -1e+30 }
0x1902   :  { %v1477_v28 = vmul.f32 0.2, %v1475_v24  ;;  %v1338_v29 = vsel %vm995_vm5, %v1337_v10, -inf  ;;  %vm1476_vm13 = vcmp.gt.f32.partialorder %v1475_v24, 0.0 }
0x1903   :  { %1339 = vmax.xlane.f32.xlu0 %v1338_v29 }
0x1904   :  { %v1478_v39 = vsel %vm1476_vm13, %v1475_v24, %v1477_v28 }
0x1905   :  { %v1480_v14 = vsel %vm1479_vm14, %v1478_v39, -1e+30 }
0x1906   :  { %v1481_v30 = vsel %vm995_vm5, %v1480_v14, -inf }
0x1907   :  { %1482 = vmax.xlane.f32.xlu1 %v1481_v30 }
0x1940   :  { %v1193_v59 = vpop.xlane.xlu1 %1192 }
0x1941   :  { %v1194_v31 = vsub.f32 %v1190_v55, %v1193_v59 }
0x1943   :  { %v1195_v33 = vmul.f32 1.442695, %v1194_v31 }
0x1945   :  { %3614 = vpow2.f32 %v1195_v33  ;;  %v1628_v33 = vld [vmem:[%s4557_s8] sm:$0xff] }
0x194f   :  { %v3615_v57 = vpop.eup %3614 }
0x1950   :  { %v1197_v34 = vmul.f32 %v3615_v57, %v2967_v9 }
0x1952   :  { %v1198_v35 = vsel %vm995_vm5, %v1197_v34, 0.0 }
0x1953   :  { %1199 = vadd.xlane.f32.xlu0 %v1198_v35 }
0x1990   :  { %v1340_v36 = vpop.xlane.xlu0 %1339 }
0x1991   :  { %v1341_v37 = vsub.f32 %v1337_v10, %v1340_v36 }
0x1993   :  { %v1342_v38 = vmul.f32 1.442695, %v1341_v37 }
0x1994   :  { %v1483_v40 = vpop.xlane.xlu1 %1482 }
0x1995   :  { %3616 = vpow2.f32 %v1342_v38  ;;  %v1484_v41 = vsub.f32 %v1480_v14, %v1483_v40  ;;  %v1629_v38 = vld [vmem:[%s4557_s8 + $0x8] sm:$0x3] }
0x1996   :  { %vm1707_vm9 = vcmp.gt.f32.partialorder %v1629_v38, 0.0 }
0x1997   :  { %v1485_v43 = vmul.f32 1.442695, %v1484_v41 }
0x1999   :  { %3618 = vpow2.f32 %v1485_v43 }
0x199f   :  { %v3617_v44 = vpop.eup %3616 }
0x19a0   :  { %v1344_v46 = vmul.f32 %v3617_v44, %v1262_v45 }
0x19a2   :  { %v1345_v47 = vsel %vm995_vm5, %v1344_v46, 0.0 }
0x19a3   :  { %v3619_v48 = vpop.eup %3618  ;;  %1346 = vadd.xlane.f32.xlu1 %v1345_v47 }
0x19a4   :  { %v1487_v51 = vmul.f32 %v3619_v48, %v2988_v22 }
0x19a6   :  { %v1488_v32 = vsel %vm995_vm5, %v1487_v51, 0.0 }
0x19a7   :  { %1489 = vadd.xlane.f32.xlu0 %v1488_v32 }
0x19ab   :  { %1645 = vadd.xlane.f32.xlu0 %v1644_v61 }
0x19af   :  { %1649 = vadd.xlane.f32.xlu0 %v1648_v53 }
0x19b4   :  { %1359 = vrot.lane.b32.xlu1 %v4125_v2, %s3751_s4 }
0x19e0   :  { %v1200_v54 = vpop.xlane.xlu0 %1199 }
0x19e1   :  { %v1201_v56 = vmax.f32 %v1200_v54, 1e-20 }
0x19e3   :  { %3620 = vrcp.f32 %v1201_v56 }
0x19ed   :  { %v3621_v58 = vpop.eup %3620 }
0x19ee   :  { %v1203_v60 = vmul.f32 %v3621_v58, %v1197_v34 }
0x19f0   :  { %v1204_v63 = vpack.c.bf16 %v1203_v60, %v1203_v60 }
0x19f2   :  { %3310 = vmatmul.mubr.msk.bf16.vlgmr.msra.gmra.mrb[36].mxu0 %vm995_vm5, %v1204_v63 }
0x19f3   :  { %3321 = vmatprep.mubr.msk.bf16.mxu0 %vm3749_vm2, %v3748_v7 }
0x1a30   :  { %v1347_v0 = vpop.xlane.xlu1 %1346 }
0x1a31   :  { %v1348_v3 = vmax.f32 %v1347_v0, 1e-20 }
0x1a33   :  { %3622 = vrcp.f32 %v1348_v3  ;;  %v3522_v3 = vld [vmem:[%s4560_s11 + $0x20] sm:$0xff]  }
0x1a34   :  { %v1490_v4 = vpop.xlane.xlu0 %1489  ;;  %v1360_v6 = vpop.permute.xlu1 %1359  ;;  %3362 = vmatpush3.bf16.msra.mxu1 %v3522_v3 }
0x1a35   :  { %v1491_v8 = vmax.f32 %v1490_v4, 1e-20  ;;  %v1365_v9 = vsel %vm1215_vm4, %v1360_v6, 0  ;;  %vm1706_vm4 = vcmp.gt.f32.partialorder %v1628_v33, 0.0  ;;  %v3523_v4 = vld [vmem:[%s4560_s11 + $0x28] sm:$0xff]   ;;  %3363 = vmatprep.subr.bf16.mxu1 %v3748_v7 }
0x1a36   :  { %3320 = vmatpush3.bf16.msra.mxu0 %v1365_v9 }
0x1a37   :  { %3624 = vrcp.f32 %v1491_v8  ;;  %3331 = vmatprep.subr.bf16.mxu0 %v3748_v7 }
0x1a38   :  { %v1646_v14 = vpop.xlane.xlu0 %1645  ;;  %3364 = vmatpush3.bf16.msra.mxu1 %v3523_v4  ;;  %v3022_v4 = vld [vmem:[%s4557_s8 + $0x18] sm:$0x3] }
0x1a39   :  { %3365 = vmatprep.subr.bf16.mxu1 %v3748_v7 }
0x1a3c   :  { %v1650_v57 = vpop.xlane.xlu0 %1649 }
0x1a3d   :  { %v3623_v2 = vpop.eup %3622 }
0x1a3e   :  { %v1350_v12 = vmul.f32 %v3623_v2, %v1344_v46 }
0x1a40   :  { %v1351_v55 = vpack.c.bf16 %v1350_v12, %v1350_v12 }
0x1a41   :  { %v3625_v13 = vpop.eup %3624 }
0x1a42   :  { %3322 = vmatmul.mubr.msk.bf16.vlgmr.msra.gmra.mrb[40].mxu0 %vm995_vm5, %v1351_v55  ;;  %v1493_v16 = vmul.f32 %v3625_v13, %v1487_v51 }
0x1a43   :  { %3332 = vmatpush3.bf16.msra.mxu0 %v1506_v15  ;;  %3333 = vmatprep.mubr.msk.bf16.mxu0 %vm3749_vm2, %v3748_v7 }
0x1a44   :  { %3349 = vmatprep.subr.bf16.mxu0 %v3748_v7  ;;  %v1494_v45 = vpack.c.bf16 %v1493_v16, %v1493_v16  ;;  %v3524_v16 = vld [vmem:[%s4560_s11 + $0x30] sm:$0xff]  }
0x1a45   :  { %3366 = vmatpush3.bf16.msra.mxu1 %v3524_v16 }
0x1a46   :  { %3367 = vmatprep.subr.bf16.mxu1 %v3748_v7 }
0x1a4a   :  { %3334 = vmatmul.mubr.msk.bf16.vlgmr.msra.gmra.mrb[44].mxu0 %vm995_vm5, %v1494_v45  ;;  %v3525_v45 = vld [vmem:[%s4560_s11 + $0x38] sm:$0xff]  }
0x1a4b   :  { %3351 = vmatprep.mubr.msk.bf16.mxu0 %vm3749_vm2, %v3748_v7  ;;  %3368 = vmatpush3.bf16.msra.mxu1 %v3525_v45 }
0x1a4c   :  { %3350 = vmatpush3.bf16.xpose.msra.mxu0 %v4200_v5  ;;  %3385 = vmatprep.subr.bf16.mxu1 %v3748_v7 }
0x1a4d   :  { %3355 = vmatprep.subr.bf16.mxu0 %v3748_v7 }
0x1a53   :  { %3352 = vmatmul.mubr.msk.bf16.vlgmr.msra.gmra.mrb[48].mxu0 %vm1080_vm3, %v3001_v17  ;;  %v3006_v17 = vld [vmem:[%s4563_s14 + $0x3] ss:$0 sm:$0xff] }
0x1a54   :  { %3356 = vmatpush3.bf16.msra.mxu0 %v1751_v18  ;;  %3357 = vmatprep.mubr.msk.bf16.mxu0 %vm3749_vm2, %v3748_v7 }
0x1a55   :  { %3373 = vmatprep.subr.bf16.mxu0 %v3748_v7 }
0x1ac5   :  { %v4217_v19 = vpop.f32.mrb[36].mxu0 }
0x1ac6   :  { %v3311_v20 = vpop.f32.mrb[37].mxu0 }
0x1ac7   :  { %v1256_v22 = vpop.f32.mrb[38].mxu0 }
0x1ac8   :  { %v3312_v24 = vpop.f32.mrb[39].mxu0 }
0x1b15   :  { %v4219_v27 = vpop.f32.mrb[40].mxu0 }
0x1b16   :  { %v3323_v10 = vpop.f32.mrb[41].mxu0 }
0x1b17   :  { %v1404_v28 = vpop.f32.mrb[42].mxu0 }
0x1b18   :  { %v3324_v29 = vpop.f32.mrb[43].mxu0 }
0x1b1d   :  { %v4221_v39 = vpop.f32.mrb[44].mxu0 }
0x1b1e   :  { %v3335_v21 = vpop.f32.mrb[45].mxu0 }
0x1b1f   :  { %v1545_v25 = vpop.f32.mrb[46].mxu0 }
0x1b20   :  { %v3336_v26 = vpop.f32.mrb[47].mxu0 }
0x1b26   :  { %v1688_v30 = vpop.f32.mrb[48].mxu0 }
0x1b27   :  { %v1697_v59 = vrot.slane %v1688_v30, %v4156_v1  ;;  %v3353_v31 = vpop.f32.mrb[49].mxu0 }
0x1b28   :  { %v1691_v34 = vpop.f32.mrb[50].mxu0  ;;  %v3527_v31 = vld [vmem:[%s4560_s11 + $0x48] sm:$0xff]  }
0x1b29   :  { %v1698_v35 = vadd.f32 %v1697_v59, %v1646_v14  ;;  %v1699_v36 = vadd.f32 %v1697_v59, %v1650_v57  ;;  %v3354_v37 = vpop.f32.mrb[51].mxu0  ;;  %v3526_v14 = vld [vmem:[%s4560_s11 + $0x40] sm:$0xff]   ;;  %v3529_v34 = vld [vmem:[%s4560_s11 + $0x58] sm:$0xff]  }
0x1b2a   :  { %v3023_v57 = vld [vmem:[%s4561_s12 + $0x4] sm:$0x1] }
0x1b2b   :  { %vm1700_vm6 = vcmp.gt.f32.partialorder %v1698_v35, 0.0  ;;  %v1702_v40 = vmul.f32 0.2, %v1698_v35  ;;  %vm1701_vm7 = vcmp.gt.f32.partialorder %v1699_v36, 0.0  ;;  %v1703_v41 = vmul.f32 0.2, %v1699_v36 }
0x1b2d   :  { %v1704_v43 = vsel %vm1700_vm6, %v1698_v35, %v1702_v40  ;;  %v1705_v44 = vsel %vm1701_vm7, %v1699_v36, %v1703_v41  ;;  %v3026_v35 = vld [vmem:[%s4562_s13 + $0x4] ss:$0 sm:$0xff]  ;;  %vm2238_vm6 = vcmask 1045504  }
0x1b2e   :  { %v1708_v46 = vsel %vm1706_vm4, %v1704_v43, -1e+30  ;;  %v1709_v48 = vsel %vm1707_vm9, %v1705_v44, -1e+30  ;;  %vm2136_vm4 = vcmask 519168  }
0x1b2f   :  { %v1711_v47 = vsel %vm1710_vm8, %v1708_v46, -inf  ;;  %v1715_v23 = vsel %vm1714_vm10, %v1709_v48, -inf }
0x1b30   :  { %1712 = vmax.xlane.f32.xlu0 %v1711_v47 }
0x1b34   :  { %1716 = vmax.xlane.f32.xlu0 %v1715_v23 }
0x1bbd   :  { %v1713_v51 = vpop.xlane.xlu0 %1712 }
0x1bbe   :  { %v1718_v52 = vsub.f32 %v1708_v46, %v1713_v51 }
0x1bc0   :  { %v1720_v32 = vmul.f32 1.442695, %v1718_v52 }
0x1bc1   :  { %v1717_v42 = vpop.xlane.xlu0 %1716 }
0x1bc2   :  { %3626 = vpow2.f32 %v1720_v32  ;;  %v1719_v61 = vsub.f32 %v1709_v48, %v1717_v42 }
0x1bc4   :  { %v1722_v53 = vmul.f32 1.442695, %v1719_v61 }
0x1bc6   :  { %3628 = vpow2.f32 %v1722_v53 }
0x1bcc   :  { %v3627_v54 = vpop.eup %3626 }
0x1bcd   :  { %v1724_v56 = vmul.f32 %v3627_v54, %v1628_v33  ;;  %v3528_v33 = vld [vmem:[%s4560_s11 + $0x50] sm:$0xff]  }
0x1bcf   :  { %v1726_v58 = vsel %vm1710_vm8, %v1724_v56, 0.0 }
0x1bd0   :  { %v3629_v60 = vpop.eup %3628  ;;  %1727 = vadd.xlane.f32.xlu1 %v1726_v58 }
0x1bd1   :  { %v1725_v63 = vmul.f32 %v3629_v60, %v1629_v38  ;;  %v3021_v60 = vld [vmem:[%s4557_s8 + $0x10] sm:$0xff] }
0x1bd2   :  { %vm1956_vm14 = vcmp.gt.f32.partialorder %v3021_v60, 0.0 }
0x1bd3   :  { %v1729_v0 = vsel %vm1714_vm10, %v1725_v63, 0.0 }
0x1bd4   :  { %1730 = vadd.xlane.f32.xlu0 %v1729_v0 }
0x1c5d   :  { %v1728_v6 = vpop.xlane.xlu1 %1727 }
0x1c5e   :  { %v1732_v8 = vmax.f32 %v1728_v6, 1e-20 }
0x1c60   :  { %3630 = vrcp.f32 %v1732_v8 }
0x1c61   :  { %v1731_v9 = vpop.xlane.xlu0 %1730 }
0x1c62   :  { %v1733_v2 = vmax.f32 %v1731_v9, 1e-20 }
0x1c64   :  { %3632 = vrcp.f32 %v1733_v2 }
0x1c6a   :  { %v3631_v11 = vpop.eup %3630 }
0x1c6b   :  { %v1736_v55 = vmul.f32 %v3631_v11, %v1724_v56 }
0x1c6e   :  { %v3633_v12 = vpop.eup %3632 }
0x1c6f   :  { %v1737_v13 = vmul.f32 %v3633_v12, %v1725_v63 }
0x1c71   :  { %v1738_v15 = vpack.c.bf16 %v1737_v13, %v1736_v55 }
0x1c73   :  { %3358 = vmatmul.mubr.msk.bf16.vlgmr.msra.gmra.mrb[52].mxu0 %vm1710_vm8, %v1738_v15 }
0x1c74   :  { %3375 = vmatprep.mubr.msk.bf16.mxu0 %vm3749_vm2, %v3748_v7 }
0x1d46   :  { %v1787_v18 = vpop.f32.mrb[52].mxu0 }
0x1d47   :  { %v1788_v20 = vadd.f32 %v3006_v17, %v1787_v18  ;;  %v3359_v22 = vpop.f32.mrb[53].mxu0 }
0x1d48   :  { %v1790_v24 = vpop.f32.mrb[54].mxu0 }
0x1d49   :  { %v1796_v10 = vmul.f32 0.01, %v1788_v20  ;;  %v1791_v28 = vadd.f32 %v3006_v17, %v1790_v24  ;;  %v3360_v29 = vpop.f32.mrb[55].mxu0  ;;  %vm1794_vm11 = vcmp.gt.f32.partialorder %v1788_v20, 0.0 }
0x1d4a   :  { %v3046_v29 = vld [vmem:[%s4562_s13 + $0x5] ss:$0 sm:$0xff] }
0x1d4b   :  { %vm1795_vm12 = vcmp.gt.f32.partialorder %v1791_v28, 0.0  ;;  %v1797_v21 = vmul.f32 0.01, %v1791_v28  ;;  %v1798_v25 = vsel %vm1794_vm11, %v1788_v20, %v1796_v10  ;;  %vm2199_vm11 = vcmask 97280  }
0x1d4d   :  { %v1799_v26 = vsel %vm1795_vm12, %v1791_v28, %v1797_v21  ;;  %vm2203_vm12 = vcmask 93184  }
0x1d4e   :  { %v1800_v30 = vpack.c.bf16 %v1799_v26, %v1798_v25 }
0x1d50   :  { %3370 = vmatmul.mubr.msk.bf16.vlgmr.msra.gmra.mrb[36].mxu1 %vm1080_vm3, %v1800_v30  ;;  %v1835_v59 = vsel %vm1080_vm3, %v1800_v30, 0 }
0x1d51   :  { %3386 = vmatpush3.bf16.msra.mxu1 %v3526_v14  ;;  %3374 = vmatpush3.bf16.xpose.msra.mxu0 %v1835_v59 }
0x1d52   :  { %3387 = vmatprep.subr.bf16.mxu1 %v3748_v7  ;;  %3393 = vmatprep.mubr.msk.bf16.mxu1 %vm3749_vm2, %v3748_v7 }
0x1d53   :  { %3379 = vmatprep.subr.bf16.mxu0 %v3748_v7 }
0x1d55   :  { %3388 = vmatpush3.bf16.msra.mxu1 %v3527_v31 }
0x1d56   :  { %3389 = vmatprep.subr.bf16.mxu1 %v3748_v7 }
0x1d58   :  { %3376 = vmatmul.mubr.msk.bf16.vlgmr.msra.gmra.mrb[56].mxu0 %vm1080_vm3, %v3023_v57 }
0x1d59   :  { %3390 = vmatpush3.bf16.msra.mxu1 %v3528_v33  ;;  %3381 = vmatprep.mubr.msk.bf16.mxu0 %vm3749_vm2, %v3748_v7 }
0x1d5a   :  { %3391 = vmatprep.subr.bf16.mxu1 %v3748_v7 }
0x1d5d   :  { %3392 = vmatpush3.bf16.msra.mxu1 %v3529_v34 }
0x1d5e   :  { %3409 = vmatprep.subr.bf16.mxu1 %v3748_v7 }
0x1d60   :  { %3394 = vmatmul.mubr.msk.bf16.vlgmr.msra.gmra.mrb[40].mxu1 %vm1080_vm3, %v4118_v62 }
0x1d61   :  { %3417 = vmatprep.mubr.msk.bf16.mxu1 %vm3749_vm2, %v3748_v7 }
0x1e23   :  { %v1871_v36 = vpop.f32.mrb[36].mxu1 }
0x1e24   :  { %v1893_v37 = vmul.f32 %v3026_v35, %v1871_v36  ;;  %v3371_v38 = vpop.f32.mrb[37].mxu1 }
0x1e25   :  { %v1874_v40 = vpop.f32.mrb[38].mxu1 }
0x1e26   :  { %v1894_v41 = vmul.f32 %v3026_v35, %v1874_v40  ;;  %v1987_v43 = vpack.c.bf16 %v1874_v40, %v1871_v36  ;;  %v3372_v44 = vpop.f32.mrb[39].mxu1  ;;  %v1895_v46 = vsel %vm1080_vm3, %v1893_v37, 0.0 }
0x1e27   :  { %1896 = vadd.xlane.f32.xlu0 %v1895_v46 }
0x1e28   :  { %v1998_v47 = vsel %vm1749_vm1, %v1987_v43, 0  ;;  %v1898_v62 = vsel %vm1647_vm15, %v1894_v41, 0.0  ;;  %vm1957_vm1 = vcmp.gt.f32.partialorder %v3022_v4, 0.0  ;;  %v3043_v41 = vld [vmem:[%s4561_s12 + $0x5] sm:$0x1] }
0x1e29   :  { %3380 = vmatpush3.bf16.msra.mxu0 %v1998_v47 }
0x1e2a   :  { %3397 = vmatprep.subr.bf16.mxu0 %v3748_v7 }
0x1e2b   :  { %1899 = vadd.xlane.f32.xlu0 %v1898_v62  ;;  %v1938_v48 = vpop.f32.mrb[56].mxu0 }
0x1e2c   :  { %v3377_v23 = vpop.f32.mrb[57].mxu0  ;;  %v1947_v56 = vrot.slane %v1938_v48, %v4156_v1 }
0x1e2d   :  { %v1941_v51 = vpop.f32.mrb[58].mxu0 }
0x1e2e   :  { %v3378_v52 = vpop.f32.mrb[59].mxu0 }
0x1e2f   :  { %v2117_v52 = vld [vmem:[%s4558_s9] sm:$0xff] }
0x1e30   :  { %vm2195_vm7 = vcmp.gt.f32.partialorder %v2117_v52, 0.0 }
0x1e33   :  { %v4294_v32 = vpop.f32.mrb[40].mxu1 }
0x1e34   :  { %v3395_v42 = vpop.f32.mrb[41].mxu1  ;;  %v2131_v25 = vmul.f32 %v3046_v29, %v4294_v32 }
0x1e35   :  { %v4296_v61 = vpop.f32.mrb[42].mxu1 }
0x1e36   :  { %v2228_v53 = vpack.c.bf16 %v4296_v61, %v4294_v32  ;;  %v3396_v54 = vpop.f32.mrb[43].mxu1  ;;  %v2132_v14 = vmul.f32 %v3046_v29, %v4296_v61  ;;  %v2133_v30 = vsel %vm1080_vm3, %v2131_v25, 0.0  ;;  %v2118_v32 = vld [vmem:[%s4558_s9 + $0x8] sm:$0xf] }
0x1e38   :  { %v2137_v59 = vsel %vm2136_vm4, %v2132_v14, 0.0  ;;  %v2240_v43 = vsel %vm2238_vm6, %v2228_v53, 0 }
0x1eb4   :  { %v1897_v58 = vpop.xlane.xlu0 %1896 }
0x1eb5   :  { %v1948_v63 = vadd.f32 %v1947_v56, %v1897_v58 }
0x1eb7   :  { %v1952_v0 = vmul.f32 0.2, %v1948_v63  ;;  %vm1950_vm13 = vcmp.gt.f32.partialorder %v1948_v63, 0.0 }
0x1eb8   :  { %v1900_v3 = vpop.xlane.xlu0 %1899 }
0x1eb9   :  { %v1949_v6 = vadd.f32 %v1947_v56, %v1900_v3  ;;  %v1954_v8 = vsel %vm1950_vm13, %v1948_v63, %v1952_v0 }
0x1eba   :  { %v1958_v9 = vsel %vm1956_vm14, %v1954_v8, -1e+30 }
0x1ebb   :  { %v1953_v2 = vmul.f32 0.2, %v1949_v6  ;;  %v1960_v11 = vsel %vm1710_vm8, %v1958_v9, -inf  ;;  %vm1951_vm15 = vcmp.gt.f32.partialorder %v1949_v6, 0.0 }
0x1ebc   :  { %1961 = vmax.xlane.f32.xlu0 %v1960_v11 }
0x1ebd   :  { %v1955_v12 = vsel %vm1951_vm15, %v1949_v6, %v1953_v2 }
0x1ebe   :  { %v1959_v55 = vsel %vm1957_vm1, %v1955_v12, -1e+30 }
0x1ebf   :  { %v1963_v13 = vsel %vm1714_vm10, %v1959_v55, -inf }
0x1ec0   :  { %1964 = vmax.xlane.f32.xlu0 %v1963_v13 }
0x1f49   :  { %v1962_v15 = vpop.xlane.xlu0 %1961 }
0x1f4a   :  { %v1966_v16 = vsub.f32 %v1958_v9, %v1962_v15 }
0x1f4c   :  { %v1968_v45 = vmul.f32 1.442695, %v1966_v16 }
0x1f4d   :  { %v1965_v17 = vpop.xlane.xlu0 %1964 }
0x1f4e   :  { %3634 = vpow2.f32 %v1968_v45  ;;  %v1967_v18 = vsub.f32 %v1959_v55, %v1965_v17 }
0x1f50   :  { %v1970_v20 = vmul.f32 1.442695, %v1967_v18 }
0x1f52   :  { %3636 = vpow2.f32 %v1970_v20 }
0x1f58   :  { %v3635_v22 = vpop.eup %3634 }
0x1f59   :  { %v1972_v24 = vmul.f32 %v3635_v22, %v3021_v60  ;;  %v3530_v22 = vld [vmem:[%s4560_s11 + $0x60] sm:$0xff]  }
0x1f5a   :  { %3410 = vmatpush3.bf16.msra.mxu1 %v3530_v22 }
0x1f5b   :  { %v1974_v10 = vsel %vm1710_vm8, %v1972_v24, 0.0  ;;  %3411 = vmatprep.subr.bf16.mxu1 %v3748_v7 }
0x1f5c   :  { %v3637_v28 = vpop.eup %3636  ;;  %1975 = vadd.xlane.f32.xlu0 %v1974_v10 }
0x1f5d   :  { %v1973_v21 = vmul.f32 %v3637_v28, %v3022_v4 }
0x1f5f   :  { %v1977_v26 = vsel %vm1714_vm10, %v1973_v21, 0.0 }
0x1f60   :  { %1978 = vadd.xlane.f32.xlu0 %v1977_v26 }
0x1f64   :  { %2134 = vadd.xlane.f32.xlu0 %v2133_v30 }
0x1f68   :  { %2138 = vadd.xlane.f32.xlu0 %v2137_v59 }
0x1fe9   :  { %v1976_v31 = vpop.xlane.xlu0 %1975 }
0x1fea   :  { %v1980_v33 = vmax.f32 %v1976_v31, 1e-20  ;;  %v3532_v31 = vld [vmem:[%s4560_s11 + $0x70] sm:$0xff]  }
0x1fec   :  { %3638 = vrcp.f32 %v1980_v33  ;;  %v3533_v33 = vld [vmem:[%s4560_s11 + $0x78] sm:$0xff]  }
0x1fed   :  { %v1979_v57 = vpop.xlane.xlu0 %1978 }
0x1fee   :  { %v1981_v34 = vmax.f32 %v1979_v57, 1e-20  ;;  %v3048_v57 = vld [vmem:[%s4563_s14 + $0x5] ss:$0 sm:$0xff] }
0x1ff0   :  { %3640 = vrcp.f32 %v1981_v34 }
0x1ff1   :  { %v2135_v62 = vpop.xlane.xlu0 %2134 }
0x1ff5   :  { %v2139_v42 = vpop.xlane.xlu0 %2138 }
0x1ff6   :  { %v3639_v35 = vpop.eup %3638 }
0x1ff7   :  { %v1984_v37 = vmul.f32 %v3639_v35, %v1972_v24  ;;  %v3531_v24 = vld [vmem:[%s4560_s11 + $0x68] sm:$0xff]  }
0x1ff8   :  { %3412 = vmatpush3.bf16.msra.mxu1 %v3531_v24 }
0x1ff9   :  { %3413 = vmatprep.subr.bf16.mxu1 %v3748_v7 }
0x1ffa   :  { %v3641_v36 = vpop.eup %3640 }
0x1ffb   :  { %v1985_v38 = vmul.f32 %v3641_v36, %v1973_v21 }
0x1ffc   :  { %3414 = vmatpush3.bf16.msra.mxu1 %v3532_v31 }
0x1ffd   :  { %v1986_v40 = vpack.c.bf16 %v1985_v38, %v1984_v37  ;;  %3415 = vmatprep.subr.bf16.mxu1 %v3748_v7 }
0x1fff   :  { %3382 = vmatmul.mubr.msk.bf16.vlgmr.msra.gmra.mrb[60].mxu0 %vm1710_vm8, %v1986_v40  ;;  %vm2196_vm8 = vcmp.gt.f32.partialorder %v2118_v32, 0.0 }
0x2000   :  { %3398 = vmatpush3.bf16.xpose.msra.mxu0 %v4200_v5  ;;  %3399 = vmatprep.mubr.msk.bf16.mxu0 %vm3749_vm2, %v3748_v7 }
0x2001   :  { %3403 = vmatprep.subr.bf16.mxu0 %v3748_v7  ;;  %3416 = vmatpush3.bf16.msra.mxu1 %v3533_v33 }
0x2002   :  { %3433 = vmatprep.subr.bf16.mxu1 %v3748_v7 }
0x2007   :  { %3400 = vmatmul.mubr.msk.bf16.vlgmr.msra.gmra.mrb[64].mxu0 %vm1080_vm3, %v3043_v41 }
0x2008   :  { %3404 = vmatpush3.bf16.msra.mxu0 %v2240_v43  ;;  %3405 = vmatprep.mubr.msk.bf16.mxu0 %vm3749_vm2, %v3748_v7 }
0x2009   :  { %3421 = vmatprep.subr.bf16.mxu0 %v3748_v7 }
0x20d2   :  { %v4334_v5 = vpop.f32.mrb[60].mxu0 }
0x20d3   :  { %v3383_v44 = vpop.f32.mrb[61].mxu0 }
0x20d4   :  { %v2037_v46 = vpop.f32.mrb[62].mxu0 }
0x20d5   :  { %v3384_v47 = vpop.f32.mrb[63].mxu0 }
0x20d6   :  { %v3534_v47 = vld [vmem:[%s4564_s15] sm:$0xff]  }
0x20da   :  { %v2177_v48 = vpop.f32.mrb[64].mxu0 }
0x20db   :  { %v2186_v23 = vrot.slane %v2177_v48, %v4156_v1  ;;  %v3401_v51 = vpop.f32.mrb[65].mxu0 }
0x20dc   :  { %v2180_v61 = vpop.f32.mrb[66].mxu0  ;;  %v3536_v51 = vld [vmem:[%s4564_s15 + $0x10] sm:$0xff]  }
0x20dd   :  { %v2187_v53 = vadd.f32 %v2186_v23, %v2135_v62  ;;  %v2188_v54 = vadd.f32 %v2186_v23, %v2139_v42  ;;  %v3402_v56 = vpop.f32.mrb[67].mxu0  ;;  %v3535_v23 = vld [vmem:[%s4564_s15 + $0x8] sm:$0xff]   ;;  %v3068_v42 = vld [vmem:[%s4562_s13 + $0x6] ss:$0 sm:$0xff] }
0x20df   :  { %vm2189_vm9 = vcmp.gt.f32.partialorder %v2187_v53, 0.0  ;;  %v2191_v58 = vmul.f32 0.2, %v2187_v53  ;;  %vm2190_vm10 = vcmp.gt.f32.partialorder %v2188_v54, 0.0  ;;  %v2192_v60 = vmul.f32 0.2, %v2188_v54 }
0x20e1   :  { %v2193_v63 = vsel %vm2189_vm9, %v2187_v53, %v2191_v58  ;;  %v2194_v0 = vsel %vm2190_vm10, %v2188_v54, %v2192_v60 }
0x20e2   :  { %v2197_v3 = vsel %vm2195_vm7, %v2193_v63, -1e+30  ;;  %v2198_v4 = vsel %vm2196_vm8, %v2194_v0, -1e+30 }
0x20e3   :  { %v2200_v6 = vsel %vm2199_vm11, %v2197_v3, -inf  ;;  %v2204_v8 = vsel %vm2203_vm12, %v2198_v4, -inf }
0x20e4   :  { %2201 = vmax.xlane.f32.xlu1 %v2200_v6  ;;  %2205 = vmax.xlane.f32.xlu0 %v2204_v8 }
0x2171   :  { %v2202_v9 = vpop.xlane.xlu1 %2201  ;;  %v2206_v2 = vpop.xlane.xlu0 %2205 }
0x2172   :  { %v2207_v11 = vsub.f32 %v2197_v3, %v2202_v9  ;;  %v2208_v12 = vsub.f32 %v2198_v4, %v2206_v2 }
0x2174   :  { %v2209_v55 = vmul.f32 1.442695, %v2207_v11  ;;  %v2211_v13 = vmul.f32 1.442695, %v2208_v12 }
0x2176   :  { %3642 = vpow2.f32 %v2209_v55 }
0x2177   :  { %3644 = vpow2.f32 %v2211_v13 }
0x2180   :  { %v3643_v15 = vpop.eup %3642 }
0x2181   :  { %v3645_v16 = vpop.eup %3644  ;;  %v2213_v45 = vmul.f32 %v3643_v15, %v2117_v52  ;;  %v3065_v52 = vld [vmem:[%s4561_s12 + $0x6] sm:$0x1] }
0x2182   :  { %v2214_v17 = vmul.f32 %v3645_v16, %v2118_v32  ;;  %v3537_v32 = vld [vmem:[%s4564_s15 + $0x18] sm:$0xff]   ;;  %v3063_v16 = vld [vmem:[%s4558_s9 + $0x10] sm:$0xff] }
0x2183   :  { %v2215_v18 = vsel %vm2199_vm11, %v2213_v45, 0.0  ;;  %vm2445_vm1 = vcmp.gt.f32.partialorder %v3063_v16, 0.0 }
0x2184   :  { %2216 = vadd.xlane.f32.xlu1 %v2215_v18  ;;  %v2218_v20 = vsel %vm2203_vm12, %v2214_v17, 0.0  ;;  %v3064_v18 = vld [vmem:[%s4558_s9 + $0x18] sm:$0xf] }
0x2185   :  { %2219 = vadd.xlane.f32.xlu0 %v2218_v20 }
0x2211   :  { %v2217_v10 = vpop.xlane.xlu1 %2216 }
0x2212   :  { %v2221_v28 = vmax.f32 %v2217_v10, 1e-20  ;;  %v2220_v29 = vpop.xlane.xlu0 %2219 }
0x2213   :  { %v2222_v21 = vmax.f32 %v2220_v29, 1e-20 }
0x2214   :  { %3646 = vrcp.f32 %v2221_v28 }
0x2215   :  { %3648 = vrcp.f32 %v2222_v21 }
0x221e   :  { %v3647_v25 = vpop.eup %3646 }
0x221f   :  { %v3649_v26 = vpop.eup %3648  ;;  %v2225_v14 = vmul.f32 %v3647_v25, %v2213_v45 }
0x2220   :  { %v2226_v30 = vmul.f32 %v3649_v26, %v2214_v17 }
0x2222   :  { %v2227_v59 = vpack.c.bf16 %v2226_v30, %v2225_v14 }
0x2224   :  { %3406 = vmatmul.mubr.msk.bf16.vlgmr.msra.gmra.mrb[68].mxu0 %vm2199_vm11, %v2227_v59 }
0x2225   :  { %3423 = vmatprep.mubr.msk.bf16.mxu0 %vm3749_vm2, %v3748_v7 }
0x22f7   :  { %v2276_v34 = vpop.f32.mrb[68].mxu0 }
0x22f8   :  { %v2277_v35 = vadd.f32 %v3048_v57, %v2276_v34  ;;  %v3407_v36 = vpop.f32.mrb[69].mxu0 }
0x22f9   :  { %v2279_v37 = vpop.f32.mrb[70].mxu0 }
0x22fa   :  { %v2285_v38 = vmul.f32 0.01, %v2277_v35  ;;  %v2280_v40 = vadd.f32 %v3048_v57, %v2279_v37  ;;  %v3408_v41 = vpop.f32.mrb[71].mxu0  ;;  %vm2283_vm13 = vcmp.gt.f32.partialorder %v2277_v35, 0.0 }
0x22fc   :  { %vm2284_vm14 = vcmp.gt.f32.partialorder %v2280_v40, 0.0  ;;  %v2286_v43 = vmul.f32 0.01, %v2280_v40  ;;  %v2287_v44 = vsel %vm2283_vm13, %v2277_v35, %v2285_v38 }
0x22fe   :  { %v2288_v46 = vsel %vm2284_vm14, %v2280_v40, %v2286_v43 }
0x22ff   :  { %v2289_v62 = vpack.c.bf16 %v2288_v46, %v2287_v44 }
0x2301   :  { %3418 = vmatmul.mubr.msk.bf16.vlgmr.msra.gmra.mrb[44].mxu1 %vm1080_vm3, %v2289_v62  ;;  %v2324_v48 = vsel %vm1080_vm3, %v2289_v62, 0 }
0x2302   :  { %3434 = vmatpush3.bf16.msra.mxu1 %v3534_v47  ;;  %3422 = vmatpush3.bf16.xpose.msra.mxu0 %v2324_v48 }
0x2303   :  { %3435 = vmatprep.subr.bf16.mxu1 %v3748_v7  ;;  %3441 = vmatprep.mubr.msk.bf16.mxu1 %vm3749_vm2, %v3748_v7 }
0x2304   :  { %3427 = vmatprep.subr.bf16.mxu0 %v3748_v7 }
0x2306   :  { %3436 = vmatpush3.bf16.msra.mxu1 %v3535_v23  ;;  %v3538_v23 = vld [vmem:[%s4564_s15 + $0x20] sm:$0xff]  }
0x2307   :  { %3437 = vmatprep.subr.bf16.mxu1 %v3748_v7 }
0x2309   :  { %3424 = vmatmul.mubr.msk.bf16.vlgmr.msra.gmra.mrb[72].mxu0 %vm1080_vm3, %v3065_v52  ;;  %v2994_v52 = vld [vmem:[%s4563_s14 + $0x2] ss:$0 sm:$0xff] }
0x230a   :  { %3438 = vmatpush3.bf16.msra.mxu1 %v3536_v51  ;;  %3429 = vmatprep.mubr.msk.bf16.mxu0 %vm3749_vm2, %v3748_v7 }
0x230b   :  { %3439 = vmatprep.subr.bf16.mxu1 %v3748_v7 }
0x230e   :  { %3440 = vmatpush3.bf16.msra.mxu1 %v3537_v32  ;;  %v3539_v32 = vld [vmem:[%s4564_s15 + $0x28] sm:$0xff]  }
0x230f   :  { %3465 = vmatprep.subr.bf16.mxu1 %v3748_v7 }
0x2311   :  { %3442 = vmatmul.mubr.msk.bf16.vlgmr.msra.gmra.mrb[48].mxu1 %vm1080_vm3, %v4067_v50 }
0x2312   :  { %3481 = vmatprep.mubr.msk.bf16.mxu1 %vm3749_vm2, %v3748_v7 }
0x23d4   :  { %v2360_v61 = vpop.f32.mrb[44].mxu1 }
0x23d5   :  { %v2382_v53 = vmul.f32 %v3068_v42, %v2360_v61  ;;  %v3419_v54 = vpop.f32.mrb[45].mxu1 }
0x23d6   :  { %v2363_v56 = vpop.f32.mrb[46].mxu1  ;;  %v3540_v54 = vld [vmem:[%s4564_s15 + $0x30] sm:$0xff]  }
0x23d7   :  { %v2383_v58 = vmul.f32 %v3068_v42, %v2363_v56  ;;  %v2476_v60 = vpack.c.bf16 %v2363_v56, %v2360_v61  ;;  %v3420_v63 = vpop.f32.mrb[47].mxu1  ;;  %v2384_v0 = vsel %vm1080_vm3, %v2382_v53, 0.0  ;;  %v2986_v42 = vld [vmem:[%s4563_s14 + $0x1] ss:$0 sm:$0xff]  ;;  %v1543_v61 = vadd.f32 %v2994_v52, %v4221_v39  ;;  %v3544_v52 = vld [vmem:[%s4566_s17 + $0x10] sm:$0xff]  }
0x23d8   :  { %2385 = vadd.xlane.f32.xlu1 %v2384_v0  ;;  %v1402_v53 = vadd.f32 %v2986_v42, %v4219_v27  ;;  %v3028_v0 = vld [vmem:[%s4563_s14 + $0x4] ss:$0 sm:$0xff] }
0x23d9   :  { %v2487_v3 = vsel %vm2238_vm6, %v2476_v60, 0  ;;  %v2387_v50 = vsel %vm2136_vm4, %v2383_v58, 0.0  ;;  %vm2446_vm6 = vcmp.gt.f32.partialorder %v3064_v18, 0.0  ;;  %v1549_v56 = vmul.f32 0.01, %v1543_v61  ;;  %v3541_v60 = vld [vmem:[%s4564_s15 + $0x38] sm:$0xff]  }
0x23da   :  { %3428 = vmatpush3.bf16.msra.mxu0 %v2487_v3  ;;  %2388 = vadd.xlane.f32.xlu0 %v2387_v50  ;;  %vm1548_vm7 = vcmp.gt.f32.partialorder %v1543_v61, 0.0  ;;  %v1408_v58 = vmul.f32 0.01, %v1402_v53  ;;  %vm1407_vm8 = vcmp.gt.f32.partialorder %v1402_v53, 0.0  ;;  %v2035_v3 = vadd.f32 %v3028_v0, %v4334_v5  ;;  %v3070_v50 = vld [vmem:[%s4563_s14 + $0x6] ss:$0 sm:$0xff] }
0x23db   :  { %3445 = vmatprep.subr.bf16.mxu0 %v3748_v7  ;;  %v4446_v39 = vsel %vm1548_vm7, %v1543_v61, %v1549_v56  ;;  %v3546_v42 = vld [vmem:[%s4566_s17 + $0x20] sm:$0xff]   ;;  %v3547_v61 = vld [vmem:[%s4566_s17 + $0x28] sm:$0xff]  }
0x23dc   :  { %v2427_v4 = vpop.f32.mrb[72].mxu0  ;;  %v4448_v27 = vsel %vm1407_vm8, %v1402_v53, %v1408_v58  ;;  %vm2040_vm9 = vcmp.gt.f32.partialorder %v2035_v3, 0.0  ;;  %v3548_v53 = vld [vmem:[%s4566_s17 + $0x30] sm:$0xff]  }
0x23dd   :  { %v3425_v6 = vpop.f32.mrb[73].mxu0  ;;  %v2436_v13 = vrot.slane %v2427_v4, %v4156_v1  ;;  %v2532_v63 = vpack.c.bf16 %v4446_v39, %v4448_v27  ;;  %v2979_v4 = vld [vmem:[%s4563_s14] ss:$0 sm:$0xff] }
0x23de   :  { %v2430_v8 = vpop.f32.mrb[74].mxu0 }
0x23df   :  { %v3426_v9 = vpop.f32.mrb[75].mxu0  ;;  %v2041_v8 = vmul.f32 0.01, %v2035_v3 }
0x23e1   :  { %v4466_v5 = vsel %vm2040_vm9, %v2035_v3, %v2041_v8 }
0x23e4   :  { %v4407_v2 = vpop.f32.mrb[48].mxu1 }
0x23e5   :  { %v3443_v11 = vpop.f32.mrb[49].mxu1 }
0x23e6   :  { %v2611_v12 = vpop.f32.mrb[50].mxu1 }
0x23e7   :  { %v3444_v55 = vpop.f32.mrb[51].mxu1 }
0x23e8   :  { %v1254_v55 = vadd.f32 %v2979_v4, %v4217_v19 }
0x2465   :  { %v2386_v15 = vpop.xlane.xlu1 %2385 }
0x2466   :  { %v2437_v45 = vadd.f32 %v2436_v13, %v2386_v15 }
0x2467   :  { %v2389_v17 = vpop.xlane.xlu0 %2388 }
0x2468   :  { %v2441_v20 = vmul.f32 0.2, %v2437_v45  ;;  %v2438_v22 = vadd.f32 %v2436_v13, %v2389_v17  ;;  %vm2439_vm15 = vcmp.gt.f32.partialorder %v2437_v45, 0.0  ;;  %v1260_v17 = vmul.f32 0.01, %v1254_v55 }
0x246a   :  { %v2442_v24 = vmul.f32 0.2, %v2438_v22  ;;  %v2443_v10 = vsel %vm2439_vm15, %v2437_v45, %v2441_v20  ;;  %vm2440_vm4 = vcmp.gt.f32.partialorder %v2438_v22, 0.0  ;;  %v3072_v20 = vld [vmem:[%s4565_s16] ss:$0 sm:$0xff] }
0x246b   :  { %v2447_v1 = vsel %vm2445_vm1, %v2443_v10, -1e+30  ;;  %v2609_v10 = vadd.f32 %v3072_v20, %v4407_v2 }
0x246c   :  { %v2449_v28 = vsel %vm2199_vm11, %v2447_v1, -inf  ;;  %v2444_v29 = vsel %vm2440_vm4, %v2438_v22, %v2442_v24  ;;  %v3087_v22 = vld [vmem:[%s4565_s16 + $0x1] ss:$0 sm:$0xff] }
0x246d   :  { %2450 = vmax.xlane.f32.xlu1 %v2449_v28  ;;  %v2448_v21 = vsel %vm2446_vm6, %v2444_v29, -1e+30 }
0x246e   :  { %v2452_v25 = vsel %vm2203_vm12, %v2448_v21, -inf }
0x246f   :  { %2453 = vmax.xlane.f32.xlu0 %v2452_v25 }
0x24fa   :  { %v2451_v26 = vpop.xlane.xlu1 %2450 }
0x24fb   :  { %v2455_v14 = vsub.f32 %v2447_v1, %v2451_v26 }
0x24fc   :  { %v2454_v30 = vpop.xlane.xlu0 %2453 }
0x24fd   :  { %v2457_v59 = vmul.f32 1.442695, %v2455_v14  ;;  %v2456_v31 = vsub.f32 %v2448_v21, %v2454_v30 }
0x24ff   :  { %3650 = vpow2.f32 %v2457_v59  ;;  %v2459_v33 = vmul.f32 1.442695, %v2456_v31 }
0x2501   :  { %3652 = vpow2.f32 %v2459_v33 }
0x2509   :  { %v3651_v57 = vpop.eup %3650 }
0x250a   :  { %v2461_v34 = vmul.f32 %v3651_v57, %v3063_v16 }
0x250b   :  { %v3653_v35 = vpop.eup %3652 }
0x250c   :  { %v2463_v36 = vsel %vm2199_vm11, %v2461_v34, 0.0  ;;  %v2462_v37 = vmul.f32 %v3653_v35, %v3064_v18 }
0x250d   :  { %2464 = vadd.xlane.f32.xlu1 %v2463_v36 }
0x250e   :  { %v2466_v38 = vsel %vm2203_vm12, %v2462_v37, 0.0 }
0x250f   :  { %2467 = vadd.xlane.f32.xlu0 %v2466_v38 }
0x259a   :  { %v2465_v40 = vpop.xlane.xlu1 %2464 }
0x259b   :  { %v2469_v41 = vmax.f32 %v2465_v40, 1e-20 }
0x259c   :  { %v2468_v43 = vpop.xlane.xlu0 %2467 }
0x259d   :  { %3654 = vrcp.f32 %v2469_v41  ;;  %v2470_v44 = vmax.f32 %v2468_v43, 1e-20 }
0x259f   :  { %3656 = vrcp.f32 %v2470_v44 }
0x25a7   :  { %v3655_v46 = vpop.eup %3654 }
0x25a8   :  { %v2473_v62 = vmul.f32 %v3655_v46, %v2461_v34 }
0x25a9   :  { %v3657_v47 = vpop.eup %3656 }
0x25aa   :  { %v2474_v48 = vmul.f32 %v3657_v47, %v2462_v37 }
0x25ac   :  { %v2475_v51 = vpack.c.bf16 %v2474_v48, %v2473_v62 }
0x25ae   :  { %3430 = vmatmul.mubr.msk.bf16.vlgmr.msra.gmra.mrb[76].mxu0 %vm2199_vm11, %v2475_v51  ;;  %vm1259_vm11 = vcmp.gt.f32.partialorder %v1254_v55, 0.0  ;;  %v3543_v51 = vld [vmem:[%s4566_s17 + $0x8] sm:$0xff]  }
0x25af   :  { %3446 = vmatpush3.bf16.msra.mxu0 %v3538_v23  ;;  %3453 = vmatprep.mubr.msk.bf16.mxu0 %vm3749_vm2, %v3748_v7  ;;  %v4475_v18 = vsel %vm1259_vm11, %v1254_v55, %v1260_v17  ;;  %v3542_v23 = vld [vmem:[%s4566_s17] sm:$0xff]  }
0x25b0   :  { %3447 = vmatprep.subr.bf16.mxu0 %v3748_v7  ;;  %v2534_v19 = vpack.c.bf16 %v4475_v18, %v4475_v18  ;;  %3466 = vmatpush3.bf16.msra.mxu1 %v3542_v23 }
0x25b1   :  { %3467 = vmatprep.subr.bf16.mxu1 %v3748_v7 }
0x25b3   :  { %3448 = vmatpush3.bf16.msra.mxu0 %v3539_v32  ;;  %v3545_v32 = vld [vmem:[%s4566_s17 + $0x18] sm:$0xff]  }
0x25b4   :  { %3449 = vmatprep.subr.bf16.mxu0 %v3748_v7  ;;  %3468 = vmatpush3.bf16.msra.mxu1 %v3543_v51 }
0x25b5   :  { %3469 = vmatprep.subr.bf16.mxu1 %v3748_v7 }
0x25b7   :  { %3450 = vmatpush3.bf16.msra.mxu0 %v3540_v54 }
0x25b8   :  { %3451 = vmatprep.subr.bf16.mxu0 %v3748_v7  ;;  %3470 = vmatpush3.bf16.msra.mxu1 %v3544_v52 }
0x25b9   :  { %3471 = vmatprep.subr.bf16.mxu1 %v3748_v7 }
0x25bb   :  { %3452 = vmatpush3.bf16.msra.mxu0 %v3541_v60 }
0x25bc   :  { %3472 = vmatpush3.bf16.msra.mxu1 %v3545_v32 }
0x25bd   :  { %3473 = vmatprep.subr.bf16.mxu1 %v3748_v7 }
0x25be   :  { %3454 = vmatmul.mubr.msk.bf16.vlgmr.msra.gmra.mrb[80].mxu0 %vm1080_vm3, %v2532_v63 }
0x25bf   :  { %3457 = vmatprep.mubr.msk.bf16.mxu0 %vm3749_vm2, %v3748_v7 }
0x25c0   :  { %3474 = vmatpush3.bf16.msra.mxu1 %v3546_v42 }
0x25c1   :  { %3475 = vmatprep.subr.bf16.mxu1 %v3748_v7 }
0x25c4   :  { %3476 = vmatpush3.bf16.msra.mxu1 %v3547_v61 }
0x25c5   :  { %3477 = vmatprep.subr.bf16.mxu1 %v3748_v7 }
0x25c8   :  { %3478 = vmatpush3.bf16.msra.mxu1 %v3548_v53 }
0x25c9   :  { %3479 = vmatprep.subr.bf16.mxu1 %v3748_v7 }
0x2681   :  { %v2523_v6 = vpop.f32.mrb[76].mxu0 }
0x2682   :  { %v2524_v9 = vadd.f32 %v3070_v50, %v2523_v6  ;;  %v3431_v11 = vpop.f32.mrb[77].mxu0 }
0x2683   :  { %v2526_v12 = vpop.f32.mrb[78].mxu0 }
0x2684   :  { %vm2529_vm10 = vcmp.gt.f32.partialorder %v2524_v9, 0.0  ;;  %v2530_v13 = vmul.f32 0.01, %v2524_v9  ;;  %v3432_v15 = vpop.f32.mrb[79].mxu0 }
0x2686   :  { %v4468_v16 = vsel %vm2529_vm10, %v2524_v9, %v2530_v13 }
0x2687   :  { %v2533_v45 = vpack.c.bf16 %v4468_v16, %v4466_v5 }
0x2689   :  { %3458 = vmatmul.mubr.msk.bf16.gmra.mrb[84].mxu0 %vm1080_vm3, %v2533_v45 }
0x268a   :  { %3461 = vmatprep.mubr.msk.bf16.mxu0 %vm3749_vm2, %v3748_v7 }
0x2691   :  { %v2698_v24 = vpop.f32.mrb[80].mxu0  ;;  %3462 = vmatmul.mubr.msk.bf16.gmra.mrb[88].mxu0 %vm1080_vm3, %v2534_v19 }
0x2692   :  { %v2699_v1 = vadd.f32 %v3087_v22, %v2698_v24  ;;  %v3455_v28 = vpop.f32.mrb[81].mxu0 }
0x2693   :  { %v2701_v29 = vpop.f32.mrb[82].mxu0 }
0x2694   :  { %v2702_v21 = vadd.f32 %v3087_v22, %v2701_v29  ;;  %v3456_v25 = vpop.f32.mrb[83].mxu0  ;;  %v2720_v26 = vmul.f32 %v2699_v1, %v2609_v10 }
0x2696   :  { %v2725_v14 = vsel %vm131_vm0, %v2720_v26, 0.0  ;;  %v2721_v30 = vmul.f32 %v2702_v21, %v2609_v10 }
0x2697   :  { %2726 = vadd.xlane.f32.xlu1 %v2725_v14 }
0x2698   :  { %v2728_v59 = vsel %vm131_vm0, %v2721_v30, 0.0 }
0x2699   :  { %2729 = vadd.xlane.f32.xlu0 %v2728_v59 }
0x2724   :  { %v2727_v54 = vpop.xlane.xlu1 %2726 }
0x2725   :  { %v2740_v63 = vmul.f32 0.25, %v2727_v54 }
0x2726   :  { %v2730_v56 = vpop.xlane.xlu0 %2729 }
0x2727   :  { %v2741_v58 = vmul.f32 0.25, %v2730_v56 }
0x2729   :  { %v2745_v50 = vmax.f32 %v2740_v63, %v2741_v58 }
0x275c   :  { %v2706_v31 = vpop.f32.mrb[84].mxu0 }
0x275d   :  { %v2707_v33 = vadd.f32 %v3087_v22, %v2706_v31  ;;  %v3459_v57 = vpop.f32.mrb[85].mxu0 }
0x275e   :  { %v2709_v34 = vpop.f32.mrb[86].mxu0 }
0x275f   :  { %v2710_v35 = vadd.f32 %v3087_v22, %v2709_v34  ;;  %v3460_v36 = vpop.f32.mrb[87].mxu0  ;;  %v2722_v2 = vmul.f32 %v2707_v33, %v2609_v10  ;;  %v3549_v34 = vld [vmem:[%s4566_s17 + $0x38] sm:$0xff]  }
0x2760   :  { %3480 = vmatpush3.bf16.msra.mxu1 %v3549_v34 }
0x2761   :  { %v2731_v37 = vsel %vm131_vm0, %v2722_v2, 0.0  ;;  %v2723_v38 = vmul.f32 %v2710_v35, %v2609_v10 }
0x2762   :  { %2732 = vadd.xlane.f32.xlu1 %v2731_v37 }
0x2763   :  { %v2734_v40 = vsel %vm131_vm0, %v2723_v38, 0.0 }
0x2764   :  { %v2714_v41 = vpop.f32.mrb[88].mxu0  ;;  %2735 = vadd.xlane.f32.xlu0 %v2734_v40 }
0x2765   :  { %v2715_v43 = vadd.f32 %v3087_v22, %v2714_v41  ;;  %v3463_v44 = vpop.f32.mrb[89].mxu0 }
0x2766   :  { %v2717_v46 = vpop.f32.mrb[90].mxu0 }
0x2767   :  { %v3464_v47 = vpop.f32.mrb[91].mxu0  ;;  %v2724_v62 = vmul.f32 %v2715_v43, %v2609_v10 }
0x2769   :  { %v2737_v48 = vsel %vm131_vm0, %v2724_v62, 0.0 }
0x276a   :  { %2738 = vadd.xlane.f32.xlu1 %v2737_v48 }
0x27ef   :  { %v2733_v60 = vpop.xlane.xlu1 %2732 }
0x27f0   :  { %v2742_v0 = vmul.f32 0.25, %v2733_v60 }
0x27f1   :  { %v2736_v3 = vpop.xlane.xlu0 %2735 }
0x27f2   :  { %v2746_v4 = vmax.f32 %v2745_v50, %v2742_v0  ;;  %v2743_v6 = vmul.f32 0.25, %v2736_v3 }
0x27f4   :  { %v2747_v9 = vmax.f32 %v2746_v4, %v2743_v6 }
0x27f7   :  { %v2739_v8 = vpop.xlane.xlu1 %2738 }
0x27f8   :  { %v2744_v11 = vmul.f32 0.25, %v2739_v8 }
0x27fa   :  { %v2748_v12 = vmax.f32 %v2747_v9, %v2744_v11 }
0x27fc   :  { %v2749_v55 = vsub.f32 %v2740_v63, %v2748_v12  ;;  %v2752_v13 = vsub.f32 %v2741_v58, %v2748_v12  ;;  %v2755_v15 = vsub.f32 %v2742_v0, %v2748_v12  ;;  %v2758_v45 = vsub.f32 %v2743_v6, %v2748_v12 }
0x27fd   :  { %v2761_v20 = vsub.f32 %v2744_v11, %v2748_v12 }
0x27fe   :  { %v2750_v17 = vmul.f32 1.442695, %v2749_v55  ;;  %v2753_v7 = vmul.f32 1.442695, %v2752_v13  ;;  %v2756_v19 = vmul.f32 1.442695, %v2755_v15 }
0x27ff   :  { %v2759_v22 = vmul.f32 1.442695, %v2758_v45  ;;  %v2762_v24 = vmul.f32 1.442695, %v2761_v20 }
0x2800   :  { %3658 = vpow2.f32 %v2750_v17 }
0x2801   :  { %3660 = vpow2.f32 %v2753_v7 }
0x2802   :  { %3662 = vpow2.f32 %v2756_v19 }
0x2803   :  { %3664 = vpow2.f32 %v2759_v22 }
0x2804   :  { %3666 = vpow2.f32 %v2762_v24 }
0x280a   :  { %v3659_v10 = vpop.eup %3658 }
0x280b   :  { %v3661_v1 = vpop.eup %3660 }
0x280c   :  { %v2764_v28 = vadd.f32 %v3661_v1, %v3659_v10  ;;  %v3663_v29 = vpop.eup %3662 }
0x280d   :  { %v3665_v25 = vpop.eup %3664 }
0x280e   :  { %v2765_v21 = vadd.f32 %v3663_v29, %v2764_v28  ;;  %v3667_v14 = vpop.eup %3666 }
0x2810   :  { %v2766_v26 = vadd.f32 %v3665_v25, %v2765_v21 }
0x2812   :  { %v2767_v30 = vadd.f32 %v3667_v14, %v2766_v26 }
0x2814   :  { %3668 = vrcp.f32 %v2767_v30 }
0x281e   :  { %v3669_v59 = vpop.eup %3668 }
0x281f   :  { %v2769_v31 = vmul.f32 %v3669_v59, %v3659_v10  ;;  %v2772_v33 = vmul.f32 %v3669_v59, %v3661_v1  ;;  %v2775_v57 = vmul.f32 %v3669_v59, %v3663_v29  ;;  %v2778_v2 = vmul.f32 %v3669_v59, %v3665_v25 }
0x2820   :  { %v2781_v40 = vmul.f32 %v3669_v59, %v3667_v14 }
0x2821   :  { %v2770_v35 = vmul.f32 %v2769_v31, %v4448_v27  ;;  %v2773_v36 = vmul.f32 %v2772_v33, %v4446_v39  ;;  %v2776_v38 = vmul.f32 %v2775_v57, %v4466_v5  ;;  %v2779_v43 = vmul.f32 %v2778_v2, %v4468_v16  ;;  %v3095_v5 = vld [vmem:[%s4567_s18] ss:$0 sm:$0xff]  ;;  %s3753_s18 = smov [#allocation7]  }
0x2822   :  { %v2782_v46 = vmul.f32 %v2781_v40, %v4475_v18 }
0x2823   :  { %v2774_v37 = vadd.f32 %v2773_v36, %v2770_v35 }
0x2825   :  { %v2777_v41 = vadd.f32 %v2776_v38, %v2774_v37 }
0x2827   :  { %v2780_v44 = vadd.f32 %v2779_v43, %v2777_v41 }
0x2829   :  { %v2783_v47 = vadd.f32 %v2782_v46, %v2780_v44 }
0x282b   :  { %2785 = vrot.lane.b32.xlu0 %v2783_v47, %s3751_s4  ;;  %s2921_s4 = sshll.u32 %s3753_s18, 4  ;;  %s2922_s4 = int_to_ptr.vmem [resolvable:$true] %s2921_s4 }
0x282c   :  { %s3718_s10 = scalar_lea.vmem %s2922_s4, 128  ;;  %p3723_p3 = scmp.lt.s32.totalorder %s2922_s4, %s2922_s4 }
0x282d   :  { %p3719_p2 = scmp.ne.s32.totalorder %s2922_s4, %s3718_s10  ;;  %p3724_p4 = scmp.lt.s32.totalorder %s3718_s10, %s3718_s10 }
0x282f   :  { %p3725_p5 = por %p3724_p4, %p3723_p3 }
0x2831   :  { %p3726_p6 = pnand %p3725_p5, %p3719_p2 }
0x289d   :  { %v2786_v62 = vpop.permute.xlu0 %2785 }
0x289e   :  { %v2788_v27 = vsel %vm1080_vm3, %v4062_v49, %v2786_v62 }
0x289f   :  { %v2789_v39 = vpack.c.bf16 %v2788_v27, %v2788_v27 }
0x28a1   :  { %3482 = vmatmul.mubr.bf16.vlgmr.msra.gmra.mrb[52].mxu1 %v2789_v39 }
0x2974   :  { %v2895_v48 = vpop.f32.mrb[52].mxu1 }
0x2975   :  { %v2896_v23 = vadd.f32 %v3095_v5, %v2895_v48  ;;  %v3483_v51 = vpop.f32.mrb[53].mxu1 }
0x2976   :  { %v2898_v16 = vpop.f32.mrb[54].mxu1 }
0x2977   :  { %v3484_v52 = vpop.f32.mrb[55].mxu1  ;;  %v2901_v18 = vsel %vm995_vm5, %v2896_v23, -inf }
0x2978   :  { %2902 = vmax.xlane.f32.xlu1 %v2901_v18 }
0x2a05   :  { %v2903_v32 = vpop.xlane.xlu1 %2902 }
0x2a06   :  { %v2904_v42 = vsub.f32 %v2896_v23, %v2903_v32 }
0x2a08   :  { %v2905_v61 = vmul.f32 1.442695, %v2904_v42 }
0x2a0a   :  { %3670 = vpow2.f32 %v2905_v61 }
0x2a14   :  { %v3671_v53 = vpop.eup %3670 }
0x2a15   :  { %v2907_v49 = vsel %vm995_vm5, %v3671_v53, 0.0 }
0x2a16   :  { %2908 = vadd.xlane.f32.xlu1 %v2907_v49 }
0x2aa3   :  { %v2909_v54 = vpop.xlane.xlu1 %2908 }
0x2aa4   :  { %3672 = vlog2.f32 %v2909_v54 }
0x2aae   :  { %v3673_v56 = vpop.eup %3672 }
0x2aaf   :  { %v2911_v58 = vmul.f32 0.6931472, %v3673_v56 }
0x2ab1   :  { %v2912_v60 = vadd.f32 %v2911_v58, %v2903_v32 }
0x2ab3   :  { %v2913_v63 = vsub.f32 %v2896_v23, %v2912_v60 }
0x2ab5   :  { %2914 = vst.msk [vmem:[#allocation7] sm:$0xff] %vm995_vm5, %v2913_v63 }
0x2ab6   :  { %3729 = shalt.err (!%p3726_p6)
}
0x2ab7   :  { %s3730_s25 = scalar_lea.hbm %s4568_s19, 128 }
0x2ab8   :  { %p3731_p7 = scmp.ne.s32.totalorder %s4568_s19, %s3730_s25  ;;  %p3734_p8 = scmp.lt.u32.totalorder %s3730_s25, %s4568_s19 }
0x2aba   :  { %p3736_p9 = pnand %p3734_p8, %p3731_p7 }
0x2abc   :  { %3739 = shalt.err (!%p3736_p9)
}
0x2abd   :  { %2924 = dma.vmem_to_hbm [thread:$0]  %s2922_s4, 128, %s4568_s19, [#allocation4]  }
0x2abe   :  { %3744 = dma.done.wait [#allocation4], 128  }
0x2abf   :  { %3745 = vsyncadd [#allocation4], 4294967168 }
0x2ac0   :  { %2928 = vsyncpa [#allocation3], 1 }
0x2ac1   :  { %2929 = vsyncpa [#allocation6], 1 }
0x2ac2   :  { %2930 = vsyncpa [#allocation4], 1 }

</bundles_post_ra>
